<compile_context>
chip_gen: v7x
topology: tpu7x:2x2x1
jax: 0.10.0
libtpu: 0.0.40
codegen_flags: <defaults>
</compile_context>

<pallas_src>
import functools

import jax
import jax.numpy as jnp
from jax import lax
from jax.experimental import pallas as pl
from jax.experimental.pallas import tpu as pltpu


# ----------------------------------------------------------------------------
# mask helpers
# ----------------------------------------------------------------------------
def _live_hw_taps(kH, kW, mask_type):
    """(kh, kw) positions kept by the PixelCNN 'A'/'B' mask (odd kH/kW assumed)."""
    assert mask_type in ("A", "B")
    b = 1 if mask_type == "B" else 0
    return [(kh, kw) for kh in range(kH) for kw in range(kW)
            if kh < kH // 2 or (kh == kH // 2 and kw < kW // 2 + b)]


def make_pixelcnn_mask(cout, cin, kD, kH, kW, mask_type):
    """Full (Cout, Cin, kD, kH, kW) mask (only used by the pure-JAX reference)."""
    mask = jnp.zeros((cout, cin, kD, kH, kW), jnp.float32)
    for (kh, kw) in _live_hw_taps(kH, kW, mask_type):
        mask = mask.at[:, :, :, kh, kw].set(1.0)
    return mask


# ----------------------------------------------------------------------------
# Pallas kernel: fused  h = P@Wh + bh ; g = sigmoid(P@Wg + bg) ; out = h * g
# ----------------------------------------------------------------------------
def _gated_kernel(p_ref, w_ref, b_ref, o_ref, *, cout):
    # single MXU pass over the row tile: (tm, Kp) @ (Kp, 2*Cout) with f32 accumulate
    acc = jnp.dot(p_ref[...], w_ref[...], preferred_element_type=jnp.float32)
    acc = acc + b_ref[...]                      # bias broadcast in f32
    h = acc[:, :cout]
    g = acc[:, cout:]
    o_ref[...] = (h * jax.nn.sigmoid(g)).astype(o_ref.dtype)


# ----------------------------------------------------------------------------
# wrapper
# ----------------------------------------------------------------------------
def masked_gated_conv3d(x, wh, bh, wg, bg, *, mask_type="A", padding=(1, 1, 1),
                        tile_m=2048, compute_dtype=jnp.bfloat16):
    """Forward of MaskedGatedConv3d.  x: (N, Cin, D, H, W), NCDHW like PyTorch."""
    N, Cin, D, H, W = x.shape
    Cout, Cin_w, kD, kH, kW = wh.shape
    assert Cin_w == Cin

    pd, ph, pw = padding
    Do = D + 2 * pd - kD + 1
    Ho = H + 2 * ph - kH + 1
    Wo = W + 2 * pw - kW + 1

    live = _live_hw_taps(kH, kW, mask_type)      # masked taps dropped entirely
    n_live = len(live)
    T = kD * n_live
    K = Cin * T
    M = N * Do * Ho * Wo

    # ---- glue: reduced im2col over live taps only (layout plumbing) ----
    xp = jnp.pad(x, ((0, 0), (0, 0), (pd, pd), (ph, ph), (pw, pw)))
    slices = [xp[:, :, kd:kd + Do, kh:kh + Ho, kw:kw + Wo]
              for kd in range(kD) for (kh, kw) in live]
    p = jnp.stack(slices, axis=2)                # (N, Cin, T, Do, Ho, Wo)
    p = jnp.transpose(p, (0, 3, 4, 5, 1, 2))     # (N, Do, Ho, Wo, Cin, T)
    patches = p.reshape(M, K)                    # K ordered (cin major, then kd, tap)

    # fused weights: gather live taps only (masking is implicit), concat h | g
    def _fuse(w):
        w_live = jnp.stack([w[:, :, kd, kh, kw] for kd in range(kD)
                            for (kh, kw) in live], axis=2)   # (Cout, Cin, T)
        return w_live.reshape(Cout, K).T                      # (K, Cout)

    w2 = jnp.concatenate([_fuse(wh), _fuse(wg)], axis=1)      # (K, 2*Cout)
    b2 = jnp.concatenate([bh, bg]).reshape(1, 2 * Cout).astype(jnp.float32)

    # pad K to a multiple of 16 for bf16 sublane packing (zero columns/rows -> no-op)
    Kp = ((K + 15) // 16) * 16
    if Kp != K:
        patches = jnp.pad(patches, ((0, 0), (0, Kp - K)))
        w2 = jnp.pad(w2, ((0, Kp - K), (0, 0)))

    # bf16 MXU inputs, f32 accumulate inside the kernel
    patches = patches.astype(compute_dtype)
    w2 = w2.astype(compute_dtype)

    # tile_m: multiple of 256 (MXU cadence), but keep >= 2 grid steps when possible
    # so the single "parallel" axis can shard across v7x's 2 TensorCores.
    tm = max(256, (tile_m // 256) * 256)
    half_m = 256 * max(1, -(-M // (2 * 256)))    # ceil(M/2) rounded up to mult of 256
    tm = min(tm, half_m)
    Mp = -(-M // tm) * tm
    if Mp != M:
        patches = jnp.pad(patches, ((0, Mp - M), (0, 0)))

    # ---- Pallas hot path ----
    out = pl.pallas_call(
        functools.partial(_gated_kernel, cout=Cout),
        out_shape=jax.ShapeDtypeStruct((Mp, Cout), x.dtype),
        grid_spec=pltpu.PrefetchScalarGridSpec(
            num_scalar_prefetch=0,
            grid=(Mp // tm,),
            in_specs=[
                pl.BlockSpec((tm, Kp), lambda i: (i, 0)),
                pl.BlockSpec((Kp, 2 * Cout), lambda i: (0, 0)),
                pl.BlockSpec((1, 2 * Cout), lambda i: (0, 0)),
            ],
            out_specs=pl.BlockSpec((tm, Cout), lambda i: (i, 0)),
        ),
        compiler_params=pltpu.CompilerParams(
            dimension_semantics=("parallel",)),
    )(patches, w2, b2)

    out = out[:M].reshape(N, Do, Ho, Wo, Cout)
    return jnp.transpose(out, (0, 4, 1, 2, 3))   # back to NCDHW


# ----------------------------------------------------------------------------
# pure-JAX reference (lax conv) for correctness check
# ----------------------------------------------------------------------------
def _reference(x, wh, bh, wg, bg, mask_type, padding):
    Cout, Cin, kD, kH, kW = wh.shape
    mask = make_pixelcnn_mask(Cout, Cin, kD, kH, kW, mask_type)
    pd, ph, pw = padding
    dn = ("NCDHW", "OIDHW", "NCDHW")

    def conv(w, b):
        y = lax.conv_general_dilated(
            x, w * mask, window_strides=(1, 1, 1),
            padding=[(pd, pd), (ph, ph), (pw, pw)], dimension_numbers=dn)
        return y + b[None, :, None, None, None]

    h = conv(wh, bh)
    g = jax.nn.sigmoid(conv(wg, bg))
    return h * g


if __name__ == "__main__":
    key = jax.random.PRNGKey(0)
    N, Cin, Cout = 2, 4, 8
    D, H, W = 8, 16, 16
    kD = kH = kW = 3
    padding = (1, 1, 1)
    mask_type = "A"

    k1, k2, k3, k4, k5 = jax.random.split(key, 5)
    fan_in = Cin * kD * kH * kW
    bound = 1.0 / (fan_in ** 0.5)
    x = jax.random.normal(k1, (N, Cin, D, H, W), jnp.float32)
    wh = jax.random.uniform(k2, (Cout, Cin, kD, kH, kW), jnp.float32, -bound, bound)
    bh = jax.random.uniform(k3, (Cout,), jnp.float32, -bound, bound)
    wg = jax.random.uniform(k4, (Cout, Cin, kD, kH, kW), jnp.float32, -bound, bound)
    bg = jax.random.uniform(k5, (Cout,), jnp.float32, -bound, bound)

    fwd = jax.jit(functools.partial(
        masked_gated_conv3d, mask_type=mask_type, padding=padding))
    out = fwd(x, wh, bh, wg, bg)
    jax.block_until_ready(out)
    assert out.shape == (N, Cout, D, H, W)

    # tight check: reference fed the same bf16-quantized inputs the kernel's MXU sees
    q = lambda a: a.astype(jnp.bfloat16).astype(jnp.float32)
    ref_q = _reference(q(x), q(wh), bh, q(wg), bg, mask_type, padding)
    assert jnp.allclose(out, ref_q, rtol=1e-3, atol=1e-3), \
        "mismatch vs bf16-quantized reference"

    # loose sanity check vs full-f32 reference (accounts for bf16 MXU inputs)
    ref = _reference(x, wh, bh, wg, bg, mask_type, padding)
    assert jnp.allclose(out, ref, rtol=2e-2, atol=2e-2), "mismatch vs f32 reference"

    print("KERNEL_OK")
</pallas_src>

<mosaic_0001>
module attributes {stable_mosaic.version = 11 : i64} {
  func.func @_gated_kernel(%arg0: i32, %arg1: memref<2048x48xbf16, #tpu.memory_space<vmem>>, %arg2: memref<48x16xbf16, #tpu.memory_space<vmem>>, %arg3: memref<1x16xf32, #tpu.memory_space<vmem>>, %arg4: memref<2048x8xf32, #tpu.memory_space<vmem>>) attributes {dimension_semantics = [#tpu.dimension_semantics<parallel>], iteration_bounds = array<i64: 2>, scalar_prefetch = 0 : i64, scratch_operands = 0 : i64, tpu.core_type = #tpu.core_type<tc>, window_params = [{transform_indices = @transform_0, window_bounds = array<i64: 2048, 48>}, {pipeline_mode = #tpu.pipeline_mode<synchronous>, transform_indices = @transform_1, window_bounds = array<i64: 48, 16>}, {pipeline_mode = #tpu.pipeline_mode<synchronous>, transform_indices = @transform_2, window_bounds = array<i64: 1, 16>}, {transform_indices = @transform_3, window_bounds = array<i64: 2048, 8>}]} {
    %c0 = arith.constant 0 : index
    %c0_0 = arith.constant 0 : index
    %0 = vector.load %arg1[%c0, %c0_0] : memref<2048x48xbf16, #tpu.memory_space<vmem>>, vector<2048x48xbf16>
    %c0_1 = arith.constant 0 : index
    %c0_2 = arith.constant 0 : index
    %1 = vector.load %arg2[%c0_1, %c0_2] : memref<48x16xbf16, #tpu.memory_space<vmem>>, vector<48x16xbf16>
    %cst = arith.constant dense<0.000000e+00> : vector<2048x16xf32>
    %2 = tpu.matmul %0, %1, %cst {dimension_numbers = #tpu.dot_dimension_numbers<[1], [0], [0], [1], [0, 0, 1, 1], [], []>} : vector<2048x48xbf16>, vector<48x16xbf16>, vector<2048x16xf32> -> vector<2048x16xf32>
    %c0_3 = arith.constant 0 : index
    %c0_4 = arith.constant 0 : index
    %3 = vector.load %arg3[%c0_3, %c0_4] : memref<1x16xf32, #tpu.memory_space<vmem>>, vector<1x16xf32>
    %4 = vector.broadcast %3 : vector<1x16xf32> to vector<2048x16xf32>
    %5 = arith.addf %2, %4 : vector<2048x16xf32>
    %6 = vector.extract_strided_slice %5 {offsets = [0, 0], sizes = [2048, 8], strides = [1, 1]} : vector<2048x16xf32> to vector<2048x8xf32>
    %7 = vector.extract_strided_slice %5 {offsets = [0, 8], sizes = [2048, 8], strides = [1, 1]} : vector<2048x16xf32> to vector<2048x8xf32>
    %8 = arith.negf %7 : vector<2048x8xf32>
    %9 = math.exp %8 : vector<2048x8xf32>
    %cst_5 = arith.constant 1.000000e+00 : f32
    %10 = vector.broadcast %cst_5 : f32 to vector<2048x8xf32>
    %11 = arith.addf %10, %9 : vector<2048x8xf32>
    %12 = arith.divf %10, %11 : vector<2048x8xf32>
    %13 = arith.mulf %6, %12 : vector<2048x8xf32>
    %c0_6 = arith.constant 0 : index
    %c0_7 = arith.constant 0 : index
    %14 = vector.load %arg4[%c0_6, %c0_7] : memref<2048x8xf32, #tpu.memory_space<vmem>>, vector<2048x8xf32>
    tpu.vector_store %arg4[%c0_6, %c0_7], %13 {strides = array<i32>} : memref<2048x8xf32, #tpu.memory_space<vmem>>, vector<2048x8xf32>,
    return
  }
  func.func @transform_0(%arg0: i32) -> (i32, i32) {
    %c0_i32 = arith.constant 0 : i32
    %c0_i32_0 = arith.constant 0 : i32
    return %arg0, %c0_i32 : i32, i32
  }
  func.func @transform_1(%arg0: i32) -> (i32, i32) {
    %c0_i32 = arith.constant 0 : i32
    %c0_i32_0 = arith.constant 0 : i32
    %c0_i32_1 = arith.constant 0 : i32
    return %c0_i32, %c0_i32_0 : i32, i32
  }
  func.func @transform_2(%arg0: i32) -> (i32, i32) {
    %c0_i32 = arith.constant 0 : i32
    %c0_i32_0 = arith.constant 0 : i32
    %c0_i32_1 = arith.constant 0 : i32
    return %c0_i32, %c0_i32_0 : i32, i32
  }
  func.func @transform_3(%arg0: i32) -> (i32, i32) {
    %c0_i32 = arith.constant 0 : i32
    %c0_i32_0 = arith.constant 0 : i32
    return %arg0, %c0_i32 : i32, i32
  }
}

</mosaic_0001>

<bundles_post_ra>
// kernel: masked_gated_conv3d.1
= control target key start
LH: loop header
LB: loop body
LE: loop exit
PB: predicated region body
PF: predicated region fallthrough
CT: control target
= control target key end

     0   :  { %s7797_s12 = smov 0   ;;  %s10966_s0 = inlined_call_operand.vmem [shape: bf16[4096,48], index: 0, kind: input, shape index: {}]   ;;  %s10967_s1 = inlined_call_operand.vmem [shape: bf16[48,16], index: 1, kind: input, shape index: {}]   ;;  %s10968_s2 = inlined_call_operand.vmem [shape: f32[1,16], index: 2, kind: input, shape index: {}]   ;;  %s10969_s3 = inlined_call_operand.vmem [shape: f32[4096,8], index: 3, kind: output, shape index: {}]  }
   0x1 LB: > { %s5673_s13 = sadd.s32 4294967295, %s7774_s12   ;;  %p5677_p0 = scmp.ge.s32.totalorder %s7774_s12, 1  ;;  %s7774_s12 = sphi %s7797_s12, %s13_s12  }
   0x2   : > { %p138_p1 = scmp.lt.s32.totalorder %s7774_s12, 3 }
   0x4   : > { %p139_p2 = pnand %p5677_p0, %p138_p1 }
   0x6   : > { %142 = sbr.rel (%p139_p2) target bundleno = 919 (0x397), region = 32 }
   0xd   : > { %v6608_v0 = vld [vmem:[%s10967_s1] sm:$0xff]   ;;  %s5678_s16 = sshll.u32 %s5673_s13, 8  ;;  %v6609_v1 = vld [vmem:[%s10967_s1 + $0x8] sm:$0xff]   ;;  %v6610_v2 = vld [vmem:[%s10967_s1 + $0x10] sm:$0xff]   ;;  %vm1102_vm0 = vcmask 392192   ;;  %s7776_s27 = smov 120  }
   0xe   : > { %p163_p3 = scmp.lt.s32.totalorder %s5678_s16, 511  ;;  %6331 = vmatprep.subr.bf16.mxu0 %v6608_v0  ;;  %6593 = vmatprep.subr.bf16.mxu1 %v6608_v0  ;;  %vm5360_vm1 = vcmask 64512  }
   0xf   : > { %6332 = vmatpush3.bf16.msra.mxu0 %v6608_v0  ;;  %6596 = vmatpush3.bf16.msra.mxu1 %v6608_v0 }
  0x10   : > { %s11716_s16 = smov (!%p163_p3, %s5678_s16), 511  ;;  %6333 = vmatprep.subr.bf16.mxu0 %v6609_v1  ;;  %6594 = vmatprep.subr.bf16.mxu1 %v6609_v1 }
  0x11   : > { %s5679_s21 = sshll.u32 %s11716_s16, 2  ;;  %s5681_s30 = sshll.u32 %s11716_s16, 3 }
  0x12   : > { %s7820_s24 = scalar_lea.vmem %s10966_s0, %s5679_s21  ;;  %s8740_s6 = scalar_lea.vmem %s10969_s3, %s5681_s30 }
  0x13   : > { %6334 = vmatpush3.bf16.msra.mxu0 %v6609_v1  ;;  %6597 = vmatpush3.bf16.msra.mxu1 %v6609_v1  ;;  %v6611_v3 = vld [vmem:[%s7820_s24] sm:$0xff]   ;;  %v6613_v5 = vld [vmem:[%s7820_s24 + $0x8] sm:$0xff]   ;;  %v6615_v7 = vld [vmem:[%s7820_s24 + $0x10] sm:$0xff]  }
  0x14   : > { %6335 = vmatprep.subr.bf16.mxu0 %v6610_v2  ;;  %6595 = vmatprep.subr.bf16.mxu1 %v6610_v2  ;;  %v6612_v4 = vld [vmem:[%s7820_s24 + $0x200] sm:$0xff]   ;;  %v6614_v6 = vld [vmem:[%s7820_s24 + $0x208] sm:$0xff]   ;;  %v6617_v8 = vld [vmem:[%s7820_s24 + $0x210] sm:$0xff]  }
  0x15   : > { %6337 = vmatprep.mubr.msk.bf16.mxu0 %vm1102_vm0, %v6611_v3  ;;  %6465 = vmatprep.mubr.msk.bf16.mxu1 %vm1102_vm0, %v6612_v4  ;;  %v6616_v9 = vld [vmem:[%s7820_s24 + $0x18] sm:$0xff]   ;;  %v6619_v11 = vld [vmem:[%s7820_s24 + $0x20] sm:$0xff]   ;;  %v6620_v13 = vld [vmem:[%s7820_s24 + $0x28] sm:$0xff]  }
  0x16   : > { %v6618_v10 = vld [vmem:[%s7820_s24 + $0x218] sm:$0xff]   ;;  %v6621_v12 = vld [vmem:[%s7820_s24 + $0x220] sm:$0xff]   ;;  %v6622_v14 = vld [vmem:[%s7820_s24 + $0x228] sm:$0xff]  }
  0x17   : > { %6336 = vmatpush3.bf16.msra.mxu0 %v6610_v2  ;;  %6598 = vmatpush3.bf16.msra.mxu1 %v6610_v2  ;;  %v6623_v15 = vld [vmem:[%s7820_s24 + $0x30] sm:$0xff]   ;;  %v6624_v17 = vld [vmem:[%s7820_s24 + $0x38] sm:$0xff]   ;;  %v6627_v19 = vld [vmem:[%s7820_s24 + $0x40] sm:$0xff]  }
  0x18   : > { %v6625_v16 = vld [vmem:[%s7820_s24 + $0x230] sm:$0xff]   ;;  %v6626_v18 = vld [vmem:[%s7820_s24 + $0x238] sm:$0xff]   ;;  %v6629_v20 = vld [vmem:[%s7820_s24 + $0x240] sm:$0xff]  }
  0x19   : > { %v6628_v21 = vld [vmem:[%s7820_s24 + $0x48] sm:$0xff]   ;;  %v6631_v23 = vld [vmem:[%s7820_s24 + $0x50] sm:$0xff]   ;;  %v6632_v25 = vld [vmem:[%s7820_s24 + $0x58] sm:$0xff]  }
  0x1a   : > { %6338 = vmatmul.mubr.msk.bf16.vlgmr.msra.gmra.mrb[0].mxu0 %vm1102_vm0, %v6613_v5  ;;  %6466 = vmatmul.mubr.msk.bf16.vlgmr.msra.gmra.mrb[0].mxu1 %vm1102_vm0, %v6614_v6  ;;  %v6630_v22 = vld [vmem:[%s7820_s24 + $0x248] sm:$0xff]   ;;  %v6633_v24 = vld [vmem:[%s7820_s24 + $0x250] sm:$0xff]   ;;  %v6634_v26 = vld [vmem:[%s7820_s24 + $0x258] sm:$0xff]  }
  0x1b   : > { %6341 = vmatprep.mubr.msk.bf16.mxu0 %vm1102_vm0, %v6615_v7  ;;  %6469 = vmatprep.mubr.msk.bf16.mxu1 %vm1102_vm0, %v6617_v8  ;;  %v6635_v27 = vld [vmem:[%s7820_s24 + $0x60] sm:$0xff]   ;;  %v6636_v29 = vld [vmem:[%s7820_s24 + $0x68] sm:$0xff]   ;;  %v6639_v31 = vld [vmem:[%s7820_s24 + $0x70] sm:$0xff]  }
  0x1c   : > { %v6637_v28 = vld [vmem:[%s7820_s24 + $0x260] sm:$0xff]   ;;  %v6638_v30 = vld [vmem:[%s7820_s24 + $0x268] sm:$0xff]   ;;  %v6641_v32 = vld [vmem:[%s7820_s24 + $0x270] sm:$0xff]  }
  0x1d   : > { %v6640_v33 = vld [vmem:[%s7820_s24 + $0x78] sm:$0xff]   ;;  %v6643_v35 = vld [vmem:[%s7820_s24 + $0x80] sm:$0xff]   ;;  %v6644_v37 = vld [vmem:[%s7820_s24 + $0x88] sm:$0xff]  }
  0x1e   : > { %v6642_v34 = vld [vmem:[%s7820_s24 + $0x278] sm:$0xff]   ;;  %v6645_v36 = vld [vmem:[%s7820_s24 + $0x280] sm:$0xff]   ;;  %v6646_v38 = vld [vmem:[%s7820_s24 + $0x288] sm:$0xff]  }
  0x1f   : > { %v6647_v39 = vld [vmem:[%s7820_s24 + $0x90] sm:$0xff]   ;;  %v6648_v41 = vld [vmem:[%s7820_s24 + $0x98] sm:$0xff]   ;;  %v6651_v43 = vld [vmem:[%s7820_s24 + $0xa0] sm:$0xff]  }
  0x20   : > { %v6649_v40 = vld [vmem:[%s7820_s24 + $0x290] sm:$0xff]   ;;  %v6650_v42 = vld [vmem:[%s7820_s24 + $0x298] sm:$0xff]   ;;  %v6653_v44 = vld [vmem:[%s7820_s24 + $0x2a0] sm:$0xff]  }
  0x21   : > { %v6652_v45 = vld [vmem:[%s7820_s24 + $0xa8] sm:$0xff]   ;;  %v6655_v47 = vld [vmem:[%s7820_s24 + $0xb0] sm:$0xff]   ;;  %v6656_v49 = vld [vmem:[%s7820_s24 + $0xb8] sm:$0xff]  }
  0x22   : > { %6342 = vmatmul.mubr.msk.bf16.gmra.mrb[4].mxu0 %vm1102_vm0, %v6616_v9  ;;  %6470 = vmatmul.mubr.msk.bf16.gmra.mrb[4].mxu1 %vm1102_vm0, %v6618_v10  ;;  %v6654_v46 = vld [vmem:[%s7820_s24 + $0x2a8] sm:$0xff]   ;;  %v6657_v48 = vld [vmem:[%s7820_s24 + $0x2b0] sm:$0xff]   ;;  %v6658_v50 = vld [vmem:[%s7820_s24 + $0x2b8] sm:$0xff]  }
  0x23   : > { %6345 = vmatprep.mubr.msk.bf16.mxu0 %vm1102_vm0, %v6619_v11  ;;  %6473 = vmatprep.mubr.msk.bf16.mxu1 %vm1102_vm0, %v6621_v12  ;;  %v6659_v51 = vld [vmem:[%s7820_s24 + $0xc0] sm:$0xff]   ;;  %v6660_v53 = vld [vmem:[%s7820_s24 + $0xc8] sm:$0xff]   ;;  %v6663_v55 = vld [vmem:[%s7820_s24 + $0xd0] sm:$0xff]  }
  0x24   : > { %v6661_v52 = vld [vmem:[%s7820_s24 + $0x2c0] sm:$0xff]   ;;  %v6662_v54 = vld [vmem:[%s7820_s24 + $0x2c8] sm:$0xff]   ;;  %v6665_v56 = vld [vmem:[%s7820_s24 + $0x2d0] sm:$0xff]  }
  0x25   : > { %v6664_v57 = vld [vmem:[%s7820_s24 + $0xd8] sm:$0xff]   ;;  %v6667_v59 = vld [vmem:[%s7820_s24 + $0xe0] sm:$0xff]   ;;  %v6668_v61 = vld [vmem:[%s7820_s24 + $0xe8] sm:$0xff]  }
  0x26   : > { %v6666_v58 = vld [vmem:[%s7820_s24 + $0x2d8] sm:$0xff]   ;;  %v6669_v60 = vld [vmem:[%s7820_s24 + $0x2e0] sm:$0xff]   ;;  %v6670_v62 = vld [vmem:[%s7820_s24 + $0x2e8] sm:$0xff]  }
  0x27   : > { %v6671_v63 = vld [vmem:[%s7820_s24 + $0xf0] sm:$0xff]   ;;  %v6672_v0 = vld [vmem:[%s7820_s24 + $0xf8] sm:$0xff]   ;;  %v6675_v3 = vld [vmem:[%s7820_s24 + $0x100] sm:$0xff]  }
  0x28   : > { %v6673_v1 = vld [vmem:[%s7820_s24 + $0x2f0] sm:$0xff]   ;;  %v6674_v2 = vld [vmem:[%s7820_s24 + $0x2f8] sm:$0xff]   ;;  %v6676_v4 = vld [vmem:[%s7820_s24 + $0x108] sm:$0xff]  }
  0x29   : > { %v6677_v5 = vld [vmem:[%s7820_s24 + $0x300] sm:$0xff]   ;;  %v6678_v6 = vld [vmem:[%s7820_s24 + $0x308] sm:$0xff]   ;;  %v6679_v7 = vld [vmem:[%s7820_s24 + $0x110] sm:$0xff]  }
  0x2a   : > { %6346 = vmatmul.mubr.msk.bf16.gmra.mrb[8].mxu0 %vm1102_vm0, %v6620_v13  ;;  %6474 = vmatmul.mubr.msk.bf16.gmra.mrb[8].mxu1 %vm1102_vm0, %v6622_v14  ;;  %v6680_v8 = vld [vmem:[%s7820_s24 + $0x118] sm:$0xff]   ;;  %v6681_v9 = vld [vmem:[%s7820_s24 + $0x310] sm:$0xff]   ;;  %v6683_v11 = vld [vmem:[%s7820_s24 + $0x120] sm:$0xff]  }
  0x2b   : > { %6349 = vmatprep.mubr.msk.bf16.mxu0 %vm1102_vm0, %v6623_v15  ;;  %6477 = vmatprep.mubr.msk.bf16.mxu1 %vm1102_vm0, %v6625_v16  ;;  %v6682_v10 = vld [vmem:[%s7820_s24 + $0x318] sm:$0xff]   ;;  %v6684_v12 = vld [vmem:[%s7820_s24 + $0x128] sm:$0xff]   ;;  %v6685_v13 = vld [vmem:[%s7820_s24 + $0x320] sm:$0xff]  }
  0x2c   : > { %v6686_v14 = vld [vmem:[%s7820_s24 + $0x328] sm:$0xff]   ;;  %v6687_v15 = vld [vmem:[%s7820_s24 + $0x130] sm:$0xff]   ;;  %v6688_v16 = vld [vmem:[%s7820_s24 + $0x138] sm:$0xff]  }
  0x32   : > { %6350 = vmatmul.mubr.msk.bf16.gmra.mrb[12].mxu0 %vm1102_vm0, %v6624_v17  ;;  %6478 = vmatmul.mubr.msk.bf16.gmra.mrb[12].mxu1 %vm1102_vm0, %v6626_v18  ;;  %v6689_v17 = vld [vmem:[%s7820_s24 + $0x330] sm:$0xff]   ;;  %v6690_v18 = vld [vmem:[%s7820_s24 + $0x338] sm:$0xff]  }
  0x33   : > { %6353 = vmatprep.mubr.msk.bf16.mxu0 %vm1102_vm0, %v6627_v19  ;;  %6481 = vmatprep.mubr.msk.bf16.mxu1 %vm1102_vm0, %v6629_v20  ;;  %v6691_v19 = vld [vmem:[%s7820_s24 + $0x140] sm:$0xff]   ;;  %v6692_v20 = vld [vmem:[%s7820_s24 + $0x148] sm:$0xff]  }
  0x3a   : > { %6354 = vmatmul.mubr.msk.bf16.gmra.mrb[16].mxu0 %vm1102_vm0, %v6628_v21  ;;  %6482 = vmatmul.mubr.msk.bf16.gmra.mrb[16].mxu1 %vm1102_vm0, %v6630_v22  ;;  %v6693_v21 = vld [vmem:[%s7820_s24 + $0x340] sm:$0xff]   ;;  %v6694_v22 = vld [vmem:[%s7820_s24 + $0x348] sm:$0xff]  }
  0x3b   : > { %6357 = vmatprep.mubr.msk.bf16.mxu0 %vm1102_vm0, %v6631_v23  ;;  %6485 = vmatprep.mubr.msk.bf16.mxu1 %vm1102_vm0, %v6633_v24  ;;  %v7993_v23 = vld [vmem:[%s10968_s2] ss:$0 sm:$0xff] }
  0x42   : > { %6358 = vmatmul.mubr.msk.bf16.gmra.mrb[20].mxu0 %vm1102_vm0, %v6632_v25  ;;  %6486 = vmatmul.mubr.msk.bf16.gmra.mrb[20].mxu1 %vm1102_vm0, %v6634_v26 }
  0x43   : > { %6361 = vmatprep.mubr.msk.bf16.mxu0 %vm1102_vm0, %v6635_v27  ;;  %6489 = vmatprep.mubr.msk.bf16.mxu1 %vm1102_vm0, %v6637_v28 }
  0x4a   : > { %6362 = vmatmul.mubr.msk.bf16.gmra.mrb[24].mxu0 %vm1102_vm0, %v6636_v29  ;;  %6490 = vmatmul.mubr.msk.bf16.gmra.mrb[24].mxu1 %vm1102_vm0, %v6638_v30  ;;  %v6695_v30 = vld [vmem:[%s7820_s24 + $0x150] sm:$0xff]  }
  0x4b   : > { %6365 = vmatprep.mubr.msk.bf16.mxu0 %vm1102_vm0, %v6639_v31  ;;  %6493 = vmatprep.mubr.msk.bf16.mxu1 %vm1102_vm0, %v6641_v32 }
  0x52   : > { %6366 = vmatmul.mubr.msk.bf16.gmra.mrb[28].mxu0 %vm1102_vm0, %v6640_v33  ;;  %6494 = vmatmul.mubr.msk.bf16.gmra.mrb[28].mxu1 %vm1102_vm0, %v6642_v34 }
  0x53   : > { %6369 = vmatprep.mubr.msk.bf16.mxu0 %vm1102_vm0, %v6643_v35  ;;  %6497 = vmatprep.mubr.msk.bf16.mxu1 %vm1102_vm0, %v6645_v36  ;;  %v6696_v35 = vld [vmem:[%s7820_s24 + $0x158] sm:$0xff]  }
  0x5a   : > { %6370 = vmatmul.mubr.msk.bf16.gmra.mrb[32].mxu0 %vm1102_vm0, %v6644_v37  ;;  %6498 = vmatmul.mubr.msk.bf16.gmra.mrb[32].mxu1 %vm1102_vm0, %v6646_v38 }
  0x5b   : > { %6373 = vmatprep.mubr.msk.bf16.mxu0 %vm1102_vm0, %v6647_v39  ;;  %6501 = vmatprep.mubr.msk.bf16.mxu1 %vm1102_vm0, %v6649_v40 }
  0x62   : > { %6374 = vmatmul.mubr.msk.bf16.gmra.mrb[36].mxu0 %vm1102_vm0, %v6648_v41  ;;  %6502 = vmatmul.mubr.msk.bf16.gmra.mrb[36].mxu1 %vm1102_vm0, %v6650_v42 }
  0x63   : > { %6377 = vmatprep.mubr.msk.bf16.mxu0 %vm1102_vm0, %v6651_v43  ;;  %6505 = vmatprep.mubr.msk.bf16.mxu1 %vm1102_vm0, %v6653_v44 }
  0x6a   : > { %6378 = vmatmul.mubr.msk.bf16.gmra.mrb[40].mxu0 %vm1102_vm0, %v6652_v45  ;;  %6506 = vmatmul.mubr.msk.bf16.gmra.mrb[40].mxu1 %vm1102_vm0, %v6654_v46 }
  0x6b   : > { %6381 = vmatprep.mubr.msk.bf16.mxu0 %vm1102_vm0, %v6655_v47  ;;  %6509 = vmatprep.mubr.msk.bf16.mxu1 %vm1102_vm0, %v6657_v48  ;;  %v6697_v47 = vld [vmem:[%s7820_s24 + $0x350] sm:$0xff]  }
  0x72   : > { %6382 = vmatmul.mubr.msk.bf16.gmra.mrb[44].mxu0 %vm1102_vm0, %v6656_v49  ;;  %6510 = vmatmul.mubr.msk.bf16.gmra.mrb[44].mxu1 %vm1102_vm0, %v6658_v50  ;;  %v6698_v49 = vld [vmem:[%s7820_s24 + $0x358] sm:$0xff]  }
  0x73   : > { %6385 = vmatprep.mubr.msk.bf16.mxu0 %vm1102_vm0, %v6659_v51  ;;  %6513 = vmatprep.mubr.msk.bf16.mxu1 %vm1102_vm0, %v6661_v52 }
  0x7a   : > { %6386 = vmatmul.mubr.msk.bf16.gmra.mrb[48].mxu0 %vm1102_vm0, %v6660_v53  ;;  %6514 = vmatmul.mubr.msk.bf16.gmra.mrb[48].mxu1 %vm1102_vm0, %v6662_v54 }
  0x7b   : > { %6389 = vmatprep.mubr.msk.bf16.mxu0 %vm1102_vm0, %v6663_v55  ;;  %6517 = vmatprep.mubr.msk.bf16.mxu1 %vm1102_vm0, %v6665_v56 }
  0x82   : > { %6390 = vmatmul.mubr.msk.bf16.gmra.mrb[52].mxu0 %vm1102_vm0, %v6664_v57  ;;  %6518 = vmatmul.mubr.msk.bf16.gmra.mrb[52].mxu1 %vm1102_vm0, %v6666_v58 }
  0x83   : > { %6393 = vmatprep.mubr.msk.bf16.mxu0 %vm1102_vm0, %v6667_v59  ;;  %6521 = vmatprep.mubr.msk.bf16.mxu1 %vm1102_vm0, %v6669_v60 }
  0x8a   : > { %6394 = vmatmul.mubr.msk.bf16.gmra.mrb[56].mxu0 %vm1102_vm0, %v6668_v61  ;;  %6522 = vmatmul.mubr.msk.bf16.gmra.mrb[56].mxu1 %vm1102_vm0, %v6670_v62 }
  0x8b   : > { %6397 = vmatprep.mubr.msk.bf16.mxu0 %vm1102_vm0, %v6671_v63  ;;  %6525 = vmatprep.mubr.msk.bf16.mxu1 %vm1102_vm0, %v6673_v1 }
  0x92   : > { %6398 = vmatmul.mubr.msk.bf16.gmra.mrb[60].mxu0 %vm1102_vm0, %v6672_v0  ;;  %6526 = vmatmul.mubr.msk.bf16.gmra.mrb[60].mxu1 %vm1102_vm0, %v6674_v2 }
  0x93   : > { %6401 = vmatprep.mubr.msk.bf16.mxu0 %vm1102_vm0, %v6675_v3  ;;  %6529 = vmatprep.mubr.msk.bf16.mxu1 %vm1102_vm0, %v6677_v5 }
  0x9a   : > { %6402 = vmatmul.mubr.msk.bf16.gmra.mrb[64].mxu0 %vm1102_vm0, %v6676_v4  ;;  %6530 = vmatmul.mubr.msk.bf16.gmra.mrb[64].mxu1 %vm1102_vm0, %v6678_v6 }
  0x9b   : > { %6405 = vmatprep.mubr.msk.bf16.mxu0 %vm1102_vm0, %v6679_v7  ;;  %6533 = vmatprep.mubr.msk.bf16.mxu1 %vm1102_vm0, %v6681_v9 }
  0xa2   : > { %6406 = vmatmul.mubr.msk.bf16.gmra.mrb[68].mxu0 %vm1102_vm0, %v6680_v8  ;;  %6534 = vmatmul.mubr.msk.bf16.gmra.mrb[68].mxu1 %vm1102_vm0, %v6682_v10 }
  0xa3   : > { %6409 = vmatprep.mubr.msk.bf16.mxu0 %vm1102_vm0, %v6683_v11  ;;  %6537 = vmatprep.mubr.msk.bf16.mxu1 %vm1102_vm0, %v6685_v13 }
  0xaa   : > { %6410 = vmatmul.mubr.msk.bf16.gmra.mrb[72].mxu0 %vm1102_vm0, %v6684_v12  ;;  %6538 = vmatmul.mubr.msk.bf16.gmra.mrb[72].mxu1 %vm1102_vm0, %v6686_v14 }
  0xab   : > { %6413 = vmatprep.mubr.msk.bf16.mxu0 %vm1102_vm0, %v6687_v15  ;;  %6541 = vmatprep.mubr.msk.bf16.mxu1 %vm1102_vm0, %v6689_v17  ;;  %v6699_v15 = vld [vmem:[%s7820_s24 + $0x160] sm:$0xff]  }
  0xb2   : > { %6414 = vmatmul.mubr.msk.bf16.gmra.mrb[76].mxu0 %vm1102_vm0, %v6688_v16  ;;  %6542 = vmatmul.mubr.msk.bf16.gmra.mrb[76].mxu1 %vm1102_vm0, %v6690_v18 }
  0xb3   : > { %6417 = vmatprep.mubr.msk.bf16.mxu0 %vm1102_vm0, %v6691_v19  ;;  %6545 = vmatprep.mubr.msk.bf16.mxu1 %vm1102_vm0, %v6693_v21  ;;  %v6700_v19 = vld [vmem:[%s7820_s24 + $0x168] sm:$0xff]  }
  0xba   : > { %6418 = vmatmul.mubr.msk.bf16.gmra.mrb[80].mxu0 %vm1102_vm0, %v6692_v20  ;;  %6546 = vmatmul.mubr.msk.bf16.gmra.mrb[80].mxu1 %vm1102_vm0, %v6694_v22 }
  0xbb   : > { %6421 = vmatprep.mubr.msk.bf16.mxu0 %vm1102_vm0, %v6695_v30  ;;  %6549 = vmatprep.mubr.msk.bf16.mxu1 %vm1102_vm0, %v6697_v47 }
  0xc2   : > { %6422 = vmatmul.mubr.msk.bf16.gmra.mrb[84].mxu0 %vm1102_vm0, %v6696_v35  ;;  %6550 = vmatmul.mubr.msk.bf16.gmra.mrb[84].mxu1 %vm1102_vm0, %v6698_v49 }
  0xc3   : > { %6425 = vmatprep.mubr.msk.bf16.mxu0 %vm1102_vm0, %v6699_v15 }
  0xca   : > { %6426 = vmatmul.mubr.msk.bf16.gmra.mrb[88].mxu0 %vm1102_vm0, %v6700_v19 }
  0xed   : > { %v6339_v24 = vpop.f32.mrb[0].mxu0  ;;  %v6467_v25 = vpop.f32.mrb[0].mxu1 }
  0xee   : > { %v7996_v26 = vadd.f32 %v6339_v24, %v7993_v23  ;;  %v7999_v27 = vadd.f32 %v6467_v25, %v7993_v23  ;;  %v1521_v28 = vpop.f32.mrb[1].mxu0  ;;  %v2033_v29 = vpop.f32.mrb[1].mxu1 }
  0xef   : > { %v8003_v31 = vadd.f32 %v7993_v23, %v1521_v28  ;;  %v8006_v32 = vadd.f32 %v7993_v23, %v2033_v29  ;;  %v6340_v33 = vpop.f32.mrb[2].mxu0  ;;  %v6468_v34 = vpop.f32.mrb[2].mxu1 }
  0xf0   : > { %v5944_v36 = vmul.f32 -1.442695, %v7996_v26  ;;  %v6072_v37 = vmul.f32 -1.442695, %v7999_v27  ;;  %v8012_v38 = vadd.f32 %v6340_v33, %v7993_v23  ;;  %v8015_v39 = vadd.f32 %v6468_v34, %v7993_v23  ;;  %v1524_v40 = vpop.f32.mrb[3].mxu0  ;;  %v2036_v41 = vpop.f32.mrb[3].mxu1 }
  0xf1   : > { %v5942_v42 = vmul.f32 -1.442695, %v8003_v31  ;;  %v6070_v43 = vmul.f32 -1.442695, %v8006_v32  ;;  %v8021_v44 = vadd.f32 %v7993_v23, %v1524_v40  ;;  %v8024_v45 = vadd.f32 %v7993_v23, %v2036_v41  ;;  %v6701_v34 = vld [vmem:[%s7820_s24 + $0x360] sm:$0xff]  }
  0xf2   : > { %6739 = vpow2.f32 %v5944_v36  ;;  %v5945_v46 = vmul.f32 -1.442695, %v8012_v38  ;;  %v6073_v48 = vmul.f32 -1.442695, %v8015_v39  ;;  %6553 = vmatprep.mubr.msk.bf16.mxu1 %vm1102_vm0, %v6701_v34  ;;  %v6704_v34 = vld [vmem:[%s7820_s24 + $0x178] sm:$0xff]  }
  0xf3   : > { %11175 = vst [vmem:[#allocation2_spill] sm:$0xff] %v8021_v44  ;;  %6741 = vpow2.f32 %v6072_v37  ;;  %v5943_v50 = vmul.f32 -1.442695, %v8021_v44  ;;  %v6071_v51 = vmul.f32 -1.442695, %v8024_v45  ;;  %v6702_v37 = vld [vmem:[%s7820_s24 + $0x368] sm:$0xff]  }
  0xf4   : > { %6743 = vpow2.f32 %v5942_v42  ;;  %6554 = vmatmul.mubr.msk.bf16.gmra.mrb[88].mxu1 %vm1102_vm0, %v6702_v37 }
  0xf5   : > { %6745 = vpow2.f32 %v6070_v43  ;;  %v6343_v52 = vpop.f32.mrb[4].mxu0  ;;  %v6471_v53 = vpop.f32.mrb[4].mxu1 }
  0xf6   : > { %6747 = vpow2.f32 %v5945_v46  ;;  %v8036_v54 = vadd.f32 %v6343_v52, %v7993_v23  ;;  %v1537_v55 = vpop.f32.mrb[5].mxu0  ;;  %v8039_v56 = vadd.f32 %v6471_v53, %v7993_v23  ;;  %v2049_v57 = vpop.f32.mrb[5].mxu1 }
  0xf7   : > { %6749 = vpow2.f32 %v6073_v48  ;;  %v6344_v58 = vpop.f32.mrb[6].mxu0  ;;  %v6472_v59 = vpop.f32.mrb[6].mxu1  ;;  %v8046_v0 = vadd.f32 %v7993_v23, %v1537_v55  ;;  %v8070_v42 = vadd.f32 %v7993_v23, %v2049_v57 }
  0xf8   : > { %11176 = vst [vmem:[#allocation3_spill] sm:$0xff] %v8036_v54  ;;  %11177 = vst [vmem:[#allocation4_spill] sm:$0xff] %v8039_v56  ;;  %6751 = vpow2.f32 %v5943_v50  ;;  %v5948_v60 = vmul.f32 -1.442695, %v8036_v54  ;;  %v8043_v61 = vadd.f32 %v6344_v58, %v7993_v23  ;;  %v1540_v62 = vpop.f32.mrb[7].mxu0  ;;  %v2052_v63 = vpop.f32.mrb[7].mxu1  ;;  %v8074_v46 = vadd.f32 %v6472_v59, %v7993_v23 }
  0xf9   : > { %6753 = vpow2.f32 %v6071_v51  ;;  %11179 = vst [vmem:[#allocation6_spill] sm:$0xff] %v8046_v0  ;;  %v8050_v2 = vadd.f32 %v7993_v23, %v1540_v62  ;;  %v6076_v3 = vmul.f32 -1.442695, %v8039_v56  ;;  %v5946_v7 = vmul.f32 -1.442695, %v8046_v0  ;;  %11181 = vst [vmem:[#allocation8_spill] sm:$0xff] %v8070_v42 }
  0xfa   : > { %11178 = vst [vmem:[#allocation5_spill] sm:$0xff] %v8043_v61  ;;  %6755 = vpow2.f32 %v5948_v60  ;;  %v5949_v1 = vmul.f32 -1.442695, %v8043_v61  ;;  %11182 = vst [vmem:[#allocation9_spill] sm:$0xff] %v8074_v46  ;;  %v8082_v50 = vadd.f32 %v7993_v23, %v2052_v63  ;;  %v6074_v59 = vmul.f32 -1.442695, %v8070_v42 }
  0xfb   : > { %11180 = vst [vmem:[#allocation7_spill] sm:$0xff] %v8050_v2  ;;  %v5947_v12 = vmul.f32 -1.442695, %v8050_v2  ;;  %v6713_v0 = vld [vmem:[%s7820_s24 + $0x390] sm:$0xff]   ;;  %v6714_v54 = vld [vmem:[%s7820_s24 + $0x398] sm:$0xff]  }
  0xfc   : > { %v6740_v4 = vpop.eup %6739  ;;  %6757 = vpow2.f32 %v5949_v1  ;;  %11183 = vst [vmem:[#allocation10_spill] sm:$0xff] %v8082_v50 }
  0xfd   : > { %v6742_v5 = vpop.eup %6741  ;;  %v3314_v6 = vadd.f32 1.0, %v6740_v4  ;;  %v6347_v8 = vpop.f32.mrb[8].mxu0  ;;  %6759 = vpow2.f32 %v6076_v3  ;;  %v6077_v4 = vmul.f32 -1.442695, %v8074_v46 }
  0xfe   : > { %v8054_v9 = vpop.f32.mrb[8].mxu1  ;;  %v6744_v10 = vpop.eup %6743  ;;  %v3442_v11 = vadd.f32 1.0, %v6742_v5  ;;  %v8087_v53 = vadd.f32 %v6347_v8, %v7993_v23  ;;  %v6075_v8 = vmul.f32 -1.442695, %v8082_v50 }
  0xff   : > { %v1553_v13 = vpop.f32.mrb[9].mxu0  ;;  %v8057_v14 = vpop.f32.mrb[9].mxu1  ;;  %6761 = vrcp.f32 %v3314_v6  ;;  %v3312_v21 = vadd.f32 1.0, %v6744_v10 }
 0x100   : > { %v6746_v16 = vpop.eup %6745  ;;  %v6348_v17 = vpop.f32.mrb[10].mxu0  ;;  %6763 = vrcp.f32 %v3442_v11  ;;  %11184 = vst [vmem:[#allocation11_spill] sm:$0xff] %v8087_v53  ;;  %v8095_v60 = vadd.f32 %v7993_v23, %v1553_v13  ;;  %v8116_v13 = vadd.f32 %v8054_v9, %v7993_v23 }
 0x101   : > { %v8060_v18 = vpop.f32.mrb[10].mxu1  ;;  %v6748_v20 = vpop.eup %6747  ;;  %v3440_v28 = vadd.f32 1.0, %v6746_v16  ;;  %6765 = vpow2.f32 %v5946_v7  ;;  %v8103_v5 = vadd.f32 %v6348_v17, %v7993_v23  ;;  %v8121_v17 = vadd.f32 %v7993_v23, %v8057_v14  ;;  %v6703_v14 = vld [vmem:[%s7820_s24 + $0x170] sm:$0xff]  }
 0x102   : > { %v1556_v22 = vpop.f32.mrb[11].mxu0  ;;  %v8063_v24 = vpop.f32.mrb[11].mxu1  ;;  %v3315_v29 = vadd.f32 1.0, %v6748_v20  ;;  %6767 = vpow2.f32 %v5947_v12  ;;  %11185 = vst [vmem:[#allocation12_spill] sm:$0xff] %v8095_v60  ;;  %v5952_v12 = vmul.f32 -1.442695, %v8087_v53  ;;  %6429 = vmatprep.mubr.msk.bf16.mxu0 %vm1102_vm0, %v6703_v14 }
 0x103   : > { %v6750_v25 = vpop.eup %6749  ;;  %11186 = vst [vmem:[#allocation13_spill] sm:$0xff] %v8103_v5  ;;  %v8110_v10 = vadd.f32 %v7993_v23, %v1556_v22  ;;  %11188 = vst [vmem:[#allocation15_spill] sm:$0xff] %v8116_v13  ;;  %v5950_v16 = vmul.f32 -1.442695, %v8095_v60  ;;  %v5953_v20 = vmul.f32 -1.442695, %v8103_v5  ;;  %6430 = vmatmul.mubr.msk.bf16.gmra.mrb[92].mxu0 %vm1102_vm0, %v6704_v34 }
 0x104   : > { %v6752_v30 = vpop.eup %6751  ;;  %v3443_v33 = vadd.f32 1.0, %v6750_v25  ;;  %6769 = vrcp.f32 %v3315_v29  ;;  %11189 = vst [vmem:[#allocation16_spill] sm:$0xff] %v8121_v17 }
 0x105   : > { %v6754_v35 = vpop.eup %6753  ;;  %v3313_v36 = vadd.f32 1.0, %v6752_v30  ;;  %6771 = vrcp.f32 %v3312_v21  ;;  %v8076_v47 = vpop.f32.mrb[12].mxu0  ;;  %11187 = vst [vmem:[#allocation14_spill] sm:$0xff] %v8110_v10  ;;  %v8126_v21 = vadd.f32 %v8060_v18, %v7993_v23  ;;  %v5951_v9 = vmul.f32 -1.442695, %v8110_v10 }
 0x106   : > { %v6756_v40 = vpop.eup %6755  ;;  %v3441_v41 = vadd.f32 1.0, %v6754_v35  ;;  %6773 = vrcp.f32 %v3440_v28  ;;  %v8078_v48 = vpop.f32.mrb[12].mxu1  ;;  %v6080_v30 = vmul.f32 -1.442695, %v8116_v13 }
 0x107   : > { %v3318_v43 = vadd.f32 1.0, %v6756_v40  ;;  %v6758_v49 = vpop.eup %6757  ;;  %6775 = vrcp.f32 %v3443_v33  ;;  %v8084_v51 = vpop.f32.mrb[13].mxu0  ;;  %11190 = vst [vmem:[#allocation17_spill] sm:$0xff] %v8126_v21 }
 0x108   : > { %6777 = vrcp.f32 %v3313_v36  ;;  %v3319_v52 = vadd.f32 1.0, %v6758_v49  ;;  %v8089_v55 = vpop.f32.mrb[14].mxu0  ;;  %v8091_v57 = vpop.f32.mrb[13].mxu1  ;;  %v6078_v36 = vmul.f32 -1.442695, %v8121_v17  ;;  %v8151_v49 = vadd.f32 %v7993_v23, %v8063_v24 }
 0x109   : > { %v6760_v58 = vpop.eup %6759  ;;  %6779 = vrcp.f32 %v3441_v41  ;;  %v8097_v62 = vpop.f32.mrb[15].mxu0  ;;  %v8163_v24 = vadd.f32 %v8076_v47, %v7993_v23  ;;  %v8226_v17 = vadd.f32 %v7993_v23, %v8091_v57 }
 0x10a   : > { %v8099_v63 = vpop.f32.mrb[14].mxu1  ;;  %v6762_v1 = vpop.eup %6761  ;;  %6781 = vrcp.f32 %v3318_v43  ;;  %v3446_v3 = vadd.f32 1.0, %v6760_v58  ;;  %v6081_v43 = vmul.f32 -1.442695, %v8126_v21  ;;  %11191 = vst [vmem:[#allocation18_spill] sm:$0xff] %v8151_v49 }
 0x10b   : > { %v8105_v6 = vpop.f32.mrb[15].mxu1  ;;  %v6764_v7 = vpop.eup %6763  ;;  %6783 = vrcp.f32 %v3319_v52  ;;  %4340 = vrot.lane.b32.xlu1 %v6762_v1, %s7776_s27  ;;  %v6705_v1 = vld [vmem:[%s7820_s24 + $0x370] sm:$0xff]   ;;  %11192 = vst [vmem:[#allocation19_spill] sm:$0xff] %v8163_v24  ;;  %11197 = vst [vmem:[#allocation24_spill] sm:$0xff] %v8226_v17 }
 0x10c   : > { %v6766_v11 = vpop.eup %6765  ;;  %6785 = vrcp.f32 %v3446_v3  ;;  %4596 = vrot.lane.b32.xlu0 %v6764_v7, %s7776_s27  ;;  %v6706_v7 = vld [vmem:[%s7820_s24 + $0x378] sm:$0xff]   ;;  %6557 = vmatprep.mubr.msk.bf16.mxu1 %vm1102_vm0, %v6705_v1  ;;  %v8241_v60 = vadd.f32 %v7993_v23, %v8105_v6 }
 0x10d   : > { %v6768_v15 = vpop.eup %6767  ;;  %6787 = vpow2.f32 %v6074_v59  ;;  %v8130_v25 = vpop.f32.mrb[16].mxu0  ;;  %6558 = vmatmul.mubr.msk.bf16.gmra.mrb[92].mxu1 %vm1102_vm0, %v6706_v7 }
 0x10e   : > { %v6770_v19 = vpop.eup %6769  ;;  %6789 = vpow2.f32 %v6077_v4  ;;  %v8132_v28 = vpop.f32.mrb[16].mxu1  ;;  %v3316_v4 = vadd.f32 1.0, %v6766_v11  ;;  %v8170_v11 = vadd.f32 %v7993_v23, %v8084_v51  ;;  %v5956_v51 = vmul.f32 -1.442695, %v8163_v24  ;;  %11199 = vst [vmem:[#allocation26_spill] sm:$0xff] %v8241_v60 }
 0x10f   : > { %v6772_v22 = vpop.eup %6771  ;;  %6791 = vpow2.f32 %v6075_v8  ;;  %4342 = vrot.lane.b32.xlu1 %v6770_v19, %s7776_s27  ;;  %v8137_v33 = vpop.f32.mrb[17].mxu0  ;;  %v6079_v19 = vmul.f32 -1.442695, %v8151_v49 }
 0x110   : > { %v6774_v29 = vpop.eup %6773  ;;  %6793 = vpow2.f32 %v5952_v12  ;;  %4336 = vrot.lane.b32.xlu0 %v6772_v22, %s7776_s27  ;;  %v8139_v18 = vpop.f32.mrb[17].mxu1  ;;  %v3317_v12 = vadd.f32 1.0, %v6768_v15  ;;  %11193 = vst [vmem:[#allocation20_spill] sm:$0xff] %v8170_v11  ;;  %v8255_v6 = vadd.f32 %v7993_v23, %v8137_v33 }
 0x111   : > { %v6776_v35 = vpop.eup %6775  ;;  %6795 = vpow2.f32 %v5950_v16  ;;  %v8143_v37 = vpop.f32.mrb[18].mxu0 }
 0x112   : > { %v8145_v40 = vpop.f32.mrb[18].mxu1  ;;  %v6778_v41 = vpop.eup %6777  ;;  %6797 = vpow2.f32 %v5953_v20  ;;  %11201 = vst [vmem:[#allocation28_spill] sm:$0xff] %v8255_v6 }
 0x113   : > { %v8153_v52 = vpop.f32.mrb[19].mxu0  ;;  %v8155_v58 = vpop.f32.mrb[19].mxu1  ;;  %6799 = vpow2.f32 %v5951_v9  ;;  %4598 = vrot.lane.b32.xlu1 %v6776_v35, %s7776_s27 }
 0x114   : > { %v6780_v59 = vpop.eup %6779  ;;  %6801 = vpow2.f32 %v6080_v30  ;;  %4592 = vrot.lane.b32.xlu0 %v6774_v29, %s7776_s27 }
 0x115   : > { %v6782_v3 = vpop.eup %6781  ;;  %6803 = vpow2.f32 %v6078_v36  ;;  %v8172_v20 = vpop.f32.mrb[20].mxu0 }
 0x116   : > { %v6784_v8 = vpop.eup %6783  ;;  %6805 = vpow2.f32 %v6081_v43  ;;  %v8174_v22 = vpop.f32.mrb[20].mxu1 }
 0x117   : > { %v6786_v16 = vpop.eup %6785  ;;  %4594 = vrot.lane.b32.xlu1 %v6780_v59, %s7776_s27  ;;  %v8178_v15 = vpop.f32.mrb[21].mxu0  ;;  %6807 = vrcp.f32 %v3316_v4  ;;  %v5954_v4 = vmul.f32 -1.442695, %v8170_v11 }
 0x118   : > { %v6788_v47 = vpop.eup %6787  ;;  %v8180_v9 = vpop.f32.mrb[21].mxu1  ;;  %4338 = vrot.lane.b32.xlu0 %v6778_v41, %s7776_s27  ;;  %6809 = vrcp.f32 %v3317_v12 }
 0x119   : > { %v6790_v14 = vpop.eup %6789  ;;  %v8184_v29 = vpop.f32.mrb[22].mxu0  ;;  %v3444_v35 = vadd.f32 1.0, %v6788_v47  ;;  %6811 = vpow2.f32 %v6079_v19 }
 0x11a   : > { %v8186_v30 = vpop.f32.mrb[22].mxu1  ;;  %v6792_v34 = vpop.eup %6791  ;;  %v3447_v36 = vadd.f32 1.0, %v6790_v14 }
 0x11b   : > { %v8188_v43 = vpop.f32.mrb[23].mxu0  ;;  %v8190_v59 = vpop.f32.mrb[23].mxu1  ;;  %v3445_v41 = vadd.f32 1.0, %v6792_v34  ;;  %4350 = vrot.lane.b32.xlu1 %v6784_v8, %s7776_s27 }
 0x11c   : > { %v6794_v1 = vpop.eup %6793  ;;  %6813 = vrcp.f32 %v3447_v36  ;;  %4348 = vrot.lane.b32.xlu0 %v6782_v3, %s7776_s27 }
 0x11d   : > { %v6796_v7 = vpop.eup %6795  ;;  %v3322_v24 = vadd.f32 1.0, %v6794_v1  ;;  %6815 = vpow2.f32 %v5956_v51  ;;  %v8195_v19 = vpop.f32.mrb[24].mxu0  ;;  %v8201_v51 = vadd.f32 %v8089_v55, %v7993_v23 }
 0x11e   : > { %v6798_v49 = vpop.eup %6797  ;;  %6817 = vrcp.f32 %v3444_v35  ;;  %v3320_v47 = vadd.f32 1.0, %v6796_v7  ;;  %v8197_v11 = vpop.f32.mrb[24].mxu1  ;;  %v6707_v7 = vld [vmem:[%s7820_s24 + $0x180] sm:$0xff]  }
 0x11f   : > { %v6800_v12 = vpop.eup %6799  ;;  %v3323_v10 = vadd.f32 1.0, %v6798_v49  ;;  %6819 = vpow2.f32 %v5954_v4  ;;  %11194 = vst [vmem:[#allocation21_spill] sm:$0xff] %v8201_v51  ;;  %v8203_v3 = vpop.f32.mrb[25].mxu0  ;;  %v8207_v49 = vadd.f32 %v7993_v23, %v8097_v62  ;;  %6433 = vmatprep.mubr.msk.bf16.mxu0 %vm1102_vm0, %v6707_v7 }
 0x120   : > { %v6802_v14 = vpop.eup %6801  ;;  %6821 = vrcp.f32 %v3445_v41  ;;  %v3321_v8 = vadd.f32 1.0, %v6800_v12  ;;  %4604 = vrot.lane.b32.xlu0 %v6786_v16, %s7776_s27  ;;  %v8210_v1 = vpop.f32.mrb[26].mxu0  ;;  %v6708_v41 = vld [vmem:[%s7820_s24 + $0x188] sm:$0xff]   ;;  %v8218_v12 = vadd.f32 %v8078_v48, %v7993_v23  ;;  %v5957_v48 = vmul.f32 -1.442695, %v8201_v51 }
 0x121   : > { %v6804_v34 = vpop.eup %6803  ;;  %6823 = vrcp.f32 %v3322_v24  ;;  %v3450_v36 = vadd.f32 1.0, %v6802_v14  ;;  %11195 = vst [vmem:[#allocation22_spill] sm:$0xff] %v8207_v49  ;;  %v8212_v4 = vpop.f32.mrb[25].mxu1  ;;  %6434 = vmatmul.mubr.msk.bf16.gmra.mrb[96].mxu0 %vm1102_vm0, %v6708_v41  ;;  %v5955_v57 = vmul.f32 -1.442695, %v8207_v49 }
 0x122   : > { %v6806_v35 = vpop.eup %6805  ;;  %6825 = vrcp.f32 %v3320_v47  ;;  %v3448_v55 = vadd.f32 1.0, %v6804_v34  ;;  %11196 = vst [vmem:[#allocation23_spill] sm:$0xff] %v8218_v12  ;;  %v8220_v24 = vpop.f32.mrb[27].mxu0  ;;  %v8234_v34 = vadd.f32 %v8099_v63, %v7993_v23  ;;  %v6084_v51 = vmul.f32 -1.442695, %v8218_v12 }
 0x123   : > { %v8222_v14 = vpop.f32.mrb[26].mxu1  ;;  %v6808_v62 = vpop.eup %6807  ;;  %6827 = vrcp.f32 %v3323_v10  ;;  %v3451_v16 = vadd.f32 1.0, %v6806_v35  ;;  %v6709_v10 = vld [vmem:[%s7820_s24 + $0x380] sm:$0xff]   ;;  %v8248_v63 = vadd.f32 %v8130_v25, %v7993_v23  ;;  %v6082_v41 = vmul.f32 -1.442695, %v8226_v17 }
 0x124   : > { %v8228_v21 = vpop.f32.mrb[27].mxu1  ;;  %v6810_v47 = vpop.eup %6809  ;;  %6829 = vrcp.f32 %v3321_v8  ;;  %11198 = vst [vmem:[#allocation25_spill] sm:$0xff] %v8234_v34  ;;  %4344 = vrot.lane.b32.xlu0 %v6808_v62, %s7776_s27  ;;  %v6710_v8 = vld [vmem:[%s7820_s24 + $0x388] sm:$0xff]   ;;  %6561 = vmatprep.mubr.msk.bf16.mxu1 %vm1102_vm0, %v6709_v10  ;;  %v6085_v10 = vmul.f32 -1.442695, %v8234_v34 }
 0x125   : > { %v6812_v35 = vpop.eup %6811  ;;  %6831 = vrcp.f32 %v3450_v36  ;;  %11200 = vst [vmem:[#allocation27_spill] sm:$0xff] %v8248_v63  ;;  %v8257_v62 = vpop.f32.mrb[28].mxu0  ;;  %6562 = vmatmul.mubr.msk.bf16.gmra.mrb[96].mxu1 %vm1102_vm0, %v6710_v8  ;;  %v6083_v17 = vmul.f32 -1.442695, %v8241_v60  ;;  %v5960_v34 = vmul.f32 -1.442695, %v8248_v63 }
 0x126   : > { %v6814_v7 = vpop.eup %6813  ;;  %6833 = vrcp.f32 %v3448_v55  ;;  %v8259_v55 = vpop.f32.mrb[28].mxu1  ;;  %6565 = vmatprep.mubr.msk.bf16.mxu1 %vm1102_vm0, %v6713_v0 }
 0x127   : > { %v6816_v36 = vpop.eup %6815  ;;  %6835 = vrcp.f32 %v3451_v16  ;;  %4606 = vrot.lane.b32.xlu1 %v6814_v7, %s7776_s27  ;;  %v8265_v16 = vadd.f32 %v8143_v37, %v7993_v23  ;;  %v8267_v49 = vpop.f32.mrb[29].mxu0  ;;  %v8280_v37 = vadd.f32 %v8132_v28, %v7993_v23  ;;  %v8292_v28 = vadd.f32 %v7993_v23, %v8153_v52 }
 0x128   : > { %v6818_v25 = vpop.eup %6817  ;;  %6837 = vpow2.f32 %v5957_v48  ;;  %v8269_v7 = vpop.f32.mrb[29].mxu1  ;;  %v3326_v63 = vadd.f32 1.0, %v6816_v36 }
 0x129   : > { %11202 = vst [vmem:[#allocation29_spill] sm:$0xff] %v8265_v16  ;;  %v6820_v33 = vpop.eup %6819  ;;  %6839 = vpow2.f32 %v5955_v57  ;;  %4600 = vrot.lane.b32.xlu0 %v6818_v25, %s7776_s27  ;;  %v8273_v12 = vpop.f32.mrb[30].mxu0  ;;  %11203 = vst [vmem:[#allocation30_spill] sm:$0xff] %v8280_v37  ;;  %v5958_v25 = vmul.f32 -1.442695, %v8255_v6  ;;  %v3449_v6 = vadd.f32 1.0, %v6812_v35 }
 0x12a   : > { %v8275_v8 = vpop.f32.mrb[30].mxu1  ;;  %v6822_v48 = vpop.eup %6821  ;;  %6841 = vpow2.f32 %v6084_v51  ;;  %v5961_v51 = vmul.f32 -1.442695, %v8265_v16  ;;  %11204 = vst [vmem:[#allocation31_spill] sm:$0xff] %v8292_v28  ;;  %v5959_v35 = vmul.f32 -1.442695, %v8292_v28 }
 0x12b   : > { %v8282_v5 = vpop.f32.mrb[31].mxu0  ;;  %v8284_v13 = vpop.f32.mrb[31].mxu1  ;;  %6843 = vpow2.f32 %v6082_v41  ;;  %4346 = vrot.lane.b32.xlu1 %v6810_v47, %s7776_s27  ;;  %v6088_v47 = vmul.f32 -1.442695, %v8280_v37  ;;  %v8299_v41 = vadd.f32 %v7993_v23, %v8139_v18  ;;  %v6711_v37 = vld [vmem:[%s7820_s24 + $0x190] sm:$0xff]  }
 0x12c   : > { %v6824_v57 = vpop.eup %6823  ;;  %6845 = vpow2.f32 %v6085_v10  ;;  %6437 = vmatprep.mubr.msk.bf16.mxu0 %vm1102_vm0, %v6711_v37 }
 0x12d   : > { %v6826_v60 = vpop.eup %6825  ;;  %6847 = vpow2.f32 %v6083_v17  ;;  %4356 = vrot.lane.b32.xlu0 %v6824_v57, %s7776_s27  ;;  %11205 = vst [vmem:[#allocation32_spill] sm:$0xff] %v8299_v41  ;;  %v8302_v17 = vpop.f32.mrb[32].mxu0  ;;  %v3324_v57 = vadd.f32 1.0, %v6820_v33  ;;  %v6086_v42 = vmul.f32 -1.442695, %v8299_v41  ;;  %6566 = vmatmul.mubr.msk.bf16.gmra.mrb[100].mxu1 %vm1102_vm0, %v6714_v54  ;;  %v8352_v54 = vadd.f32 %v7993_v23, %v8155_v58 }
 0x12e   : > { %v6828_v50 = vpop.eup %6827  ;;  %6849 = vpow2.f32 %v5960_v34  ;;  %v8304_v52 = vpop.f32.mrb[32].mxu1  ;;  %v8366_v58 = vadd.f32 %v7993_v23, %v8178_v15 }
 0x12f   : > { %v8294_v53 = vpop.eup %6829  ;;  %4602 = vrot.lane.b32.xlu1 %v6822_v48, %s7776_s27  ;;  %6851 = vpow2.f32 %v5958_v25  ;;  %v8306_v34 = vpop.f32.mrb[33].mxu0  ;;  %v8314_v48 = vadd.f32 %v8145_v40, %v7993_v23  ;;  %11207 = vst [vmem:[#allocation34_spill] sm:$0xff] %v8352_v54 }
 0x130   : > { %v6832_v10 = vpop.eup %6831  ;;  %6853 = vpow2.f32 %v5961_v51  ;;  %v8308_v16 = vpop.f32.mrb[33].mxu1  ;;  %v6712_v51 = vld [vmem:[%s7820_s24 + $0x198] sm:$0xff]   ;;  %11209 = vst [vmem:[#allocation36_spill] sm:$0xff] %v8366_v58 }
 0x131   : > { %v6834_v36 = vpop.eup %6833  ;;  %6855 = vrcp.f32 %v3326_v63  ;;  %11206 = vst [vmem:[#allocation33_spill] sm:$0xff] %v8314_v48  ;;  %4612 = vrot.lane.b32.xlu0 %v6832_v10, %s7776_s27  ;;  %v8317_v25 = vpop.f32.mrb[34].mxu0  ;;  %6438 = vmatmul.mubr.msk.bf16.gmra.mrb[100].mxu0 %vm1102_vm0, %v6712_v51  ;;  %v6089_v41 = vmul.f32 -1.442695, %v8314_v48 }
 0x132   : > { %v6836_v18 = vpop.eup %6835  ;;  %v8319_v33 = vpop.f32.mrb[34].mxu1  ;;  %6857 = vpow2.f32 %v6088_v47 }
 0x133   : > { %v6838_v2 = vpop.eup %6837  ;;  %v8323_v46 = vpop.f32.mrb[35].mxu0  ;;  %6859 = vrcp.f32 %v3449_v6  ;;  %4358 = vrot.lane.b32.xlu1 %v6828_v50, %s7776_s27 }
 0x134   : > { %v8325_v63 = vpop.f32.mrb[35].mxu1  ;;  %v6840_v40 = vpop.eup %6839  ;;  %6861 = vrcp.f32 %v3324_v57  ;;  %v3327_v28 = vadd.f32 1.0, %v6838_v2 }
 0x135   : > { %v6842_v10 = vpop.eup %6841  ;;  %6863 = vpow2.f32 %v5959_v35  ;;  %4352 = vrot.lane.b32.xlu0 %v6826_v60, %s7776_s27  ;;  %v3325_v37 = vadd.f32 1.0, %v6840_v40  ;;  %v8336_v2 = vpop.f32.mrb[36].mxu0 }
 0x136   : > { %v6844_v47 = vpop.eup %6843  ;;  %v3454_v56 = vadd.f32 1.0, %v6842_v10  ;;  %6865 = vpow2.f32 %v6086_v42  ;;  %v8338_v57 = vpop.f32.mrb[36].mxu1 }
 0x137   : > { %v6846_v61 = vpop.eup %6845  ;;  %v3452_v6 = vadd.f32 1.0, %v6844_v47  ;;  %4614 = vrot.lane.b32.xlu1 %v6836_v18, %s7776_s27  ;;  %v8341_v51 = vpop.f32.mrb[37].mxu0 }
 0x138   : > { %v6848_v50 = vpop.eup %6847  ;;  %6867 = vrcp.f32 %v3454_v56  ;;  %v3455_v60 = vadd.f32 1.0, %v6846_v61  ;;  %v8343_v40 = vpop.f32.mrb[37].mxu1 }
 0x139   : > { %v6850_v35 = vpop.eup %6849  ;;  %6869 = vrcp.f32 %v3327_v28  ;;  %v3453_v0 = vadd.f32 1.0, %v6848_v50  ;;  %4608 = vrot.lane.b32.xlu0 %v6834_v36, %s7776_s27  ;;  %v8346_v56 = vpop.f32.mrb[38].mxu0  ;;  %v8362_v36 = vadd.f32 %v8172_v20, %v7993_v23  ;;  %v6087_v20 = vmul.f32 -1.442695, %v8352_v54 }
 0x13a   : > { %v6852_v42 = vpop.eup %6851  ;;  %6871 = vpow2.f32 %v6089_v41  ;;  %v8348_v18 = vpop.f32.mrb[38].mxu1  ;;  %v3330_v47 = vadd.f32 1.0, %v6850_v35  ;;  %v8400_v54 = vadd.f32 %v8186_v30, %v7993_v23 }
 0x13b   : > { %v6854_v10 = vpop.eup %6853  ;;  %6873 = vrcp.f32 %v3325_v37  ;;  %v8354_v61 = vpop.f32.mrb[39].mxu0  ;;  %v3328_v41 = vadd.f32 1.0, %v6852_v42  ;;  %4354 = vrot.lane.b32.xlu1 %v8294_v53, %s7776_s27  ;;  %11208 = vst [vmem:[#allocation35_spill] sm:$0xff] %v8362_v36  ;;  %v5964_v15 = vmul.f32 -1.442695, %v8362_v36 }
 0x13c   : > { %v8356_v28 = vpop.f32.mrb[39].mxu1  ;;  %v6856_v48 = vpop.eup %6855  ;;  %6875 = vrcp.f32 %v3452_v6  ;;  %v3331_v50 = vadd.f32 1.0, %v6854_v10  ;;  %v8370_v6 = vadd.f32 %v8184_v29, %v7993_v23  ;;  %v8382_v29 = vadd.f32 %v8174_v22, %v7993_v23  ;;  %11217 = vst [vmem:[#allocation44_spill] sm:$0xff] %v8400_v54 }
 0x13d   : > { %v6858_v37 = vpop.eup %6857  ;;  %6877 = vrcp.f32 %v3455_v60  ;;  %4364 = vrot.lane.b32.xlu0 %v6856_v48, %s7776_s27  ;;  %v8376_v60 = vadd.f32 %v7993_v23, %v8188_v43  ;;  %v8384_v48 = vpop.f32.mrb[40].mxu0  ;;  %v5962_v43 = vmul.f32 -1.442695, %v8366_v58  ;;  %v6715_v58 = vld [vmem:[%s7820_s24 + $0x1a0] sm:$0xff]  }
 0x13e   : > { %v6860_v35 = vpop.eup %6859  ;;  %6879 = vrcp.f32 %v3453_v0  ;;  %v3458_v44 = vadd.f32 1.0, %v6858_v37  ;;  %11210 = vst [vmem:[#allocation37_spill] sm:$0xff] %v8370_v6  ;;  %11212 = vst [vmem:[#allocation39_spill] sm:$0xff] %v8382_v29  ;;  %v8386_v0 = vpop.f32.mrb[40].mxu1  ;;  %v5965_v22 = vmul.f32 -1.442695, %v8370_v6  ;;  %6441 = vmatprep.mubr.msk.bf16.mxu0 %vm1102_vm0, %v6715_v58 }
 0x13f   : > { %v6862_v53 = vpop.eup %6861  ;;  %6881 = vrcp.f32 %v3330_v47  ;;  %11211 = vst [vmem:[#allocation38_spill] sm:$0xff] %v8376_v60  ;;  %4610 = vrot.lane.b32.xlu1 %v6860_v35, %s7776_s27  ;;  %11213 = vst [vmem:[#allocation40_spill] sm:$0xff] %v8386_v0  ;;  %v8391_v47 = vadd.f32 %v7993_v23, %v8180_v9  ;;  %v8395_v37 = vpop.f32.mrb[41].mxu1  ;;  %v6716_v0 = vld [vmem:[%s7820_s24 + $0x1a8] sm:$0xff]  }
 0x140   : > { %v6864_v42 = vpop.eup %6863  ;;  %6883 = vrcp.f32 %v3328_v41  ;;  %v8393_v41 = vpop.f32.mrb[41].mxu0  ;;  %11216 = vst [vmem:[#allocation43_spill] sm:$0xff] %v8395_v37  ;;  %6442 = vmatmul.mubr.msk.bf16.gmra.mrb[104].mxu0 %vm1102_vm0, %v6716_v0  ;;  %v8436_v0 = vadd.f32 %v7993_v23, %v8203_v3 }
 0x141   : > { %v6866_v10 = vpop.eup %6865  ;;  %6885 = vrcp.f32 %v3331_v50  ;;  %11214 = vst [vmem:[#allocation41_spill] sm:$0xff] %v8391_v47  ;;  %11215 = vst [vmem:[#allocation42_spill] sm:$0xff] %v8393_v41  ;;  %v8402_v36 = vpop.f32.mrb[42].mxu0  ;;  %v5963_v41 = vmul.f32 -1.442695, %v8376_v60  ;;  %v8422_v60 = vadd.f32 %v8195_v19, %v7993_v23 }
 0x142   : > { %v6868_v35 = vpop.eup %6867  ;;  %6887 = vrcp.f32 %v3458_v44  ;;  %v8404_v50 = vpop.f32.mrb[42].mxu1  ;;  %v8412_v44 = vadd.f32 %v7993_v23, %v8190_v59  ;;  %11223 = vst [vmem:[#allocation50_spill] sm:$0xff] %v8436_v0 }
 0x143   : > { %11218 = vst [vmem:[#allocation45_spill] sm:$0xff] %v8404_v50  ;;  %v6870_v9 = vpop.eup %6869  ;;  %6889 = vpow2.f32 %v6087_v20  ;;  %4620 = vrot.lane.b32.xlu0 %v6868_v35, %s7776_s27  ;;  %v8414_v6 = vpop.f32.mrb[43].mxu0  ;;  %v6092_v20 = vmul.f32 -1.442695, %v8382_v29  ;;  %11222 = vst [vmem:[#allocation49_spill] sm:$0xff] %v8422_v60 }
 0x144   : > { %11219 = vst [vmem:[#allocation46_spill] sm:$0xff] %v8412_v44  ;;  %11220 = vst [vmem:[#allocation47_spill] sm:$0xff] %v8414_v6  ;;  %v8416_v30 = vpop.f32.mrb[43].mxu1  ;;  %v6872_v37 = vpop.eup %6871  ;;  %6891 = vpow2.f32 %v5964_v15  ;;  %4366 = vrot.lane.b32.xlu1 %v6870_v9, %s7776_s27  ;;  %v6090_v35 = vmul.f32 -1.442695, %v8391_v47  ;;  %v6718_v9 = vld [vmem:[%s7820_s24 + $0x3a8] sm:$0xff]  }
 0x145   : > { %11221 = vst [vmem:[#allocation48_spill] sm:$0xff] %v8416_v30  ;;  %v6874_v59 = vpop.eup %6873  ;;  %6893 = vpow2.f32 %v5962_v43  ;;  %v6093_v15 = vmul.f32 -1.442695, %v8400_v54  ;;  %v6717_v30 = vld [vmem:[%s7820_s24 + $0x3a0] sm:$0xff]   ;;  %v6091_v29 = vmul.f32 -1.442695, %v8412_v44 }
 0x146   : > { %v6876_v50 = vpop.eup %6875  ;;  %6895 = vpow2.f32 %v5965_v22  ;;  %v5968_v58 = vmul.f32 -1.442695, %v8422_v60  ;;  %v8438_v43 = vpop.f32.mrb[44].mxu0  ;;  %6569 = vmatprep.mubr.msk.bf16.mxu1 %vm1102_vm0, %v6717_v30  ;;  %v3459_v44 = vadd.f32 1.0, %v6872_v37  ;;  %v3329_v60 = vadd.f32 1.0, %v6864_v42 }
 0x147   : > { %v6878_v6 = vpop.eup %6877  ;;  %6897 = vpow2.f32 %v5963_v41  ;;  %4360 = vrot.lane.b32.xlu0 %v6862_v53, %s7776_s27  ;;  %v8440_v22 = vpop.f32.mrb[44].mxu1  ;;  %v8445_v53 = vadd.f32 %v8210_v1, %v7993_v23  ;;  %6570 = vmatmul.mubr.msk.bf16.gmra.mrb[104].mxu1 %vm1102_vm0, %v6718_v9  ;;  %v8456_v30 = vadd.f32 %v7993_v23, %v8220_v24  ;;  %v3456_v47 = vadd.f32 1.0, %v6866_v10 }
 0x148   : > { %v6880_v19 = vpop.eup %6879  ;;  %6899 = vpow2.f32 %v6092_v20  ;;  %4622 = vrot.lane.b32.xlu1 %v6878_v6, %s7776_s27  ;;  %v8447_v6 = vpop.f32.mrb[45].mxu0  ;;  %v5966_v23 = vmul.f32 -1.442695, %v8436_v0 }
 0x149   : > { %v6882_v41 = vpop.eup %6881  ;;  %6901 = vpow2.f32 %v6090_v35  ;;  %11224 = vst [vmem:[#allocation51_spill] sm:$0xff] %v8445_v53  ;;  %v8449_v20 = vpop.f32.mrb[45].mxu1  ;;  %11226 = vst [vmem:[#allocation53_spill] sm:$0xff] %v8456_v30  ;;  %v5969_v42 = vmul.f32 -1.442695, %v8445_v53 }
 0x14a   : > { %11225 = vst [vmem:[#allocation52_spill] sm:$0xff] %v8449_v20  ;;  %v8452_v3 = vpop.eup %6883  ;;  %6903 = vpow2.f32 %v6093_v15  ;;  %v8458_v37 = vpop.f32.mrb[46].mxu0 }
 0x14b   : > { %v8460_v35 = vpop.f32.mrb[46].mxu1  ;;  %v6886_v1 = vpop.eup %6885  ;;  %6905 = vpow2.f32 %v6091_v29  ;;  %4616 = vrot.lane.b32.xlu0 %v6876_v50, %s7776_s27  ;;  %v5967_v29 = vmul.f32 -1.442695, %v8456_v30 }
 0x14c   : > { %11227 = vst [vmem:[#allocation54_spill] sm:$0xff] %v8460_v35  ;;  %v8463_v54 = vpop.f32.mrb[47].mxu0  ;;  %v8465_v9 = vpop.f32.mrb[47].mxu1  ;;  %4362 = vrot.lane.b32.xlu1 %v6874_v59, %s7776_s27  ;;  %6907 = vpow2.f32 %v5968_v58 }
 0x14d   : > { %11228 = vst [vmem:[#allocation55_spill] sm:$0xff] %v8465_v9  ;;  %v6888_v20 = vpop.eup %6887  ;;  %6909 = vrcp.f32 %v3459_v44  ;;  %v8473_v59 = vpop.f32.mrb[48].mxu0 }
 0x14e   : > { %v6890_v24 = vpop.eup %6889  ;;  %6911 = vrcp.f32 %v3329_v60  ;;  %v8475_v44 = vpop.f32.mrb[48].mxu1 }
 0x14f   : > { %v6892_v15 = vpop.eup %6891  ;;  %6913 = vrcp.f32 %v3456_v47  ;;  %v3457_v50 = vadd.f32 1.0, %v6890_v24  ;;  %4372 = vrot.lane.b32.xlu0 %v6882_v41, %s7776_s27  ;;  %11229 = vst [vmem:[#allocation56_spill] sm:$0xff] %v8475_v44  ;;  %v8477_v30 = vpop.f32.mrb[49].mxu0  ;;  %v6719_v47 = vld [vmem:[%s7820_s24 + $0x1b0] sm:$0xff]  }
 0x150   : > { %v6894_v10 = vpop.eup %6893  ;;  %v3334_v35 = vadd.f32 1.0, %v6892_v15  ;;  %4618 = vrot.lane.b32.xlu1 %v6880_v19, %s7776_s27  ;;  %6915 = vpow2.f32 %v5966_v23  ;;  %v8479_v0 = vpop.f32.mrb[49].mxu1  ;;  %v6720_v19 = vld [vmem:[%s7820_s24 + $0x1b8] sm:$0xff]   ;;  %6445 = vmatprep.mubr.msk.bf16.mxu0 %vm1102_vm0, %v6719_v47  ;;  %v6721_v47 = vld [vmem:[%s7820_s24 + $0x3b0] sm:$0xff]  }
 0x151   : > { %v6896_v9 = vpop.eup %6895  ;;  %v3332_v60 = vadd.f32 1.0, %v6894_v10  ;;  %6917 = vpow2.f32 %v5969_v42  ;;  %11230 = vst [vmem:[#allocation57_spill] sm:$0xff] %v8479_v0  ;;  %v8482_v15 = vpop.f32.mrb[50].mxu0  ;;  %6446 = vmatmul.mubr.msk.bf16.gmra.mrb[108].mxu0 %vm1102_vm0, %v6720_v19  ;;  %6573 = vmatprep.mubr.msk.bf16.mxu1 %vm1102_vm0, %v6721_v47 }
 0x152   : > { %v6898_v58 = vpop.eup %6897  ;;  %v3335_v41 = vadd.f32 1.0, %v6896_v9  ;;  %6919 = vpow2.f32 %v5967_v29  ;;  %v8484_v53 = vpop.f32.mrb[50].mxu1 }
 0x153   : > { %v6900_v24 = vpop.eup %6899  ;;  %6921 = vrcp.f32 %v3457_v50  ;;  %v3333_v44 = vadd.f32 1.0, %v6898_v58  ;;  %4628 = vrot.lane.b32.xlu0 %v6888_v20, %s7776_s27  ;;  %v8488_v42 = vpop.f32.mrb[51].mxu0  ;;  %v8498_v20 = vld [vmem:[%s10968_s2] ss:$0 sm:$0xff] }
 0x154   : > { %v6902_v23 = vpop.eup %6901  ;;  %v8490_v10 = vpop.f32.mrb[51].mxu1  ;;  %6923 = vrcp.f32 %v3334_v35  ;;  %v3462_v29 = vadd.f32 1.0, %v6900_v24  ;;  %4374 = vrot.lane.b32.xlu1 %v6886_v1, %s7776_s27  ;;  %v8502_v58 = vadd.f32 %v8498_v20, %v8197_v11  ;;  %v8507_v1 = vadd.f32 %v8498_v20, %v8212_v4  ;;  %v6722_v24 = vld [vmem:[%s7820_s24 + $0x3b8] sm:$0xff]  }
 0x155   : > { %11231 = vst [vmem:[#allocation58_spill] sm:$0xff] %v8490_v10  ;;  %v6904_v9 = vpop.eup %6903  ;;  %6925 = vrcp.f32 %v3332_v60  ;;  %v3460_v50 = vadd.f32 1.0, %v6902_v23  ;;  %v8512_v23 = vadd.f32 %v8498_v20, %v8222_v14  ;;  %v8520_v4 = vadd.f32 %v8498_v20, %v8228_v21  ;;  %6574 = vmatmul.mubr.msk.bf16.gmra.mrb[108].mxu1 %vm1102_vm0, %v6722_v24 }
 0x156   : > { %v6906_v0 = vpop.eup %6905  ;;  %11232 = vst [vmem:[#allocation59_spill] sm:$0xff] %v8502_v58  ;;  %6927 = vrcp.f32 %v3335_v41  ;;  %v3463_v35 = vadd.f32 1.0, %v6904_v9  ;;  %11233 = vst [vmem:[#allocation60_spill] sm:$0xff] %v8507_v1  ;;  %v8530_v9 = vadd.f32 %v8498_v20, %v8257_v62  ;;  %v6094_v21 = vmul.f32 -1.442695, %v8507_v1 }
 0x157   : > { %v6908_v10 = vpop.eup %6907  ;;  %6929 = vrcp.f32 %v3333_v44  ;;  %v3461_v19 = vadd.f32 1.0, %v6906_v0  ;;  %11234 = vst [vmem:[#allocation61_spill] sm:$0xff] %v8512_v23  ;;  %4368 = vrot.lane.b32.xlu0 %v8452_v3, %s7776_s27  ;;  %11235 = vst [vmem:[#allocation62_spill] sm:$0xff] %v8520_v4  ;;  %v8522_v44 = vpop.f32.mrb[52].mxu0  ;;  %v6096_v3 = vmul.f32 -1.442695, %v8502_v58  ;;  %v8537_v47 = vadd.f32 %v8498_v20, %v8267_v49 }
 0x158   : > { %v6910_v60 = vpop.eup %6909  ;;  %6931 = vrcp.f32 %v3462_v29  ;;  %v3338_v41 = vadd.f32 1.0, %v6908_v10  ;;  %v8524_v0 = vpop.f32.mrb[52].mxu1  ;;  %11237 = vst [vmem:[#allocation64_spill] sm:$0xff] %v8530_v9  ;;  %v6097_v58 = vmul.f32 -1.442695, %v8512_v23  ;;  %v8547_v62 = vadd.f32 %v8498_v20, %v8273_v12 }
 0x159   : > { %v6912_v11 = vpop.eup %6911  ;;  %4630 = vrot.lane.b32.xlu1 %v6910_v60, %s7776_s27  ;;  %11236 = vst [vmem:[#allocation63_spill] sm:$0xff] %v8524_v0  ;;  %6933 = vrcp.f32 %v3460_v50  ;;  %v8532_v10 = vpop.f32.mrb[53].mxu0  ;;  %11238 = vst [vmem:[#allocation65_spill] sm:$0xff] %v8537_v47  ;;  %v6095_v0 = vmul.f32 -1.442695, %v8520_v4 }
 0x15a   : > { %v6914_v14 = vpop.eup %6913  ;;  %6935 = vrcp.f32 %v3463_v35  ;;  %v8539_v60 = vpop.f32.mrb[54].mxu0  ;;  %11240 = vst [vmem:[#allocation67_spill] sm:$0xff] %v8547_v62  ;;  %v5972_v12 = vmul.f32 -1.442695, %v8530_v9 }
 0x15b   : > { %v6916_v29 = vpop.eup %6915  ;;  %v8541_v24 = vpop.f32.mrb[53].mxu1  ;;  %6937 = vrcp.f32 %v3461_v19  ;;  %4624 = vrot.lane.b32.xlu0 %v6914_v14, %s7776_s27  ;;  %v8557_v19 = vadd.f32 %v8498_v20, %v8282_v5  ;;  %v5973_v5 = vmul.f32 -1.442695, %v8547_v62 }
 0x15c   : > { %11239 = vst [vmem:[#allocation66_spill] sm:$0xff] %v8541_v24  ;;  %v6918_v50 = vpop.eup %6917  ;;  %v8549_v35 = vpop.f32.mrb[55].mxu0  ;;  %6939 = vrcp.f32 %v3338_v41  ;;  %v8564_v24 = vadd.f32 %v8498_v20, %v8259_v55  ;;  %v5970_v41 = vmul.f32 -1.442695, %v8537_v47 }
 0x15d   : > { %11241 = vst [vmem:[#allocation68_spill] sm:$0xff] %v8549_v35  ;;  %v8551_v1 = vpop.f32.mrb[54].mxu1  ;;  %v6920_v49 = vpop.eup %6919  ;;  %4370 = vrot.lane.b32.xlu1 %v6912_v11, %s7776_s27  ;;  %11243 = vst [vmem:[#allocation70_spill] sm:$0xff] %v8557_v19  ;;  %6941 = vpow2.f32 %v6096_v3  ;;  %v8571_v11 = vadd.f32 %v8498_v20, %v8275_v8  ;;  %v5971_v55 = vmul.f32 -1.442695, %v8557_v19  ;;  %v6723_v8 = vld [vmem:[%s7820_s24 + $0x1c0] sm:$0xff]  }
 0x15e   : > { %11242 = vst [vmem:[#allocation69_spill] sm:$0xff] %v8551_v1  ;;  %v8559_v23 = vpop.f32.mrb[55].mxu1  ;;  %v6922_v14 = vpop.eup %6921  ;;  %11245 = vst [vmem:[#allocation72_spill] sm:$0xff] %v8564_v24  ;;  %6943 = vpow2.f32 %v6094_v21  ;;  %v6100_v62 = vmul.f32 -1.442695, %v8564_v24  ;;  %v6724_v19 = vld [vmem:[%s7820_s24 + $0x1c8] sm:$0xff]   ;;  %6449 = vmatprep.mubr.msk.bf16.mxu0 %vm1102_vm0, %v6723_v8  ;;  %v8610_v8 = vadd.f32 %v8498_v20, %v8302_v17 }
 0x15f   : > { %11244 = vst [vmem:[#allocation71_spill] sm:$0xff] %v8559_v23  ;;  %v6924_v1 = vpop.eup %6923  ;;  %6945 = vpow2.f32 %v6097_v58  ;;  %11246 = vst [vmem:[#allocation73_spill] sm:$0xff] %v8571_v11  ;;  %v8575_v21 = vpop.f32.mrb[56].mxu0  ;;  %v6101_v24 = vmul.f32 -1.442695, %v8571_v11  ;;  %6450 = vmatmul.mubr.msk.bf16.gmra.mrb[112].mxu0 %vm1102_vm0, %v6724_v19  ;;  %v6725_v11 = vld [vmem:[%s7820_s24 + $0x3c0] sm:$0xff]  }
 0x160   : > { %v6926_v4 = vpop.eup %6925  ;;  %4380 = vrot.lane.b32.xlu0 %v6924_v1, %s7776_s27  ;;  %6947 = vpow2.f32 %v6095_v0  ;;  %11247 = vst [vmem:[#allocation74_spill] sm:$0xff] %v8575_v21  ;;  %v8577_v47 = vpop.f32.mrb[56].mxu1  ;;  %v3336_v0 = vadd.f32 1.0, %v6916_v29  ;;  %11254 = vst [vmem:[#allocation81_spill] sm:$0xff] %v8610_v8  ;;  %6577 = vmatprep.mubr.msk.bf16.mxu1 %vm1102_vm0, %v6725_v11  ;;  %v5976_v11 = vmul.f32 -1.442695, %v8610_v8 }
 0x161   : > { %v6928_v3 = vpop.eup %6927  ;;  %4626 = vrot.lane.b32.xlu1 %v6922_v14, %s7776_s27  ;;  %11248 = vst [vmem:[#allocation75_spill] sm:$0xff] %v8577_v47  ;;  %6949 = vpow2.f32 %v5972_v12  ;;  %v8580_v1 = vpop.f32.mrb[57].mxu0  ;;  %v8592_v12 = vadd.f32 %v8498_v20, %v8269_v7  ;;  %v8604_v7 = vadd.f32 %v8498_v20, %v8284_v13 }
 0x162   : > { %v6930_v58 = vpop.eup %6929  ;;  %v8582_v9 = vpop.f32.mrb[57].mxu1  ;;  %6951 = vpow2.f32 %v5970_v41 }
 0x163   : > { %11249 = vst [vmem:[#allocation76_spill] sm:$0xff] %v8582_v9  ;;  %v6932_v23 = vpop.eup %6931  ;;  %v8585_v35 = vpop.f32.mrb[58].mxu0  ;;  %6953 = vpow2.f32 %v5973_v5  ;;  %11251 = vst [vmem:[#allocation78_spill] sm:$0xff] %v8592_v12 }
 0x164   : > { %v8587_v14 = vpop.f32.mrb[58].mxu1  ;;  %v6934_v21 = vpop.eup %6933  ;;  %4636 = vrot.lane.b32.xlu0 %v6932_v23, %s7776_s27  ;;  %6955 = vpow2.f32 %v5971_v55  ;;  %11253 = vst [vmem:[#allocation80_spill] sm:$0xff] %v8604_v7  ;;  %v3337_v23 = vadd.f32 1.0, %v6920_v49 }
 0x165   : > { %11250 = vst [vmem:[#allocation77_spill] sm:$0xff] %v8587_v14  ;;  %v8596_v9 = vpop.f32.mrb[59].mxu0  ;;  %v8598_v29 = vpop.f32.mrb[59].mxu1  ;;  %v3339_v14 = vadd.f32 1.0, %v6918_v50  ;;  %4382 = vrot.lane.b32.xlu1 %v6928_v3, %s7776_s27  ;;  %6957 = vpow2.f32 %v6100_v62  ;;  %v6726_v50 = vld [vmem:[%s7820_s24 + $0x3c8] sm:$0xff]  }
 0x166   : > { %11252 = vst [vmem:[#allocation79_spill] sm:$0xff] %v8598_v29  ;;  %v6936_v41 = vpop.eup %6935  ;;  %6959 = vrcp.f32 %v3336_v0  ;;  %v6098_v3 = vmul.f32 -1.442695, %v8592_v12  ;;  %v6099_v62 = vmul.f32 -1.442695, %v8604_v7  ;;  %v8618_v19 = vpop.f32.mrb[60].mxu0  ;;  %6578 = vmatmul.mubr.msk.bf16.gmra.mrb[112].mxu1 %vm1102_vm0, %v6726_v50 }
 0x167   : > { %v6938_v5 = vpop.eup %6937  ;;  %6961 = vpow2.f32 %v6101_v24  ;;  %v8621_v55 = vpop.f32.mrb[61].mxu0 }
 0x168   : > { %v6940_v47 = vpop.eup %6939  ;;  %4376 = vrot.lane.b32.xlu0 %v6926_v4, %s7776_s27  ;;  %6963 = vrcp.f32 %v3339_v14  ;;  %v8624_v0 = vpop.f32.mrb[62].mxu0 }
 0x169   : > { %v6942_v29 = vpop.eup %6941  ;;  %4638 = vrot.lane.b32.xlu1 %v6936_v41, %s7776_s27  ;;  %6965 = vrcp.f32 %v3337_v23  ;;  %v8627_v41 = vpop.f32.mrb[63].mxu0 }
 0x16a   : > { %v6944_v13 = vpop.eup %6943  ;;  %v3466_v49 = vadd.f32 1.0, %v6942_v29  ;;  %11255 = vst [vmem:[#allocation82_spill] sm:$0xff] %v8627_v41  ;;  %v8629_v7 = vpop.f32.mrb[60].mxu1 }
 0x16b   : > { %v6946_v17 = vpop.eup %6945  ;;  %v3464_v29 = vadd.f32 1.0, %v6944_v13  ;;  %11256 = vst [vmem:[#allocation83_spill] sm:$0xff] %v8629_v7 }
 0x16c   : > { %v6948_v24 = vpop.eup %6947  ;;  %6967 = vrcp.f32 %v3466_v49  ;;  %v3467_v4 = vadd.f32 1.0, %v6946_v17  ;;  %4632 = vrot.lane.b32.xlu0 %v6934_v21, %s7776_s27  ;;  %v8632_v49 = vpop.f32.mrb[61].mxu1 }
 0x16d   : > { %v6950_v14 = vpop.eup %6949  ;;  %6969 = vpow2.f32 %v6098_v3  ;;  %v3465_v23 = vadd.f32 1.0, %v6948_v24  ;;  %4378 = vrot.lane.b32.xlu1 %v6930_v58, %s7776_s27  ;;  %v8634_v12 = vpop.f32.mrb[62].mxu1 }
 0x16e   : > { %v6952_v50 = vpop.eup %6951  ;;  %6971 = vpow2.f32 %v6099_v62  ;;  %v3342_v8 = vadd.f32 1.0, %v6950_v14  ;;  %v8636_v21 = vpop.f32.mrb[63].mxu1  ;;  %v8640_v62 = vadd.f32 %v8498_v20, %v8306_v34  ;;  %v6727_v34 = vld [vmem:[%s7820_s24 + $0x1d0] sm:$0xff]  }
 0x16f   : > { %v6954_v17 = vpop.eup %6953  ;;  %6973 = vrcp.f32 %v3467_v4  ;;  %v3340_v3 = vadd.f32 1.0, %v6952_v50  ;;  %v8646_v4 = vadd.f32 %v8498_v20, %v8317_v25  ;;  %6453 = vmatprep.mubr.msk.bf16.mxu0 %vm1102_vm0, %v6727_v34  ;;  %v8683_v34 = vpop.f32.mrb[64].mxu0 }
 0x170   : > { %v6956_v13 = vpop.eup %6955  ;;  %6975 = vpow2.f32 %v5976_v11  ;;  %v3343_v7 = vadd.f32 1.0, %v6954_v17  ;;  %11257 = vst [vmem:[#allocation84_spill] sm:$0xff] %v8640_v62  ;;  %4388 = vrot.lane.b32.xlu0 %v6940_v47, %s7776_s27  ;;  %v5974_v25 = vmul.f32 -1.442695, %v8640_v62 }
 0x171   : > { %v6958_v41 = vpop.eup %6957  ;;  %6977 = vrcp.f32 %v3464_v29  ;;  %v3341_v24 = vadd.f32 1.0, %v6956_v13  ;;  %4634 = vrot.lane.b32.xlu1 %v6938_v5, %s7776_s27  ;;  %11258 = vst [vmem:[#allocation85_spill] sm:$0xff] %v8646_v4  ;;  %v8650_v29 = vadd.f32 %v8498_v20, %v8323_v46  ;;  %v6728_v5 = vld [vmem:[%s7820_s24 + $0x1d8] sm:$0xff]   ;;  %v8675_v13 = vadd.f32 %v8498_v20, %v8325_v63  ;;  %v8688_v63 = vpop.f32.mrb[65].mxu0 }
 0x172   : > { %v6960_v58 = vpop.eup %6959  ;;  %6979 = vrcp.f32 %v3465_v23  ;;  %v3470_v14 = vadd.f32 1.0, %v6958_v41  ;;  %v8655_v23 = vadd.f32 %v8498_v20, %v8304_v52  ;;  %v5977_v41 = vmul.f32 -1.442695, %v8646_v4  ;;  %6454 = vmatmul.mubr.msk.bf16.gmra.mrb[116].mxu0 %vm1102_vm0, %v6728_v5  ;;  %v6731_v4 = vld [vmem:[%s7820_s24 + $0x1e0] sm:$0xff]  }
 0x173   : > { %v6962_v11 = vpop.eup %6961  ;;  %6981 = vrcp.f32 %v3342_v8  ;;  %11259 = vst [vmem:[#allocation86_spill] sm:$0xff] %v8650_v29  ;;  %v8661_v8 = vadd.f32 %v8498_v20, %v8308_v16  ;;  %v8668_v52 = vadd.f32 %v8498_v20, %v8319_v33  ;;  %v5975_v16 = vmul.f32 -1.442695, %v8650_v29  ;;  %11263 = vst [vmem:[#allocation90_spill] sm:$0xff] %v8675_v13  ;;  %v8697_v29 = vpop.f32.mrb[66].mxu0  ;;  %6457 = vmatprep.mubr.msk.bf16.mxu0 %vm1102_vm0, %v6731_v4 }
 0x174   : > { %v6964_v50 = vpop.eup %6963  ;;  %6983 = vrcp.f32 %v3340_v3  ;;  %v3471_v47 = vadd.f32 1.0, %v6962_v11  ;;  %11260 = vst [vmem:[#allocation87_spill] sm:$0xff] %v8655_v23  ;;  %v6729_v3 = vld [vmem:[%s7820_s24 + $0x3d0] sm:$0xff]   ;;  %v6104_v11 = vmul.f32 -1.442695, %v8655_v23  ;;  %v8681_v33 = vadd.f32 %v8498_v20, %v8336_v2 }
 0x175   : > { %v6966_v17 = vpop.eup %6965  ;;  %6985 = vrcp.f32 %v3343_v7  ;;  %11261 = vst [vmem:[#allocation88_spill] sm:$0xff] %v8661_v8  ;;  %4390 = vrot.lane.b32.xlu1 %v6964_v50, %s7776_s27  ;;  %11262 = vst [vmem:[#allocation89_spill] sm:$0xff] %v8668_v52  ;;  %v6102_v5 = vmul.f32 -1.442695, %v8661_v8  ;;  %6581 = vmatprep.mubr.msk.bf16.mxu1 %vm1102_vm0, %v6729_v3  ;;  %v8694_v2 = vadd.f32 %v8498_v20, %v8346_v56  ;;  %v6103_v3 = vmul.f32 -1.442695, %v8675_v13 }
 0x176   : > { %v6968_v46 = vpop.eup %6967  ;;  %6987 = vrcp.f32 %v3341_v24  ;;  %11264 = vst [vmem:[#allocation91_spill] sm:$0xff] %v8681_v33  ;;  %v5980_v8 = vmul.f32 -1.442695, %v8681_v33  ;;  %v8706_v56 = vpop.f32.mrb[67].mxu0 }
 0x177   : > { %v6970_v7 = vpop.eup %6969  ;;  %6989 = vrcp.f32 %v3470_v14  ;;  %4644 = vrot.lane.b32.xlu0 %v6968_v46, %s7776_s27  ;;  %v6730_v14 = vld [vmem:[%s7820_s24 + $0x3d8] sm:$0xff]   ;;  %11265 = vst [vmem:[#allocation92_spill] sm:$0xff] %v8694_v2 }
 0x178   : > { %v6972_v24 = vpop.eup %6971  ;;  %6991 = vrcp.f32 %v3471_v47  ;;  %v6105_v47 = vmul.f32 -1.442695, %v8668_v52  ;;  %6582 = vmatmul.mubr.msk.bf16.gmra.mrb[116].mxu1 %vm1102_vm0, %v6730_v14  ;;  %v3468_v62 = vadd.f32 1.0, %v6970_v7  ;;  %v8708_v52 = vpop.f32.mrb[64].mxu1  ;;  %v8724_v7 = vadd.f32 %v8498_v20, %v8354_v61 }
 0x179   : > { %v6974_v50 = vpop.eup %6973  ;;  %6993 = vpow2.f32 %v5974_v25  ;;  %v3469_v13 = vadd.f32 1.0, %v6972_v24 }
 0x17a   : > { %v6976_v46 = vpop.eup %6975  ;;  %6995 = vpow2.f32 %v5977_v41  ;;  %4646 = vrot.lane.b32.xlu1 %v6974_v50, %s7776_s27  ;;  %v8704_v50 = vadd.f32 %v8498_v20, %v8338_v57  ;;  %v8719_v57 = vpop.f32.mrb[65].mxu1  ;;  %11268 = vst [vmem:[#allocation95_spill] sm:$0xff] %v8724_v7 }
 0x17b   : > { %v6978_v25 = vpop.eup %6977  ;;  %6997 = vpow2.f32 %v5975_v16  ;;  %4384 = vrot.lane.b32.xlu0 %v6960_v58, %s7776_s27  ;;  %v8715_v58 = vadd.f32 %v8498_v20, %v8341_v51 }
 0x17c   : > { %v6980_v41 = vpop.eup %6979  ;;  %6999 = vpow2.f32 %v6104_v11  ;;  %11266 = vst [vmem:[#allocation93_spill] sm:$0xff] %v8704_v50  ;;  %v5981_v11 = vmul.f32 -1.442695, %v8694_v2  ;;  %v6108_v51 = vmul.f32 -1.442695, %v8704_v50 }
 0x17d   : > { %v6982_v14 = vpop.eup %6981  ;;  %7001 = vpow2.f32 %v6102_v5  ;;  %11267 = vst [vmem:[#allocation94_spill] sm:$0xff] %v8715_v58  ;;  %v8726_v5 = vpop.f32.mrb[66].mxu1  ;;  %v5979_v50 = vmul.f32 -1.442695, %v8724_v7 }
 0x17e   : > { %v8710_v16 = vpop.eup %6983  ;;  %7003 = vpow2.f32 %v6105_v47  ;;  %4386 = vrot.lane.b32.xlu1 %v6966_v17, %s7776_s27  ;;  %11269 = vst [vmem:[#allocation96_spill] sm:$0xff] %v8726_v5  ;;  %v8733_v47 = vadd.f32 %v8498_v20, %v8343_v40  ;;  %v8735_v2 = vpop.f32.mrb[67].mxu1  ;;  %v5978_v40 = vmul.f32 -1.442695, %v8715_v58 }
 0x17f   : > { %v6986_v33 = vpop.eup %6985  ;;  %7005 = vpow2.f32 %v6103_v3  ;;  %4640 = vrot.lane.b32.xlu0 %v6978_v25, %s7776_s27  ;;  %11271 = vst [vmem:[#allocation98_spill] sm:$0xff] %v8735_v2  ;;  %v3346_v25 = vadd.f32 1.0, %v6976_v46  ;;  %v4341_v61 = vpop.permute.xlu1 %4340 }
 0x180   : > { %v8728_v17 = vpop.eup %6987  ;;  %7007 = vpow2.f32 %v5980_v8  ;;  %11270 = vst [vmem:[#allocation97_spill] sm:$0xff] %v8733_v47  ;;  %v4597_v3 = vpop.permute.xlu0 %4596 }
 0x181   : > { %v6990_v24 = vpop.eup %6989  ;;  %7009 = vrcp.f32 %v3468_v62  ;;  %v5106_v62 = vmul.f32 %v4341_v61, %v7996_v26  ;;  %v5234_v23 = vmul.f32 %v4597_v3, %v7999_v27 }
 0x182   : > { %v6992_v8 = vpop.eup %6991  ;;  %4642 = vrot.lane.b32.xlu1 %v6980_v41, %s7776_s27  ;;  %7011 = vpow2.f32 %v5981_v11  ;;  %v6106_v41 = vmul.f32 -1.442695, %v8733_v47  ;;  %v6732_v11 = vld [vmem:[%s7820_s24 + $0x1e8] sm:$0xff]  }
 0x183   : > { %v6994_v46 = vpop.eup %6993  ;;  %7013 = vrcp.f32 %v3469_v13  ;;  %4396 = vrot.lane.b32.xlu0 %v6982_v14, %s7776_s27  ;;  %5363 = vst.msk [vmem:[%s8740_s6 + $0x10] sm:$0xff] %vm5360_vm1, %v5106_v62  ;;  %5491 = vst.msk [vmem:[%s8740_s6 + $0x410] sm:$0xff] %vm5360_vm1, %v5234_v23  ;;  %v4343_v26 = vpop.permute.xlu1 %4342  ;;  %6458 = vmatmul.mubr.msk.bf16.gmra.mrb[120].mxu0 %vm1102_vm0, %v6732_v11  ;;  %v6733_v23 = vld [vmem:[%s7820_s24 + $0x3e0] sm:$0xff]  }
 0x184   : > { %v6996_v2 = vpop.eup %6995  ;;  %7015 = vpow2.f32 %v6108_v51  ;;  %v3344_v5 = vadd.f32 1.0, %v6994_v46  ;;  %v5107_v14 = vmul.f32 %v4343_v26, %v8012_v38  ;;  %v4337_v51 = vpop.permute.xlu0 %4336  ;;  %6585 = vmatprep.mubr.msk.bf16.mxu1 %vm1102_vm0, %v6733_v23 }
 0x185   : > { %v6998_v58 = vpop.eup %6997  ;;  %7017 = vrcp.f32 %v3346_v25  ;;  %v3347_v27 = vadd.f32 1.0, %v6996_v2  ;;  %v5104_v4 = vmul.f32 %v4337_v51, %v8003_v31  ;;  %v8767_v46 = vpop.f32.mrb[68].mxu0 }
 0x186   : > { %v7000_v13 = vpop.eup %6999  ;;  %7019 = vpow2.f32 %v5978_v40  ;;  %4398 = vrot.lane.b32.xlu1 %v6986_v33, %s7776_s27  ;;  %v3345_v61 = vadd.f32 1.0, %v6998_v58  ;;  %5364 = vst.msk [vmem:[%s8740_s6 + $0x18] sm:$0xff] %vm5360_vm1, %v5107_v14  ;;  %v6734_v33 = vld [vmem:[%s7820_s24 + $0x3e8] sm:$0xff]   ;;  %v8772_v58 = vadd.f32 %v8498_v20, %v8348_v18 }
 0x187   : > { %v7002_v25 = vpop.eup %7001  ;;  %7021 = vpow2.f32 %v5979_v50  ;;  %4652 = vrot.lane.b32.xlu0 %v6990_v24, %s7776_s27  ;;  %v3474_v2 = vadd.f32 1.0, %v7000_v13  ;;  %5361 = vst.msk [vmem:[%s8740_s6] sm:$0xff] %vm5360_vm1, %v5104_v4  ;;  %v4599_v62 = vpop.permute.xlu1 %4598  ;;  %6586 = vmatmul.mubr.msk.bf16.gmra.mrb[120].mxu1 %vm1102_vm0, %v6734_v33 }
 0x188   : > { %v7004_v3 = vpop.eup %7003  ;;  %7023 = vpow2.f32 %v6106_v41  ;;  %v3472_v38 = vadd.f32 1.0, %v7002_v25  ;;  %11272 = vst [vmem:[#allocation99_spill] sm:$0xff] %v8772_v58  ;;  %v4593_v24 = vpop.permute.xlu0 %4592 }
 0x189   : > { %v7006_v40 = vpop.eup %7005  ;;  %7025 = vrcp.f32 %v3344_v5  ;;  %v3475_v31 = vadd.f32 1.0, %v7004_v3  ;;  %v5235_v5 = vmul.f32 %v4599_v62, %v8015_v39  ;;  %v8776_v41 = vpop.f32.mrb[69].mxu0  ;;  %v5232_v18 = vmul.f32 %v4593_v24, %v8006_v32  ;;  %v11277_v62 = vld [vmem:[#allocation2_spill] sm:$0xff]  ;;  %v11279_v24 = vld [vmem:[#allocation47_spill] sm:$0xff] }
 0x18a   : > { %v7008_v50 = vpop.eup %7007  ;;  %7027 = vrcp.f32 %v3347_v27  ;;  %4654 = vrot.lane.b32.xlu1 %v6992_v8, %s7776_s27  ;;  %v3473_v26 = vadd.f32 1.0, %v7006_v40  ;;  %v8782_v13 = vpop.f32.mrb[70].mxu0  ;;  %v8786_v39 = vadd.f32 %v8498_v20, %v8356_v28  ;;  %v8796_v32 = vadd.f32 %v8498_v20, %v8384_v48 }
 0x18b   : > { %v7010_v11 = vpop.eup %7009  ;;  %7029 = vrcp.f32 %v3345_v61  ;;  %4392 = vrot.lane.b32.xlu0 %v8710_v16, %s7776_s27  ;;  %v3350_v8 = vadd.f32 1.0, %v7008_v50  ;;  %5492 = vst.msk [vmem:[%s8740_s6 + $0x418] sm:$0xff] %vm5360_vm1, %v5235_v5  ;;  %v8790_v14 = vpop.f32.mrb[71].mxu0  ;;  %5489 = vst.msk [vmem:[%s8740_s6 + $0x400] sm:$0xff] %vm5360_vm1, %v5232_v18  ;;  %v6109_v28 = vmul.f32 -1.442695, %v8772_v58 }
 0x18c   : > { %v7012_v27 = vpop.eup %7011  ;;  %7031 = vrcp.f32 %v3474_v2  ;;  %11273 = vst [vmem:[#allocation100_spill] sm:$0xff] %v8786_v39  ;;  %v4595_v16 = vpop.permute.xlu1 %4594  ;;  %11274 = vst [vmem:[#allocation101_spill] sm:$0xff] %v8796_v32  ;;  %v11275_v2 = vld [vmem:[#allocation42_spill] sm:$0xff]  ;;  %v6107_v5 = vmul.f32 -1.442695, %v8786_v39  ;;  %v11289_v39 = vld [vmem:[#allocation48_spill] sm:$0xff] }
 0x18d   : > { %v7014_v51 = vpop.eup %7013  ;;  %7033 = vrcp.f32 %v3472_v38  ;;  %v3351_v25 = vadd.f32 1.0, %v7012_v27  ;;  %v8798_v61 = vpop.f32.mrb[68].mxu1  ;;  %v5233_v23 = vmul.f32 %v4595_v16, %v8024_v45  ;;  %v8806_v33 = vadd.f32 %v8498_v20, %v11275_v2 }
 0x18e   : > { %v7016_v4 = vpop.eup %7015  ;;  %7035 = vrcp.f32 %v3475_v31  ;;  %4394 = vrot.lane.b32.xlu1 %v8728_v17, %s7776_s27  ;;  %v4339_v3 = vpop.permute.xlu0 %4338  ;;  %v8814_v17 = vadd.f32 %v8498_v20, %v8402_v36  ;;  %v5984_v27 = vmul.f32 -1.442695, %v8796_v32  ;;  %v11281_v36 = vld [vmem:[#allocation40_spill] sm:$0xff] }
 0x18f   : > { %11276 = vst [vmem:[#allocation42_spill] sm:$0xff] %v8806_v33  ;;  %v8808_v40 = vpop.f32.mrb[69].mxu1  ;;  %v7018_v48 = vpop.eup %7017  ;;  %7037 = vrcp.f32 %v3473_v26  ;;  %v3478_v38 = vadd.f32 1.0, %v7016_v4  ;;  %4648 = vrot.lane.b32.xlu0 %v7010_v11, %s7776_s27  ;;  %v5105_v50 = vmul.f32 %v4339_v3, %v11277_v62  ;;  %5490 = vst.msk [vmem:[%s8740_s6 + $0x408] sm:$0xff] %vm5360_vm1, %v5233_v23  ;;  %v8823_v26 = vadd.f32 %v8498_v20, %v11279_v24  ;;  %v11283_v3 = vld [vmem:[#allocation5_spill] sm:$0xff]  ;;  %v11284_v62 = vld [vmem:[#allocation43_spill] sm:$0xff] }
 0x190   : > { %11278 = vst [vmem:[#allocation2_spill] sm:$0xff] %v8814_v17  ;;  %v8816_v45 = vpop.f32.mrb[70].mxu1  ;;  %v7020_v31 = vpop.eup %7019  ;;  %7039 = vrcp.f32 %v3350_v8  ;;  %v8832_v8 = vadd.f32 %v8498_v20, %v11281_v36  ;;  %v5982_v23 = vmul.f32 -1.442695, %v8806_v33  ;;  %v8839_v24 = vadd.f32 %v8498_v20, %v11284_v62 }
 0x191   : > { %11280 = vst [vmem:[#allocation47_spill] sm:$0xff] %v8823_v26  ;;  %v8825_v18 = vpop.f32.mrb[71].mxu1  ;;  %v7022_v11 = vpop.eup %7021  ;;  %7041 = vrcp.f32 %v3351_v25  ;;  %5362 = vst.msk [vmem:[%s8740_s6 + $0x8] sm:$0xff] %vm5360_vm1, %v5105_v50  ;;  %v5985_v36 = vmul.f32 -1.442695, %v8814_v17 }
 0x192   : > { %11282 = vst [vmem:[#allocation40_spill] sm:$0xff] %v8832_v8  ;;  %v4351_v16 = vpop.permute.xlu1 %4350  ;;  %v7024_v4 = vpop.eup %7023  ;;  %7043 = vrcp.f32 %v3478_v38  ;;  %4650 = vrot.lane.b32.xlu1 %v7014_v51, %s7776_s27  ;;  %11285 = vst [vmem:[#allocation5_spill] sm:$0xff] %v8839_v24  ;;  %v11286_v38 = vld [vmem:[#allocation3_spill] sm:$0xff]  ;;  %v11287_v51 = vld [vmem:[#allocation45_spill] sm:$0xff]  ;;  %v5983_v62 = vmul.f32 -1.442695, %v8823_v26 }
 0x193   : > { %v5111_v2 = vmul.f32 %v4351_v16, %v11283_v3  ;;  %v4349_v25 = vpop.permute.xlu0 %4348  ;;  %v7026_v50 = vpop.eup %7025  ;;  %7045 = vpow2.f32 %v6109_v28  ;;  %4404 = vrot.lane.b32.xlu0 %v7018_v48, %s7776_s27  ;;  %v8846_v33 = vadd.f32 %v8498_v20, %v11287_v51  ;;  %v6735_v16 = vld [vmem:[%s7820_s24 + $0x1f0] sm:$0xff]   ;;  %v8854_v28 = vadd.f32 %v8498_v20, %v11289_v39 }
 0x194   : > { %v5110_v32 = vmul.f32 %v4349_v25, %v11286_v38  ;;  %v7028_v3 = vpop.eup %7027  ;;  %7047 = vpow2.f32 %v6107_v5  ;;  %v6112_v48 = vmul.f32 -1.442695, %v8832_v8  ;;  %6461 = vmatprep.mubr.msk.bf16.mxu0 %vm1102_vm0, %v6735_v16  ;;  %v6736_v25 = vld [vmem:[%s7820_s24 + $0x1f8] sm:$0xff]   ;;  %v6110_v5 = vmul.f32 -1.442695, %v8839_v24  ;;  %v8874_v24 = vpop.f32.mrb[72].mxu0 }
 0x195   : > { %11288 = vst [vmem:[#allocation43_spill] sm:$0xff] %v8846_v33  ;;  %5368 = vst.msk [vmem:[%s8740_s6 + $0x38] sm:$0xff] %vm5360_vm1, %v5111_v2  ;;  %v7030_v17 = vpop.eup %7029  ;;  %7049 = vpow2.f32 %v5984_v27  ;;  %v6113_v39 = vmul.f32 -1.442695, %v8846_v33  ;;  %v11291_v27 = vld [vmem:[#allocation4_spill] sm:$0xff]  ;;  %6462 = vmatmul.mubr.msk.bf16.gmra.mrb[124].mxu0 %vm1102_vm0, %v6736_v25  ;;  %v8879_v25 = vadd.f32 %v8498_v20, %v8447_v6  ;;  %v6738_v6 = vld [vmem:[%s7820_s24 + $0x3f8] sm:$0xff]  }
 0x196   : > { %11290 = vst [vmem:[#allocation3_spill] sm:$0xff] %v8854_v28  ;;  %5367 = vst.msk [vmem:[%s8740_s6 + $0x30] sm:$0xff] %vm5360_vm1, %v5110_v32  ;;  %v7032_v38 = vpop.eup %7031  ;;  %7051 = vpow2.f32 %v5982_v23  ;;  %4406 = vrot.lane.b32.xlu1 %v7028_v3, %s7776_s27  ;;  %v6111_v23 = vmul.f32 -1.442695, %v8854_v28  ;;  %v3348_v3 = vadd.f32 1.0, %v7020_v31  ;;  %v8881_v31 = vpop.f32.mrb[73].mxu0 }
 0x197   : > { %v4605_v2 = vpop.permute.xlu0 %4604  ;;  %v7034_v51 = vpop.eup %7033  ;;  %7053 = vpow2.f32 %v5985_v36  ;;  %4660 = vrot.lane.b32.xlu0 %v7032_v38, %s7776_s27  ;;  %v8872_v36 = vadd.f32 %v8498_v20, %v8438_v43  ;;  %11293 = vst [vmem:[#allocation48_spill] sm:$0xff] %v8879_v25  ;;  %v3476_v43 = vadd.f32 1.0, %v7024_v4 }
 0x198   : > { %v5238_v26 = vmul.f32 %v4605_v2, %v11291_v27  ;;  %v7036_v32 = vpop.eup %7035  ;;  %7055 = vpow2.f32 %v5983_v62  ;;  %v3349_v2 = vadd.f32 1.0, %v7022_v11  ;;  %v11294_v27 = vld [vmem:[#allocation6_spill] sm:$0xff] }
 0x199   : > { %v7038_v16 = vpop.eup %7037  ;;  %7057 = vpow2.f32 %v6112_v48  ;;  %11292 = vst [vmem:[#allocation45_spill] sm:$0xff] %v8872_v36  ;;  %v4607_v33 = vpop.permute.xlu1 %4606 }
 0x19a   : > { %5495 = vst.msk [vmem:[%s8740_s6 + $0x430] sm:$0xff] %vm5360_vm1, %v5238_v26  ;;  %v7040_v38 = vpop.eup %7039  ;;  %7059 = vpow2.f32 %v6110_v5  ;;  %4662 = vrot.lane.b32.xlu1 %v7036_v32, %s7776_s27  ;;  %v6737_v26 = vld [vmem:[%s7820_s24 + $0x3f0] sm:$0xff]   ;;  %v8890_v5 = vadd.f32 %v8498_v20, %v8458_v37  ;;  %v8892_v32 = vpop.f32.mrb[74].mxu0  ;;  %v5988_v37 = vmul.f32 -1.442695, %v8872_v36 }
 0x19b   : > { %v4345_v62 = vpop.permute.xlu0 %4344  ;;  %v8884_v48 = vpop.eup %7041  ;;  %7061 = vpow2.f32 %v6113_v39  ;;  %4400 = vrot.lane.b32.xlu0 %v7026_v50, %s7776_s27  ;;  %6589 = vmatprep.mubr.msk.bf16.mxu1 %vm1102_vm0, %v6737_v26  ;;  %v11296_v50 = vld [vmem:[#allocation9_spill] sm:$0xff]  ;;  %v5986_v26 = vmul.f32 -1.442695, %v8879_v25 }
 0x19c   : > { %v5108_v11 = vmul.f32 %v4345_v62, %v11294_v27  ;;  %11295 = vst [vmem:[#allocation4_spill] sm:$0xff] %v8890_v5  ;;  %v8895_v28 = vpop.eup %7043  ;;  %7063 = vpow2.f32 %v6111_v23  ;;  %v8897_v8 = vpop.f32.mrb[75].mxu0  ;;  %v5239_v39 = vmul.f32 %v4607_v33, %v11296_v50  ;;  %6590 = vmatmul.mubr.msk.bf16.gmra.mrb[124].mxu1 %vm1102_vm0, %v6738_v6  ;;  %v11298_v33 = vld [vmem:[#allocation8_spill] sm:$0xff]  ;;  %v5989_v6 = vmul.f32 -1.442695, %v8890_v5 }
 0x19d   : > { %v7046_v4 = vpop.eup %7045  ;;  %7065 = vrcp.f32 %v3348_v3  ;;  %v8904_v62 = vpop.f32.mrb[72].mxu1 }
 0x19e   : > { %5365 = vst.msk [vmem:[%s8740_s6 + $0x20] sm:$0xff] %vm5360_vm1, %v5108_v11  ;;  %v7048_v27 = vpop.eup %7047  ;;  %7067 = vrcp.f32 %v3349_v2  ;;  %v3479_v23 = vadd.f32 1.0, %v7046_v4  ;;  %4402 = vrot.lane.b32.xlu1 %v7030_v17, %s7776_s27  ;;  %v8909_v7 = vpop.f32.mrb[73].mxu1  ;;  %5496 = vst.msk [vmem:[%s8740_s6 + $0x438] sm:$0xff] %vm5360_vm1, %v5239_v39 }
 0x19f   : > { %v4601_v47 = vpop.permute.xlu0 %4600  ;;  %11297 = vst [vmem:[#allocation6_spill] sm:$0xff] %v8909_v7  ;;  %v7050_v3 = vpop.eup %7049  ;;  %7069 = vrcp.f32 %v3476_v43  ;;  %4656 = vrot.lane.b32.xlu0 %v7034_v51, %s7776_s27  ;;  %v3477_v17 = vadd.f32 1.0, %v7048_v27  ;;  %v11299_v43 = vld [vmem:[#allocation7_spill] sm:$0xff] }
 0x1a0   : > { %v5236_v11 = vmul.f32 %v4601_v47, %v11298_v33  ;;  %v8916_v2 = vpop.f32.mrb[74].mxu1  ;;  %v7052_v4 = vpop.eup %7051  ;;  %7071 = vrcp.f32 %v3479_v23  ;;  %v3354_v58 = vadd.f32 1.0, %v7050_v3  ;;  %v11300_v27 = vld [vmem:[#allocation11_spill] sm:$0xff] }
 0x1a1   : > { %v4347_v50 = vpop.permute.xlu1 %4346  ;;  %v8918_v25 = vpop.f32.mrb[75].mxu1  ;;  %7073 = vpow2.f32 %v5988_v37  ;;  %v3352_v47 = vadd.f32 1.0, %v7052_v4 }
 0x1a2   : > { %v7054_v36 = vpop.eup %7053  ;;  %v5109_v7 = vmul.f32 %v4347_v50, %v11299_v43  ;;  %5493 = vst.msk [vmem:[%s8740_s6 + $0x420] sm:$0xff] %vm5360_vm1, %v5236_v11  ;;  %4658 = vrot.lane.b32.xlu1 %v7038_v16, %s7776_s27  ;;  %7075 = vpow2.f32 %v5986_v26  ;;  %v11301_v26 = vld [vmem:[#allocation10_spill] sm:$0xff] }
 0x1a3   : > { %v7056_v51 = vpop.eup %7055  ;;  %v4357_v39 = vpop.permute.xlu0 %4356  ;;  %v3355_v33 = vadd.f32 1.0, %v7054_v36  ;;  %7077 = vpow2.f32 %v5989_v6  ;;  %4412 = vrot.lane.b32.xlu0 %v7040_v38, %s7776_s27  ;;  %v8931_v36 = vadd.f32 %v8498_v20, %v8463_v54  ;;  %v8939_v6 = vadd.f32 %v8498_v20, %v8440_v22  ;;  %v11304_v54 = vld [vmem:[#allocation52_spill] sm:$0xff] }
 0x1a4   : > { %v7058_v23 = vpop.eup %7057  ;;  %5366 = vst.msk [vmem:[%s8740_s6 + $0x28] sm:$0xff] %vm5360_vm1, %v5109_v7  ;;  %v5114_v3 = vmul.f32 %v4357_v39, %v11300_v27  ;;  %7079 = vrcp.f32 %v3477_v17  ;;  %v3353_v37 = vadd.f32 1.0, %v7056_v51  ;;  %v8945_v39 = vadd.f32 %v8498_v20, %v11304_v54 }
 0x1a5   : > { %v7060_v50 = vpop.eup %7059  ;;  %v4603_v11 = vpop.permute.xlu1 %4602  ;;  %7081 = vrcp.f32 %v3354_v58  ;;  %v3482_v16 = vadd.f32 1.0, %v7058_v23  ;;  %11302 = vst [vmem:[#allocation9_spill] sm:$0xff] %v8931_v36  ;;  %11303 = vst [vmem:[#allocation8_spill] sm:$0xff] %v8939_v6 }
 0x1a6   : > { %v7062_v4 = vpop.eup %7061  ;;  %v5237_v43 = vmul.f32 %v4603_v11, %v11301_v26  ;;  %5371 = vst.msk [vmem:[%s8740_s6 + $0x50] sm:$0xff] %vm5360_vm1, %v5114_v3  ;;  %7083 = vrcp.f32 %v3352_v47  ;;  %v3480_v38 = vadd.f32 1.0, %v7060_v50  ;;  %4414 = vrot.lane.b32.xlu1 %v8884_v48, %s7776_s27  ;;  %11305 = vst [vmem:[#allocation7_spill] sm:$0xff] %v8945_v39  ;;  %v11306_v47 = vld [vmem:[#allocation15_spill] sm:$0xff]  ;;  %v11307_v3 = vld [vmem:[#allocation54_spill] sm:$0xff] }
 0x1a7   : > { %v7064_v7 = vpop.eup %7063  ;;  %v4613_v58 = vpop.permute.xlu0 %4612  ;;  %7085 = vrcp.f32 %v3355_v33  ;;  %v3483_v51 = vadd.f32 1.0, %v7062_v4  ;;  %4668 = vrot.lane.b32.xlu0 %v8895_v28, %s7776_s27  ;;  %v8952_v33 = vadd.f32 %v8498_v20, %v11307_v3  ;;  %v5987_v11 = vmul.f32 -1.442695, %v8931_v36  ;;  %v11309_v4 = vld [vmem:[#allocation13_spill] sm:$0xff] }
 0x1a8   : > { %v7066_v17 = vpop.eup %7065  ;;  %5494 = vst.msk [vmem:[%s8740_s6 + $0x428] sm:$0xff] %vm5360_vm1, %v5237_v43  ;;  %v5242_v48 = vmul.f32 %v4613_v58, %v11306_v47  ;;  %7087 = vrcp.f32 %v3353_v37  ;;  %v3481_v22 = vadd.f32 1.0, %v7064_v7  ;;  %v11310_v43 = vld [vmem:[#allocation55_spill] sm:$0xff]  ;;  %v8962_v37 = vpop.f32.mrb[76].mxu0  ;;  %v6116_v58 = vmul.f32 -1.442695, %v8939_v6 }
 0x1a9   : > { %v7068_v23 = vpop.eup %7067  ;;  %v4359_v27 = vpop.permute.xlu1 %4358  ;;  %11308 = vst [vmem:[#allocation11_spill] sm:$0xff] %v8952_v33  ;;  %7089 = vrcp.f32 %v3482_v16  ;;  %v8958_v28 = vadd.f32 %v8498_v20, %v11310_v43  ;;  %v8967_v16 = vadd.f32 %v8498_v20, %v8473_v59  ;;  %v6114_v3 = vmul.f32 -1.442695, %v8945_v39 }
 0x1aa   : > { %v7070_v50 = vpop.eup %7069  ;;  %v5115_v26 = vmul.f32 %v4359_v27, %v11309_v4  ;;  %5499 = vst.msk [vmem:[%s8740_s6 + $0x450] sm:$0xff] %vm5360_vm1, %v5242_v48  ;;  %7091 = vrcp.f32 %v3480_v38  ;;  %v8969_v47 = vpop.f32.mrb[77].mxu0  ;;  %v11313_v38 = vld [vmem:[#allocation12_spill] sm:$0xff]  ;;  %v8979_v4 = vadd.f32 %v8498_v20, %v8477_v30  ;;  %v8986_v39 = vadd.f32 %v8498_v20, %v8482_v15  ;;  %v11317_v30 = vld [vmem:[#allocation17_spill] sm:$0xff] }
 0x1ab   : > { %11311 = vst [vmem:[#allocation10_spill] sm:$0xff] %v8958_v28  ;;  %v7072_v7 = vpop.eup %7071  ;;  %v4353_v54 = vpop.permute.xlu0 %4352  ;;  %11312 = vst [vmem:[#allocation52_spill] sm:$0xff] %v8967_v16  ;;  %7093 = vrcp.f32 %v3483_v51  ;;  %4408 = vrot.lane.b32.xlu0 %v7066_v17, %s7776_s27  ;;  %v6117_v51 = vmul.f32 -1.442695, %v8952_v33  ;;  %v5992_v33 = vmul.f32 -1.442695, %v8967_v16 }
 0x1ac   : > { %v7074_v27 = vpop.eup %7073  ;;  %5372 = vst.msk [vmem:[%s8740_s6 + $0x58] sm:$0xff] %vm5360_vm1, %v5115_v26  ;;  %4670 = vrot.lane.b32.xlu1 %v7072_v7, %s7776_s27  ;;  %v5112_v48 = vmul.f32 %v4353_v54, %v11313_v38  ;;  %11314 = vst [vmem:[#allocation15_spill] sm:$0xff] %v8979_v4  ;;  %v8981_v59 = vpop.f32.mrb[78].mxu0  ;;  %7095 = vrcp.f32 %v3481_v22  ;;  %v6115_v54 = vmul.f32 -1.442695, %v8958_v28  ;;  %v11318_v15 = vld [vmem:[#allocation56_spill] sm:$0xff] }
 0x1ad   : > { %v7076_v43 = vpop.eup %7075  ;;  %v4615_v26 = vpop.permute.xlu1 %4614  ;;  %11315 = vst [vmem:[#allocation54_spill] sm:$0xff] %v8986_v39  ;;  %7097 = vpow2.f32 %v5987_v11  ;;  %v8999_v5 = vadd.f32 %v8498_v20, %v11318_v15  ;;  %v5993_v15 = vmul.f32 -1.442695, %v8986_v39 }
 0x1ae   : > { %v8988_v7 = vpop.f32.mrb[79].mxu0  ;;  %v7078_v17 = vpop.eup %7077  ;;  %v5243_v38 = vmul.f32 %v4615_v26, %v11317_v30  ;;  %5369 = vst.msk [vmem:[%s8740_s6 + $0x40] sm:$0xff] %vm5360_vm1, %v5112_v48  ;;  %7099 = vpow2.f32 %v6116_v58  ;;  %v11321_v48 = vld [vmem:[#allocation16_spill] sm:$0xff]  ;;  %v5990_v26 = vmul.f32 -1.442695, %v8979_v4 }
 0x1af   : > { %11316 = vst [vmem:[#allocation13_spill] sm:$0xff] %v8988_v7  ;;  %v8994_v36 = vpop.f32.mrb[76].mxu1  ;;  %v7080_v22 = vpop.eup %7079  ;;  %11319 = vst [vmem:[#allocation55_spill] sm:$0xff] %v8999_v5  ;;  %7101 = vpow2.f32 %v6114_v3  ;;  %4664 = vrot.lane.b32.xlu0 %v7070_v50, %s7776_s27  ;;  %v6120_v28 = vmul.f32 -1.442695, %v8999_v5 }
 0x1b0   : > { %v4609_v6 = vpop.permute.xlu0 %4608  ;;  %v9001_v7 = vpop.f32.mrb[77].mxu1  ;;  %5500 = vst.msk [vmem:[%s8740_s6 + $0x458] sm:$0xff] %vm5360_vm1, %v5243_v38  ;;  %4410 = vrot.lane.b32.xlu1 %v7068_v23, %s7776_s27  ;;  %7103 = vpow2.f32 %v6117_v51  ;;  %v9017_v23 = vld [vmem:[%s10968_s2] ss:$0 sm:$0xff]  ;;  %v3358_v38 = vadd.f32 1.0, %v7074_v27  ;;  %v11327_v27 = vld [vmem:[#allocation19_spill] sm:$0xff] }
 0x1b1   : > { %11320 = vst [vmem:[#allocation12_spill] sm:$0xff] %v9001_v7  ;;  %v7082_v11 = vpop.eup %7081  ;;  %v5240_v58 = vmul.f32 %v4609_v6, %v11321_v48  ;;  %v9009_v30 = vpop.f32.mrb[78].mxu1  ;;  %v9021_v50 = vadd.f32 %v9017_v23, %v8484_v53  ;;  %7105 = vpow2.f32 %v6115_v54  ;;  %v11325_v48 = vld [vmem:[#allocation14_spill] sm:$0xff]  ;;  %v9032_v39 = vadd.f32 %v9017_v23, %v8488_v42 }
 0x1b2   : > { %11322 = vst [vmem:[#allocation17_spill] sm:$0xff] %v9009_v30  ;;  %v9011_v16 = vpop.eup %7083  ;;  %v4355_v20 = vpop.permute.xlu1 %4354  ;;  %7107 = vpow2.f32 %v5992_v33  ;;  %v11328_v33 = vld [vmem:[#allocation57_spill] sm:$0xff] }
 0x1b3   : > { %11323 = vst [vmem:[#allocation56_spill] sm:$0xff] %v9021_v50  ;;  %v9023_v6 = vpop.f32.mrb[79].mxu1  ;;  %v7086_v3 = vpop.eup %7085  ;;  %v5113_v51 = vmul.f32 %v4355_v20, %v11325_v48  ;;  %5497 = vst.msk [vmem:[%s8740_s6 + $0x440] sm:$0xff] %vm5360_vm1, %v5240_v58  ;;  %7109 = vpow2.f32 %v5990_v26  ;;  %4420 = vrot.lane.b32.xlu0 %v7082_v11, %s7776_s27  ;;  %v9042_v58 = vadd.f32 %v9017_v23, %v11328_v33  ;;  %v11331_v11 = vld [vmem:[#allocation58_spill] sm:$0xff]  ;;  %v5991_v33 = vmul.f32 -1.442695, %v9032_v39 }
 0x1b4   : > { %11324 = vst [vmem:[#allocation16_spill] sm:$0xff] %v9023_v6  ;;  %v9028_v4 = vpop.eup %7087  ;;  %11326 = vst [vmem:[#allocation14_spill] sm:$0xff] %v9032_v39  ;;  %v4365_v53 = vpop.permute.xlu0 %4364  ;;  %v3356_v6 = vadd.f32 1.0, %v7076_v43  ;;  %4666 = vrot.lane.b32.xlu1 %v7080_v22, %s7776_s27  ;;  %7111 = vpow2.f32 %v5993_v15  ;;  %v6121_v43 = vmul.f32 -1.442695, %v9021_v50  ;;  %v11330_v22 = vld [vmem:[#allocation18_spill] sm:$0xff] }
 0x1b5   : > { %v7090_v30 = vpop.eup %7089  ;;  %5370 = vst.msk [vmem:[%s8740_s6 + $0x48] sm:$0xff] %vm5360_vm1, %v5113_v51  ;;  %v5118_v54 = vmul.f32 %v4365_v53, %v11327_v27  ;;  %11329 = vst [vmem:[#allocation19_spill] sm:$0xff] %v9042_v58  ;;  %7113 = vrcp.f32 %v3358_v38  ;;  %v3359_v51 = vadd.f32 1.0, %v7078_v17  ;;  %v9052_v53 = vadd.f32 %v9017_v23, %v11331_v11 }
 0x1b6   : > { %v9044_v42 = vpop.eup %7091  ;;  %v4611_v20 = vpop.permute.xlu1 %4610  ;;  %7115 = vpow2.f32 %v6120_v28  ;;  %v6118_v17 = vmul.f32 -1.442695, %v9042_v58 }
 0x1b7   : > { %v7094_v48 = vpop.eup %7093  ;;  %v5241_v26 = vmul.f32 %v4611_v20, %v11330_v22  ;;  %5375 = vst.msk [vmem:[%s8740_s6 + $0x70] sm:$0xff] %vm5360_vm1, %v5118_v54  ;;  %11332 = vst [vmem:[#allocation57_spill] sm:$0xff] %v9052_v53  ;;  %7117 = vrcp.f32 %v3356_v6  ;;  %4676 = vrot.lane.b32.xlu0 %v7090_v30, %s7776_s27  ;;  %v11333_v20 = vld [vmem:[#allocation23_spill] sm:$0xff]  ;;  %v11334_v6 = vld [vmem:[#allocation21_spill] sm:$0xff] }
 0x1b8   : > { %v9054_v27 = vpop.eup %7095  ;;  %4422 = vrot.lane.b32.xlu1 %v7086_v3, %s7776_s27  ;;  %v4621_v15 = vpop.permute.xlu0 %4620  ;;  %7119 = vpow2.f32 %v6121_v43 }
 0x1b9   : > { %v7098_v5 = vpop.eup %7097  ;;  %5498 = vst.msk [vmem:[%s8740_s6 + $0x448] sm:$0xff] %vm5360_vm1, %v5241_v26  ;;  %v5246_v22 = vmul.f32 %v4621_v15, %v11333_v20  ;;  %7121 = vrcp.f32 %v3359_v51  ;;  %v6119_v26 = vmul.f32 -1.442695, %v9052_v53  ;;  %v9065_v3 = vpop.f32.mrb[80].mxu0 }
 0x1ba   : > { %v7100_v38 = vpop.eup %7099  ;;  %v4367_v54 = vpop.permute.xlu1 %4366  ;;  %v3357_v50 = vadd.f32 1.0, %v7098_v5  ;;  %7123 = vpow2.f32 %v5991_v33 }
 0x1bb   : > { %v7102_v11 = vpop.eup %7101  ;;  %v3486_v28 = vadd.f32 1.0, %v7100_v38  ;;  %v5119_v39 = vmul.f32 %v4367_v54, %v11334_v6  ;;  %5503 = vst.msk [vmem:[%s8740_s6 + $0x470] sm:$0xff] %vm5360_vm1, %v5246_v22  ;;  %v9069_v30 = vpop.f32.mrb[81].mxu0  ;;  %7125 = vpow2.f32 %v6118_v17  ;;  %4416 = vrot.lane.b32.xlu0 %v9011_v16, %s7776_s27  ;;  %v11336_v54 = vld [vmem:[#allocation20_spill] sm:$0xff] }
 0x1bc   : > { %v7104_v58 = vpop.eup %7103  ;;  %v3484_v43 = vadd.f32 1.0, %v7102_v11  ;;  %4678 = vrot.lane.b32.xlu1 %v7094_v48, %s7776_s27  ;;  %v4361_v51 = vpop.permute.xlu0 %4360  ;;  %v11337_v48 = vld [vmem:[#allocation25_spill] sm:$0xff] }
 0x1bd   : > { %v7106_v7 = vpop.eup %7105  ;;  %5376 = vst.msk [vmem:[%s8740_s6 + $0x78] sm:$0xff] %vm5360_vm1, %v5119_v39  ;;  %v9076_v15 = vpop.f32.mrb[82].mxu0  ;;  %7127 = vrcp.f32 %v3486_v28  ;;  %v3487_v33 = vadd.f32 1.0, %v7104_v58  ;;  %v5116_v20 = vmul.f32 %v4361_v51, %v11336_v54 }
 0x1be   : > { %11335 = vst [vmem:[#allocation18_spill] sm:$0xff] %v9076_v15  ;;  %v7108_v5 = vpop.eup %7107  ;;  %v4623_v38 = vpop.permute.xlu1 %4622  ;;  %v3485_v17 = vadd.f32 1.0, %v7106_v7  ;;  %7129 = vpow2.f32 %v6119_v26  ;;  %v9096_v7 = vadd.f32 %v9017_v23, %v8522_v44 }
 0x1bf   : > { %v9079_v22 = vpop.f32.mrb[83].mxu0  ;;  %v7110_v39 = vpop.eup %7109  ;;  %v5247_v11 = vmul.f32 %v4623_v38, %v11337_v48  ;;  %7131 = vrcp.f32 %v3357_v50  ;;  %v3362_v53 = vadd.f32 1.0, %v7108_v5  ;;  %5373 = vst.msk [vmem:[%s8740_s6 + $0x60] sm:$0xff] %vm5360_vm1, %v5116_v20  ;;  %4672 = vrot.lane.b32.xlu0 %v9044_v42, %s7776_s27  ;;  %v11341_v38 = vld [vmem:[#allocation24_spill] sm:$0xff] }
 0x1c0   : > { %v9082_v6 = vpop.f32.mrb[80].mxu1  ;;  %v7112_v16 = vpop.eup %7111  ;;  %7133 = vrcp.f32 %v3484_v43  ;;  %v3360_v15 = vadd.f32 1.0, %v7110_v39  ;;  %4418 = vrot.lane.b32.xlu1 %v9028_v4, %s7776_s27  ;;  %11339 = vst [vmem:[#allocation23_spill] sm:$0xff] %v9096_v7  ;;  %v9103_v4 = vadd.f32 %v9017_v23, %v8532_v10  ;;  %v11344_v39 = vld [vmem:[#allocation22_spill] sm:$0xff] }
 0x1c1   : > { %v9086_v28 = vpop.f32.mrb[81].mxu1  ;;  %v7114_v58 = vpop.eup %7113  ;;  %5504 = vst.msk [vmem:[%s8740_s6 + $0x478] sm:$0xff] %vm5360_vm1, %v5247_v11  ;;  %7135 = vrcp.f32 %v3487_v33  ;;  %v3363_v43 = vadd.f32 1.0, %v7112_v16  ;;  %v9110_v11 = vadd.f32 %v9017_v23, %v8539_v60  ;;  %v11346_v16 = vld [vmem:[#allocation68_spill] sm:$0xff]  ;;  %v11348_v60 = vld [vmem:[#allocation63_spill] sm:$0xff] }
 0x1c2   : > { %11338 = vst [vmem:[#allocation58_spill] sm:$0xff] %v9086_v28  ;;  %v4617_v50 = vpop.permute.xlu0 %4616  ;;  %v9098_v26 = vpop.f32.mrb[82].mxu1  ;;  %11342 = vst [vmem:[#allocation20_spill] sm:$0xff] %v9103_v4  ;;  %7137 = vrcp.f32 %v3485_v17  ;;  %v5996_v17 = vmul.f32 -1.442695, %v9096_v7 }
 0x1c3   : > { %11340 = vst [vmem:[#allocation21_spill] sm:$0xff] %v9098_v26  ;;  %v7116_v51 = vpop.eup %7115  ;;  %v4363_v5 = vpop.permute.xlu1 %4362  ;;  %v5244_v54 = vmul.f32 %v4617_v50, %v11341_v38  ;;  %11345 = vst [vmem:[#allocation24_spill] sm:$0xff] %v9110_v11  ;;  %7139 = vrcp.f32 %v3362_v53  ;;  %v9116_v50 = vadd.f32 %v9017_v23, %v11346_v16  ;;  %4428 = vrot.lane.b32.xlu0 %v7114_v58, %s7776_s27  ;;  %v11353_v58 = vld [vmem:[#allocation26_spill] sm:$0xff] }
 0x1c4   : > { %v9105_v42 = vpop.f32.mrb[83].mxu1  ;;  %v7118_v20 = vpop.eup %7117  ;;  %v3490_v44 = vadd.f32 1.0, %v7116_v51  ;;  %v5117_v48 = vmul.f32 %v4363_v5, %v11344_v39  ;;  %7141 = vrcp.f32 %v3360_v15  ;;  %4674 = vrot.lane.b32.xlu1 %v9054_v27, %s7776_s27  ;;  %v9126_v53 = vadd.f32 %v9017_v23, %v11348_v60  ;;  %v11350_v39 = vld [vmem:[#allocation27_spill] sm:$0xff] }
 0x1c5   : > { %11343 = vst [vmem:[#allocation25_spill] sm:$0xff] %v9105_v42  ;;  %v7120_v33 = vpop.eup %7119  ;;  %5501 = vst.msk [vmem:[%s8740_s6 + $0x460] sm:$0xff] %vm5360_vm1, %v5244_v54  ;;  %7143 = vrcp.f32 %v3363_v43  ;;  %v5994_v15 = vmul.f32 -1.442695, %v9103_v4  ;;  %v5997_v60 = vmul.f32 -1.442695, %v9110_v11 }
 0x1c6   : > { %11347 = vst [vmem:[#allocation22_spill] sm:$0xff] %v9116_v50  ;;  %v7122_v10 = vpop.eup %7121  ;;  %v3491_v38 = vadd.f32 1.0, %v7120_v33  ;;  %5374 = vst.msk [vmem:[%s8740_s6 + $0x68] sm:$0xff] %vm5360_vm1, %v5117_v48  ;;  %v4373_v51 = vpop.permute.xlu0 %4372  ;;  %v11351_v33 = vld [vmem:[#allocation66_spill] sm:$0xff]  ;;  %7145 = vrcp.f32 %v3490_v44  ;;  %v11354_v42 = vld [vmem:[#allocation69_spill] sm:$0xff] }
 0x1c7   : > { %11349 = vst [vmem:[#allocation68_spill] sm:$0xff] %v9126_v53  ;;  %v7124_v5 = vpop.eup %7123  ;;  %v4619_v54 = vpop.permute.xlu1 %4618  ;;  %v5122_v48 = vmul.f32 %v4373_v51, %v11350_v39  ;;  %v9132_v27 = vadd.f32 %v9017_v23, %v11351_v33  ;;  %v9138_v28 = vadd.f32 %v9017_v23, %v11354_v42  ;;  %v5995_v4 = vmul.f32 -1.442695, %v9116_v50  ;;  %v11356_v51 = vld [vmem:[#allocation71_spill] sm:$0xff] }
 0x1c8   : > { %v7126_v16 = vpop.eup %7125  ;;  %v5245_v7 = vmul.f32 %v4619_v54, %v11353_v58  ;;  %7147 = vrcp.f32 %v3491_v38  ;;  %v9145_v39 = vadd.f32 %v9017_v23, %v11356_v51  ;;  %4430 = vrot.lane.b32.xlu1 %v7122_v10, %s7776_s27  ;;  %v6124_v44 = vmul.f32 -1.442695, %v9126_v53  ;;  %v11358_v38 = vld [vmem:[#allocation74_spill] sm:$0xff] }
 0x1c9   : > { %11352 = vst [vmem:[#allocation63_spill] sm:$0xff] %v9132_v27  ;;  %11355 = vst [vmem:[#allocation27_spill] sm:$0xff] %v9138_v28  ;;  %v7128_v43 = vpop.eup %7127  ;;  %7149 = vpow2.f32 %v5996_v17  ;;  %v9154_v54 = vadd.f32 %v9017_v23, %v11358_v38  ;;  %v6122_v17 = vmul.f32 -1.442695, %v9132_v27  ;;  %v11360_v51 = vld [vmem:[#allocation30_spill] sm:$0xff]  ;;  %v9160_v10 = vadd.f32 %v9017_v23, %v8580_v1  ;;  %v9164_v38 = vpop.f32.mrb[84].mxu0 }
 0x1ca   : > { %5379 = vst.msk [vmem:[%s8740_s6 + $0x90] sm:$0xff] %vm5360_vm1, %v5122_v48  ;;  %11357 = vst [vmem:[#allocation66_spill] sm:$0xff] %v9145_v39  ;;  %v7130_v33 = vpop.eup %7129  ;;  %4684 = vrot.lane.b32.xlu0 %v7128_v43, %s7776_s27  ;;  %v4629_v42 = vpop.permute.xlu0 %4628  ;;  %7151 = vpow2.f32 %v5994_v15  ;;  %v11362_v43 = vld [vmem:[#allocation29_spill] sm:$0xff]  ;;  %v6125_v11 = vmul.f32 -1.442695, %v9138_v28 }
 0x1cb   : > { %5502 = vst.msk [vmem:[%s8740_s6 + $0x468] sm:$0xff] %vm5360_vm1, %v5245_v7  ;;  %11359 = vst [vmem:[#allocation26_spill] sm:$0xff] %v9154_v54  ;;  %v7132_v48 = vpop.eup %7131  ;;  %v4375_v58 = vpop.permute.xlu1 %4374  ;;  %v5250_v7 = vmul.f32 %v4629_v42, %v11360_v51  ;;  %7153 = vpow2.f32 %v5997_v60  ;;  %v6123_v15 = vmul.f32 -1.442695, %v9145_v39  ;;  %v6000_v60 = vmul.f32 -1.442695, %v9154_v54 }
 0x1cc   : > { %11361 = vst [vmem:[#allocation69_spill] sm:$0xff] %v9160_v10  ;;  %v7134_v50 = vpop.eup %7133  ;;  %v5123_v53 = vmul.f32 %v4375_v58, %v11362_v43  ;;  %7155 = vpow2.f32 %v5995_v4  ;;  %v9169_v27 = vpop.f32.mrb[85].mxu0  ;;  %v5998_v39 = vmul.f32 -1.442695, %v9160_v10  ;;  %v11367_v54 = vld [vmem:[#allocation33_spill] sm:$0xff]  ;;  %v3488_v10 = vadd.f32 1.0, %v7126_v16 }
 0x1cd   : > { %v7136_v26 = vpop.eup %7135  ;;  %5507 = vst.msk [vmem:[%s8740_s6 + $0x490] sm:$0xff] %vm5360_vm1, %v5250_v7  ;;  %7157 = vpow2.f32 %v6124_v44  ;;  %v9176_v58 = vpop.f32.mrb[86].mxu0  ;;  %v11364_v7 = vld [vmem:[#allocation28_spill] sm:$0xff]  ;;  %v3361_v44 = vadd.f32 1.0, %v7124_v5  ;;  %v3489_v5 = vadd.f32 1.0, %v7130_v33 }
 0x1ce   : > { %v7138_v42 = vpop.eup %7137  ;;  %5380 = vst.msk [vmem:[%s8740_s6 + $0x98] sm:$0xff] %vm5360_vm1, %v5123_v53  ;;  %4686 = vrot.lane.b32.xlu1 %v7136_v26, %s7776_s27  ;;  %4424 = vrot.lane.b32.xlu0 %v7118_v20, %s7776_s27  ;;  %v4369_v1 = vpop.permute.xlu0 %4368  ;;  %11363 = vst [vmem:[#allocation71_spill] sm:$0xff] %v9176_v58  ;;  %7159 = vpow2.f32 %v6122_v17  ;;  %v9182_v53 = vadd.f32 %v9017_v23, %v8585_v35  ;;  %v9191_v17 = vadd.f32 %v9017_v23, %v8596_v9  ;;  %v11370_v35 = vld [vmem:[#allocation75_spill] sm:$0xff] }
 0x1cf   : > { %v7140_v4 = vpop.eup %7139  ;;  %v4631_v51 = vpop.permute.xlu1 %4630  ;;  %v5120_v43 = vmul.f32 %v4369_v1, %v11364_v7  ;;  %7161 = vpow2.f32 %v6125_v11 }
 0x1d0   : > { %11365 = vst [vmem:[#allocation74_spill] sm:$0xff] %v9182_v53  ;;  %v9184_v26 = vpop.f32.mrb[87].mxu0  ;;  %v9186_v20 = vpop.eup %7141  ;;  %v5251_v28 = vmul.f32 %v4631_v51, %v11367_v54  ;;  %11368 = vst [vmem:[#allocation29_spill] sm:$0xff] %v9191_v17  ;;  %7163 = vpow2.f32 %v6123_v15  ;;  %v11374_v51 = vld [vmem:[#allocation32_spill] sm:$0xff] }
 0x1d1   : > { %11366 = vst [vmem:[#allocation30_spill] sm:$0xff] %v9184_v26  ;;  %v9193_v1 = vpop.f32.mrb[84].mxu1  ;;  %v7144_v7 = vpop.eup %7143  ;;  %5377 = vst.msk [vmem:[%s8740_s6 + $0x80] sm:$0xff] %vm5360_vm1, %v5120_v43  ;;  %v9199_v26 = vadd.f32 %v9017_v23, %v11370_v35  ;;  %7165 = vpow2.f32 %v6000_v60  ;;  %v6001_v35 = vmul.f32 -1.442695, %v9182_v53  ;;  %v11397_v53 = vld [vmem:[#allocation83_spill] sm:$0xff] }
 0x1d2   : > { %11369 = vst [vmem:[#allocation28_spill] sm:$0xff] %v9193_v1  ;;  %v9201_v58 = vpop.f32.mrb[85].mxu1  ;;  %v7146_v11 = vpop.eup %7145  ;;  %5508 = vst.msk [vmem:[%s8740_s6 + $0x498] sm:$0xff] %vm5360_vm1, %v5251_v28  ;;  %4426 = vrot.lane.b32.xlu1 %v7132_v48, %s7776_s27  ;;  %4680 = vrot.lane.b32.xlu0 %v7134_v50, %s7776_s27  ;;  %7167 = vpow2.f32 %v5998_v39  ;;  %v11375_v48 = vld [vmem:[#allocation31_spill] sm:$0xff]  ;;  %v5999_v50 = vmul.f32 -1.442695, %v9191_v17 }
 0x1d3   : > { %11371 = vst [vmem:[#allocation33_spill] sm:$0xff] %v9199_v26  ;;  %11372 = vst [vmem:[#allocation75_spill] sm:$0xff] %v9201_v58  ;;  %v4625_v9 = vpop.permute.xlu0 %4624  ;;  %v9207_v16 = vpop.f32.mrb[86].mxu1  ;;  %7169 = vrcp.f32 %v3361_v44 }
 0x1d4   : > { %11373 = vst [vmem:[#allocation102_spill] sm:$0xff] %v9207_v16  ;;  %v7148_v54 = vpop.eup %7147  ;;  %v4371_v15 = vpop.permute.xlu1 %4370  ;;  %v5248_v43 = vmul.f32 %v4625_v9, %v11374_v51  ;;  %7171 = vrcp.f32 %v3488_v10  ;;  %v6128_v16 = vmul.f32 -1.442695, %v9199_v26  ;;  %v11376_v10 = vld [vmem:[#allocation35_spill] sm:$0xff]  ;;  %v11377_v26 = vld [vmem:[#allocation34_spill] sm:$0xff] }
 0x1d5   : > { %v9211_v33 = vpop.f32.mrb[87].mxu1  ;;  %v7150_v28 = vpop.eup %7149  ;;  %v5121_v58 = vmul.f32 %v4371_v15, %v11375_v48  ;;  %7173 = vrcp.f32 %v3489_v5 }
 0x1d6   : > { %v7152_v60 = vpop.eup %7151  ;;  %5505 = vst.msk [vmem:[%s8740_s6 + $0x480] sm:$0xff] %vm5360_vm1, %v5248_v43  ;;  %v3366_v9 = vadd.f32 1.0, %v7150_v28  ;;  %4682 = vrot.lane.b32.xlu1 %v7138_v42, %s7776_s27  ;;  %4436 = vrot.lane.b32.xlu0 %v7140_v4, %s7776_s27  ;;  %7175 = vpow2.f32 %v6001_v35 }
 0x1d7   : > { %v7154_v1 = vpop.eup %7153  ;;  %5378 = vst.msk [vmem:[%s8740_s6 + $0x88] sm:$0xff] %vm5360_vm1, %v5121_v58  ;;  %v4381_v39 = vpop.permute.xlu0 %4380  ;;  %v3364_v15 = vadd.f32 1.0, %v7152_v60  ;;  %7177 = vpow2.f32 %v5999_v50  ;;  %v11378_v60 = vld [vmem:[#allocation39_spill] sm:$0xff] }
 0x1d8   : > { %v7156_v44 = vpop.eup %7155  ;;  %v4627_v51 = vpop.permute.xlu1 %4626  ;;  %v5126_v43 = vmul.f32 %v4381_v39, %v11376_v10  ;;  %v3367_v17 = vadd.f32 1.0, %v7154_v1  ;;  %7179 = vpow2.f32 %v6128_v16  ;;  %v11380_v10 = vld [vmem:[#allocation76_spill] sm:$0xff] }
 0x1d9   : > { %v7158_v48 = vpop.eup %7157  ;;  %v5249_v5 = vmul.f32 %v4627_v51, %v11377_v26  ;;  %v3365_v58 = vadd.f32 1.0, %v7156_v44  ;;  %7181 = vrcp.f32 %v3366_v9  ;;  %v11379_v9 = vld [vmem:[#allocation37_spill] sm:$0xff] }
 0x1da   : > { %v7160_v28 = vpop.eup %7159  ;;  %5383 = vst.msk [vmem:[%s8740_s6 + $0xb0] sm:$0xff] %vm5360_vm1, %v5126_v43  ;;  %v3494_v4 = vadd.f32 1.0, %v7158_v48  ;;  %4438 = vrot.lane.b32.xlu1 %v7144_v7, %s7776_s27  ;;  %4692 = vrot.lane.b32.xlu0 %v7146_v11, %s7776_s27  ;;  %7183 = vrcp.f32 %v3364_v15  ;;  %v9234_v43 = vadd.f32 %v9017_v23, %v11380_v10  ;;  %v9236_v7 = vpop.f32.mrb[88].mxu0  ;;  %v11382_v15 = vld [vmem:[#allocation77_spill] sm:$0xff] }
 0x1db   : > { %v7162_v42 = vpop.eup %7161  ;;  %5506 = vst.msk [vmem:[%s8740_s6 + $0x488] sm:$0xff] %vm5360_vm1, %v5249_v5  ;;  %v4637_v35 = vpop.permute.xlu0 %4636  ;;  %v3492_v26 = vadd.f32 1.0, %v7160_v28  ;;  %7185 = vrcp.f32 %v3367_v17  ;;  %v9240_v5 = vadd.f32 %v9017_v23, %v11382_v15  ;;  %v11389_v15 = vld [vmem:[#allocation44_spill] sm:$0xff] }
 0x1dc   : > { %v7164_v1 = vpop.eup %7163  ;;  %v4383_v50 = vpop.permute.xlu1 %4382  ;;  %v5254_v39 = vmul.f32 %v4637_v35, %v11378_v60  ;;  %v3495_v44 = vadd.f32 1.0, %v7162_v42  ;;  %11381 = vst [vmem:[#allocation32_spill] sm:$0xff] %v9234_v43  ;;  %7187 = vrcp.f32 %v3365_v58  ;;  %v11384_v35 = vld [vmem:[#allocation79_spill] sm:$0xff] }
 0x1dd   : > { %v7166_v16 = vpop.eup %7165  ;;  %v5127_v51 = vmul.f32 %v4383_v50, %v11379_v9  ;;  %v3493_v48 = vadd.f32 1.0, %v7164_v1  ;;  %11383 = vst [vmem:[#allocation31_spill] sm:$0xff] %v9240_v5  ;;  %v9244_v28 = vpop.f32.mrb[89].mxu0  ;;  %7189 = vrcp.f32 %v3494_v4  ;;  %v9251_v50 = vadd.f32 %v9017_v23, %v11384_v35 }
 0x1de   : > { %v7168_v11 = vpop.eup %7167  ;;  %5511 = vst.msk [vmem:[%s8740_s6 + $0x4b0] sm:$0xff] %vm5360_vm1, %v5254_v39  ;;  %v3370_v42 = vadd.f32 1.0, %v7166_v16  ;;  %4694 = vrot.lane.b32.xlu1 %v7148_v54, %s7776_s27  ;;  %4432 = vrot.lane.b32.xlu0 %v9186_v20, %s7776_s27  ;;  %v9255_v1 = vpop.f32.mrb[90].mxu0  ;;  %7191 = vrcp.f32 %v3492_v26  ;;  %v11386_v16 = vld [vmem:[#allocation36_spill] sm:$0xff]  ;;  %v9260_v54 = vadd.f32 %v9017_v23, %v8618_v19  ;;  %v6126_v20 = vmul.f32 -1.442695, %v9234_v43 }
 0x1df   : > { %v7170_v17 = vpop.eup %7169  ;;  %5384 = vst.msk [vmem:[%s8740_s6 + $0xb8] sm:$0xff] %vm5360_vm1, %v5127_v51  ;;  %11385 = vst [vmem:[#allocation35_spill] sm:$0xff] %v9251_v50  ;;  %v4377_v58 = vpop.permute.xlu0 %4376  ;;  %v3368_v39 = vadd.f32 1.0, %v7168_v11  ;;  %7193 = vrcp.f32 %v3495_v44  ;;  %v9268_v26 = vadd.f32 %v9017_v23, %v8621_v55  ;;  %v6129_v19 = vmul.f32 -1.442695, %v9240_v5 }
 0x1e0   : > { %v7172_v60 = vpop.eup %7171  ;;  %v4639_v4 = vpop.permute.xlu1 %4638  ;;  %v5124_v9 = vmul.f32 %v4377_v58, %v11386_v16  ;;  %11387 = vst [vmem:[#allocation34_spill] sm:$0xff] %v9260_v54  ;;  %7195 = vrcp.f32 %v3493_v48  ;;  %v9277_v16 = vadd.f32 %v9017_v23, %v8624_v0  ;;  %v11393_v48 = vld [vmem:[#allocation82_spill] sm:$0xff] }
 0x1e1   : > { %v9262_v51 = vpop.f32.mrb[91].mxu0  ;;  %v7174_v10 = vpop.eup %7173  ;;  %v5255_v35 = vmul.f32 %v4639_v4, %v11389_v15  ;;  %11390 = vst [vmem:[#allocation37_spill] sm:$0xff] %v9268_v26  ;;  %7197 = vrcp.f32 %v3370_v42  ;;  %v6127_v4 = vmul.f32 -1.442695, %v9251_v50  ;;  %v6004_v42 = vmul.f32 -1.442695, %v9260_v54 }
 0x1e2   : > { %11388 = vst [vmem:[#allocation39_spill] sm:$0xff] %v9262_v51  ;;  %v9270_v11 = vpop.f32.mrb[88].mxu1  ;;  %v7176_v58 = vpop.eup %7175  ;;  %5381 = vst.msk [vmem:[%s8740_s6 + $0xa0] sm:$0xff] %vm5360_vm1, %v5124_v9  ;;  %4434 = vrot.lane.b32.xlu1 %v7170_v17, %s7776_s27  ;;  %4688 = vrot.lane.b32.xlu0 %v7172_v60, %s7776_s27  ;;  %v9288_v9 = vadd.f32 %v9017_v23, %v11393_v48  ;;  %7199 = vrcp.f32 %v3368_v39  ;;  %v11396_v50 = vld [vmem:[#allocation41_spill] sm:$0xff]  ;;  %v9296_v17 = vadd.f32 %v9017_v23, %v11397_v53  ;;  %v11399_v48 = vld [vmem:[#allocation38_spill] sm:$0xff] }
 0x1e3   : > { %11391 = vst [vmem:[#allocation76_spill] sm:$0xff] %v9277_v16  ;;  %v9279_v44 = vpop.f32.mrb[89].mxu1  ;;  %v7178_v43 = vpop.eup %7177  ;;  %5512 = vst.msk [vmem:[%s8740_s6 + $0x4b8] sm:$0xff] %vm5360_vm1, %v5255_v35  ;;  %7201 = vpow2.f32 %v6126_v20  ;;  %v9304_v39 = vadd.f32 %v9017_v23, %v8632_v49  ;;  %v9311_v53 = vadd.f32 %v9017_v23, %v8634_v12 }
 0x1e4   : > { %11392 = vst [vmem:[#allocation77_spill] sm:$0xff] %v9279_v44  ;;  %v4633_v55 = vpop.permute.xlu0 %4632  ;;  %11394 = vst [vmem:[#allocation79_spill] sm:$0xff] %v9288_v9  ;;  %v9290_v0 = vpop.f32.mrb[90].mxu1  ;;  %7203 = vpow2.f32 %v6129_v19  ;;  %v6003_v49 = vmul.f32 -1.442695, %v9288_v9 }
 0x1e5   : > { %11395 = vst [vmem:[#allocation36_spill] sm:$0xff] %v9290_v0  ;;  %v7180_v15 = vpop.eup %7179  ;;  %v4379_v5 = vpop.permute.xlu1 %4378  ;;  %v5252_v35 = vmul.f32 %v4633_v55, %v11396_v50  ;;  %11398 = vst [vmem:[#allocation44_spill] sm:$0xff] %v9296_v17  ;;  %v6002_v0 = vmul.f32 -1.442695, %v9268_v26  ;;  %v6005_v50 = vmul.f32 -1.442695, %v9277_v16  ;;  %7205 = vpow2.f32 %v6127_v4 }
 0x1e6   : > { %v9298_v60 = vpop.f32.mrb[91].mxu1  ;;  %v7182_v44 = vpop.eup %7181  ;;  %v5125_v51 = vmul.f32 %v4379_v5, %v11399_v48  ;;  %11400 = vst [vmem:[#allocation82_spill] sm:$0xff] %v9304_v39  ;;  %11401 = vst [vmem:[#allocation41_spill] sm:$0xff] %v9311_v53  ;;  %4690 = vrot.lane.b32.xlu1 %v7174_v10, %s7776_s27  ;;  %7207 = vpow2.f32 %v6004_v42  ;;  %v6132_v12 = vmul.f32 -1.442695, %v9296_v17  ;;  %v11403_v26 = vld [vmem:[#allocation46_spill] sm:$0xff]  ;;  %v9329_v42 = vadd.f32 %v9017_v23, %v8636_v21 }
 0x1e7   : > { %v7184_v54 = vpop.eup %7183  ;;  %5509 = vst.msk [vmem:[%s8740_s6 + $0x4a0] sm:$0xff] %vm5360_vm1, %v5252_v35  ;;  %4444 = vrot.lane.b32.xlu0 %v7182_v44, %s7776_s27  ;;  %v11402_v35 = vld [vmem:[#allocation49_spill] sm:$0xff]  ;;  %7209 = vpow2.f32 %v6002_v0  ;;  %v6130_v10 = vmul.f32 -1.442695, %v9304_v39  ;;  %v6133_v44 = vmul.f32 -1.442695, %v9311_v53 }
 0x1e8   : > { %v7186_v55 = vpop.eup %7185  ;;  %5382 = vst.msk [vmem:[%s8740_s6 + $0xa8] sm:$0xff] %vm5360_vm1, %v5125_v51  ;;  %v4389_v5 = vpop.permute.xlu0 %4388  ;;  %7211 = vpow2.f32 %v6005_v50  ;;  %11404 = vst [vmem:[#allocation83_spill] sm:$0xff] %v9329_v42  ;;  %v3371_v17 = vadd.f32 1.0, %v7176_v58  ;;  %v3498_v50 = vadd.f32 1.0, %v7180_v15  ;;  %v3369_v58 = vadd.f32 1.0, %v7178_v43 }
 0x1e9   : > { %v9318_v20 = vpop.eup %7187  ;;  %v4635_v19 = vpop.permute.xlu1 %4634  ;;  %v5130_v48 = vmul.f32 %v4389_v5, %v11402_v35  ;;  %7213 = vpow2.f32 %v6003_v49  ;;  %v9346_v49 = vadd.f32 %v9017_v23, %v8688_v63  ;;  %v6131_v15 = vmul.f32 -1.442695, %v9329_v42 }
 0x1ea   : > { %v7190_v4 = vpop.eup %7189  ;;  %v5253_v51 = vmul.f32 %v4635_v19, %v11403_v26  ;;  %4446 = vrot.lane.b32.xlu1 %v7186_v55, %s7776_s27  ;;  %v9337_v26 = vadd.f32 %v9017_v23, %v8683_v34  ;;  %7215 = vpow2.f32 %v6132_v12  ;;  %v11406_v19 = vld [vmem:[#allocation51_spill] sm:$0xff]  ;;  %v9369_v42 = vpop.f32.mrb[92].mxu1 }
 0x1eb   : > { %v7192_v16 = vpop.eup %7191  ;;  %5387 = vst.msk [vmem:[%s8740_s6 + $0xd0] sm:$0xff] %vm5360_vm1, %v5130_v48  ;;  %4700 = vrot.lane.b32.xlu0 %v7190_v4, %s7776_s27  ;;  %7217 = vpow2.f32 %v6130_v10  ;;  %11407 = vst [vmem:[#allocation49_spill] sm:$0xff] %v9346_v49  ;;  %v9348_v48 = vpop.f32.mrb[92].mxu0  ;;  %v11408_v12 = vld [vmem:[#allocation59_spill] sm:$0xff] }
 0x1ec   : > { %v7194_v9 = vpop.eup %7193  ;;  %5510 = vst.msk [vmem:[%s8740_s6 + $0x4a8] sm:$0xff] %vm5360_vm1, %v5253_v51  ;;  %11405 = vst [vmem:[#allocation38_spill] sm:$0xff] %v9337_v26  ;;  %v4645_v55 = vpop.permute.xlu0 %4644  ;;  %7219 = vpow2.f32 %v6133_v44  ;;  %v6008_v63 = vmul.f32 -1.442695, %v9337_v26 }
 0x1ed   : > { %v9339_v0 = vpop.eup %7195  ;;  %v4391_v21 = vpop.permute.xlu1 %4390  ;;  %v5258_v4 = vmul.f32 %v4645_v55, %v11408_v12  ;;  %7221 = vrcp.f32 %v3371_v17 }
 0x1ee   : > { %v9341_v5 = vpop.eup %7197  ;;  %v5131_v35 = vmul.f32 %v4391_v21, %v11406_v19  ;;  %v9354_v51 = vpop.f32.mrb[93].mxu0  ;;  %4702 = vrot.lane.b32.xlu1 %v7194_v9, %s7776_s27  ;;  %7223 = vrcp.f32 %v3498_v50  ;;  %v11412_v50 = vld [vmem:[#allocation50_spill] sm:$0xff] }
 0x1ef   : > { %v9350_v34 = vpop.eup %7199  ;;  %4440 = vrot.lane.b32.xlu0 %v7184_v54, %s7776_s27  ;;  %v9361_v10 = vpop.f32.mrb[94].mxu0  ;;  %5515 = vst.msk [vmem:[%s8740_s6 + $0x4d0] sm:$0xff] %vm5360_vm1, %v5258_v4  ;;  %7225 = vrcp.f32 %v3369_v58  ;;  %v6006_v54 = vmul.f32 -1.442695, %v9346_v49 }
 0x1f0   : > { %v7202_v43 = vpop.eup %7201  ;;  %5388 = vst.msk [vmem:[%s8740_s6 + $0xd8] sm:$0xff] %vm5360_vm1, %v5131_v35  ;;  %11409 = vst [vmem:[#allocation46_spill] sm:$0xff] %v9361_v10  ;;  %v9365_v19 = vpop.f32.mrb[95].mxu0  ;;  %v11411_v35 = vld [vmem:[#allocation61_spill] sm:$0xff]  ;;  %7227 = vpow2.f32 %v6131_v15 }
 0x1f1   : > { %v7204_v21 = vpop.eup %7203  ;;  %v4647_v44 = vpop.permute.xlu1 %4646  ;;  %11410 = vst [vmem:[#allocation51_spill] sm:$0xff] %v9365_v19  ;;  %v3496_v39 = vadd.f32 1.0, %v7202_v43  ;;  %7229 = vpow2.f32 %v6008_v63  ;;  %v11414_v63 = vld [vmem:[#allocation60_spill] sm:$0xff] }
 0x1f2   : > { %v7206_v55 = vpop.eup %7205  ;;  %v3499_v17 = vadd.f32 1.0, %v7204_v21  ;;  %v5259_v12 = vmul.f32 %v4647_v44, %v11411_v35  ;;  %v4385_v9 = vpop.permute.xlu0 %4384  ;;  %4442 = vrot.lane.b32.xlu1 %v9318_v20, %s7776_s27 }
 0x1f3   : > { %v7208_v26 = vpop.eup %7207  ;;  %v5128_v53 = vmul.f32 %v4385_v9, %v11412_v50  ;;  %v9372_v4 = vpop.f32.mrb[93].mxu1  ;;  %v3497_v19 = vadd.f32 1.0, %v7206_v55  ;;  %4696 = vrot.lane.b32.xlu0 %v7192_v16, %s7776_s27 }
 0x1f4   : > { %v7210_v10 = vpop.eup %7209  ;;  %5516 = vst.msk [vmem:[%s8740_s6 + $0x4d8] sm:$0xff] %vm5360_vm1, %v5259_v12  ;;  %v9379_v58 = vpop.f32.mrb[94].mxu1  ;;  %7231 = vrcp.f32 %v3499_v17  ;;  %v3374_v43 = vadd.f32 1.0, %v7208_v26  ;;  %v11413_v12 = vld [vmem:[#allocation53_spill] sm:$0xff] }
 0x1f5   : > { %v7212_v21 = vpop.eup %7211  ;;  %v4387_v15 = vpop.permute.xlu1 %4386  ;;  %5385 = vst.msk [vmem:[%s8740_s6 + $0xc0] sm:$0xff] %vm5360_vm1, %v5128_v53  ;;  %v3372_v35 = vadd.f32 1.0, %v7210_v10  ;;  %7233 = vpow2.f32 %v6006_v54  ;;  %v9393_v53 = vadd.f32 %v9017_v23, %v8697_v29 }
 0x1f6   : > { %v9383_v44 = vpop.f32.mrb[95].mxu1  ;;  %v7214_v55 = vpop.eup %7213  ;;  %v5129_v9 = vmul.f32 %v4387_v15, %v11413_v12  ;;  %7235 = vrcp.f32 %v3496_v39  ;;  %v3375_v20 = vadd.f32 1.0, %v7212_v21  ;;  %4698 = vrot.lane.b32.xlu1 %v9339_v0, %s7776_s27  ;;  %v11417_v15 = vld [vmem:[#allocation62_spill] sm:$0xff] }
 0x1f7   : > { %v4641_v50 = vpop.permute.xlu0 %4640  ;;  %v7216_v16 = vpop.eup %7215  ;;  %7237 = vrcp.f32 %v3497_v19  ;;  %v3373_v26 = vadd.f32 1.0, %v7214_v55  ;;  %11415 = vst [vmem:[#allocation59_spill] sm:$0xff] %v9393_v53  ;;  %4452 = vrot.lane.b32.xlu0 %v9341_v5, %s7776_s27  ;;  %v9401_v19 = vadd.f32 %v9017_v23, %v8706_v56  ;;  %v9406_v55 = vadd.f32 %v9017_v23, %v8708_v52  ;;  %v11421_v52 = vld [vmem:[#allocation96_spill] sm:$0xff] }
 0x1f8   : > { %v5256_v49 = vmul.f32 %v4641_v50, %v11414_v63  ;;  %v7218_v17 = vpop.eup %7217  ;;  %5386 = vst.msk [vmem:[%s8740_s6 + $0xc8] sm:$0xff] %vm5360_vm1, %v5129_v9  ;;  %7239 = vrcp.f32 %v3374_v43  ;;  %v3502_v39 = vadd.f32 1.0, %v7216_v16  ;;  %v11419_v9 = vld [vmem:[#allocation64_spill] sm:$0xff]  ;;  %v9411_v56 = vadd.f32 %v9017_v23, %v8719_v57 }
 0x1f9   : > { %v7220_v10 = vpop.eup %7219  ;;  %v4643_v54 = vpop.permute.xlu1 %4642  ;;  %11416 = vst [vmem:[#allocation61_spill] sm:$0xff] %v9401_v19  ;;  %7241 = vrcp.f32 %v3372_v35  ;;  %v3500_v0 = vadd.f32 1.0, %v7218_v17  ;;  %11418 = vst [vmem:[#allocation50_spill] sm:$0xff] %v9406_v55  ;;  %v6009_v35 = vmul.f32 -1.442695, %v9393_v53  ;;  %v9419_v16 = vadd.f32 %v9017_v23, %v11421_v52  ;;  %v11423_v17 = vld [vmem:[#allocation98_spill] sm:$0xff] }
 0x1fa   : > { %5513 = vst.msk [vmem:[%s8740_s6 + $0x4c0] sm:$0xff] %vm5360_vm1, %v5256_v49  ;;  %v7222_v21 = vpop.eup %7221  ;;  %v5257_v29 = vmul.f32 %v4643_v54, %v11417_v15  ;;  %7243 = vrcp.f32 %v3375_v20  ;;  %v3503_v12 = vadd.f32 1.0, %v7220_v10  ;;  %11420 = vst [vmem:[#allocation53_spill] sm:$0xff] %v9411_v56  ;;  %v6007_v63 = vmul.f32 -1.442695, %v9401_v19 }
 0x1fb   : > { %v4397_v5 = vpop.permute.xlu0 %4396  ;;  %v7224_v43 = vpop.eup %7223  ;;  %7245 = vrcp.f32 %v3373_v26  ;;  %4454 = vrot.lane.b32.xlu1 %v7222_v21, %s7776_s27  ;;  %11422 = vst [vmem:[#allocation60_spill] sm:$0xff] %v9419_v16  ;;  %v9427_v26 = vadd.f32 %v9017_v23, %v11423_v17  ;;  %v6136_v54 = vmul.f32 -1.442695, %v9406_v55  ;;  %v11425_v21 = vld [vmem:[#allocation67_spill] sm:$0xff]  ;;  %v9439_v52 = vadd.f32 %v9017_v23, %v8776_v41 }
 0x1fc   : > { %v5134_v49 = vmul.f32 %v4397_v5, %v11419_v9  ;;  %v7226_v50 = vpop.eup %7225  ;;  %5514 = vst.msk [vmem:[%s8740_s6 + $0x4c8] sm:$0xff] %vm5360_vm1, %v5257_v29  ;;  %4708 = vrot.lane.b32.xlu0 %v7224_v43, %s7776_s27  ;;  %7247 = vrcp.f32 %v3502_v39  ;;  %v9433_v39 = vadd.f32 %v9017_v23, %v8767_v46  ;;  %v6134_v43 = vmul.f32 -1.442695, %v9411_v56  ;;  %v11427_v9 = vld [vmem:[#allocation72_spill] sm:$0xff]  ;;  %v9470_v55 = vpop.f32.mrb[96].mxu1 }
 0x1fd   : > { %v7228_v20 = vpop.eup %7227  ;;  %v4399_v57 = vpop.permute.xlu1 %4398  ;;  %11424 = vst [vmem:[#allocation62_spill] sm:$0xff] %v9427_v26  ;;  %7249 = vrcp.f32 %v3500_v0  ;;  %11428 = vst [vmem:[#allocation96_spill] sm:$0xff] %v9439_v52  ;;  %v6137_v46 = vmul.f32 -1.442695, %v9419_v16  ;;  %v9464_v56 = vadd.f32 %v9017_v23, %v8798_v61  ;;  %v6010_v16 = vmul.f32 -1.442695, %v9439_v52 }
 0x1fe   : > { %5391 = vst.msk [vmem:[%s8740_s6 + $0xf0] sm:$0xff] %vm5360_vm1, %v5134_v49  ;;  %v7230_v10 = vpop.eup %7229  ;;  %v5135_v15 = vmul.f32 %v4399_v57, %v11425_v21  ;;  %11426 = vst [vmem:[#allocation64_spill] sm:$0xff] %v9433_v39  ;;  %7251 = vrcp.f32 %v3503_v12  ;;  %v9441_v0 = vpop.f32.mrb[96].mxu0  ;;  %v9451_v12 = vadd.f32 %v9017_v23, %v8782_v13  ;;  %v6135_v21 = vmul.f32 -1.442695, %v9427_v26 }
 0x1ff   : > { %v4653_v29 = vpop.permute.xlu0 %4652  ;;  %v7232_v5 = vpop.eup %7231  ;;  %7253 = vpow2.f32 %v6009_v35  ;;  %v6012_v13 = vmul.f32 -1.442695, %v9433_v39  ;;  %11431 = vst [vmem:[#allocation67_spill] sm:$0xff] %v9464_v56  ;;  %v11437_v39 = vld [vmem:[#allocation78_spill] sm:$0xff] }
 0x200   : > { %v5262_v49 = vmul.f32 %v4653_v29, %v11427_v9  ;;  %v7234_v17 = vpop.eup %7233  ;;  %5392 = vst.msk [vmem:[%s8740_s6 + $0xf8] sm:$0xff] %vm5360_vm1, %v5135_v15  ;;  %4710 = vrot.lane.b32.xlu1 %v7232_v5, %s7776_s27  ;;  %4448 = vrot.lane.b32.xlu0 %v9350_v34, %s7776_s27  ;;  %11429 = vst [vmem:[#allocation98_spill] sm:$0xff] %v9451_v12  ;;  %v9453_v57 = vpop.f32.mrb[97].mxu0  ;;  %7255 = vpow2.f32 %v6007_v63  ;;  %v11430_v5 = vld [vmem:[#allocation73_spill] sm:$0xff]  ;;  %v6013_v61 = vmul.f32 -1.442695, %v9451_v12 }
 0x201   : > { %v7236_v41 = vpop.eup %7235  ;;  %v4655_v35 = vpop.permute.xlu1 %4654  ;;  %7257 = vpow2.f32 %v6136_v54  ;;  %v6140_v12 = vmul.f32 -1.442695, %v9464_v56 }
 0x202   : > { %5519 = vst.msk [vmem:[%s8740_s6 + $0x4f0] sm:$0xff] %vm5360_vm1, %v5262_v49  ;;  %v9458_v15 = vpop.f32.mrb[98].mxu0  ;;  %v7238_v29 = vpop.eup %7237  ;;  %v5263_v34 = vmul.f32 %v4655_v35, %v11430_v5  ;;  %7259 = vpow2.f32 %v6134_v43  ;;  %v11432_v49 = vld [vmem:[#allocation65_spill] sm:$0xff]  ;;  %v3501_v5 = vadd.f32 1.0, %v7228_v20  ;;  %v9495_v20 = vadd.f32 %v9017_v23, %v8808_v40 }
 0x203   : > { %v4393_v9 = vpop.permute.xlu0 %4392  ;;  %v9466_v63 = vpop.f32.mrb[99].mxu0  ;;  %7261 = vpow2.f32 %v6137_v46 }
 0x204   : > { %v7240_v26 = vpop.eup %7239  ;;  %v5132_v19 = vmul.f32 %v4393_v9, %v11432_v49  ;;  %5520 = vst.msk [vmem:[%s8740_s6 + $0x4f8] sm:$0xff] %vm5360_vm1, %v5263_v34  ;;  %4450 = vrot.lane.b32.xlu1 %v7226_v50, %s7776_s27  ;;  %4704 = vrot.lane.b32.xlu0 %v7236_v41, %s7776_s27  ;;  %v9479_v35 = vpop.f32.mrb[97].mxu1  ;;  %7263 = vpow2.f32 %v6135_v21  ;;  %v9485_v49 = vadd.f32 %v9017_v23, %v8790_v14  ;;  %v11435_v41 = vld [vmem:[#allocation70_spill] sm:$0xff]  ;;  %11436 = vst [vmem:[#allocation65_spill] sm:$0xff] %v9495_v20 }
 0x205   : > { %v9472_v54 = vpop.eup %7241  ;;  %11433 = vst [vmem:[#allocation72_spill] sm:$0xff] %v9479_v35  ;;  %v4395_v9 = vpop.permute.xlu1 %4394  ;;  %7265 = vpow2.f32 %v6012_v13  ;;  %v3378_v21 = vadd.f32 1.0, %v7230_v10  ;;  %v9502_v35 = vadd.f32 %v9017_v23, %v8816_v45  ;;  %v11439_v23 = vld [vmem:[#allocation80_spill] sm:$0xff] }
 0x206   : > { %v7244_v43 = vpop.eup %7243  ;;  %5389 = vst.msk [vmem:[%s8740_s6 + $0xe0] sm:$0xff] %vm5360_vm1, %v5132_v19  ;;  %11434 = vst [vmem:[#allocation73_spill] sm:$0xff] %v9485_v49  ;;  %v9487_v46 = vpop.f32.mrb[98].mxu1  ;;  %v5133_v34 = vmul.f32 %v4395_v9, %v11435_v41  ;;  %7267 = vpow2.f32 %v6010_v16  ;;  %v3376_v9 = vadd.f32 1.0, %v7234_v17  ;;  %v6011_v16 = vmul.f32 -1.442695, %v9485_v49 }
 0x207   : > { %v9489_v50 = vpop.eup %7245  ;;  %v4649_v52 = vpop.permute.xlu0 %4648  ;;  %11438 = vst [vmem:[#allocation70_spill] sm:$0xff] %v9502_v35  ;;  %7269 = vpow2.f32 %v6013_v61  ;;  %v6138_v17 = vmul.f32 -1.442695, %v9495_v20  ;;  %v11440_v61 = vld [vmem:[#allocation81_spill] sm:$0xff] }
 0x208   : > { %v9497_v19 = vpop.f32.mrb[99].mxu1  ;;  %v7248_v14 = vpop.eup %7247  ;;  %v5260_v53 = vmul.f32 %v4649_v52, %v11437_v39  ;;  %5390 = vst.msk [vmem:[%s8740_s6 + $0xe8] sm:$0xff] %vm5360_vm1, %v5133_v34  ;;  %4706 = vrot.lane.b32.xlu1 %v7238_v29, %s7776_s27  ;;  %4460 = vrot.lane.b32.xlu0 %v7240_v26, %s7776_s27  ;;  %7271 = vrcp.f32 %v3501_v5  ;;  %v6141_v5 = vmul.f32 -1.442695, %v9502_v35 }
 0x209   : > { %v9504_v13 = vpop.eup %7249  ;;  %v4651_v10 = vpop.permute.xlu1 %4650  ;;  %7273 = vpow2.f32 %v6140_v12 }
 0x20a   : > { %v7252_v40 = vpop.eup %7251  ;;  %5517 = vst.msk [vmem:[%s8740_s6 + $0x4e0] sm:$0xff] %vm5360_vm1, %v5260_v53  ;;  %v5261_v39 = vmul.f32 %v4651_v10, %v11439_v23  ;;  %7275 = vrcp.f32 %v3378_v21 }
 0x20b   : > { %v7254_v45 = vpop.eup %7253  ;;  %v4405_v52 = vpop.permute.xlu0 %4404  ;;  %7277 = vrcp.f32 %v3376_v9 }
 0x20c   : > { %v7256_v29 = vpop.eup %7255  ;;  %v5138_v26 = vmul.f32 %v4405_v52, %v11440_v61  ;;  %v3379_v34 = vadd.f32 1.0, %v7254_v45  ;;  %5518 = vst.msk [vmem:[%s8740_s6 + $0x4e8] sm:$0xff] %vm5360_vm1, %v5261_v39  ;;  %4462 = vrot.lane.b32.xlu1 %v7244_v43, %s7776_s27  ;;  %4716 = vrot.lane.b32.xlu0 %v7248_v14, %s7776_s27  ;;  %7279 = vpow2.f32 %v6011_v16  ;;  %v11441_v52 = vld [vmem:[#allocation85_spill] sm:$0xff]  ;;  %v9524_v45 = vpop.f32.mrb[100].mxu0  ;;  %v11442_v14 = vld [vmem:[#allocation87_spill] sm:$0xff] }
 0x20d   : > { %v7258_v41 = vpop.eup %7257  ;;  %v4407_v10 = vpop.permute.xlu1 %4406  ;;  %v3377_v23 = vadd.f32 1.0, %v7256_v29  ;;  %7281 = vpow2.f32 %v6138_v17 }
 0x20e   : > { %v7260_v53 = vpop.eup %7259  ;;  %v3506_v12 = vadd.f32 1.0, %v7258_v41  ;;  %5395 = vst.msk [vmem:[%s8740_s6 + $0x110] sm:$0xff] %vm5360_vm1, %v5138_v26  ;;  %v5139_v61 = vmul.f32 %v4407_v10, %v11441_v52  ;;  %7283 = vpow2.f32 %v6141_v5  ;;  %v9527_v41 = vpop.f32.mrb[101].mxu0 }
 0x20f   : > { %v7262_v21 = vpop.eup %7261  ;;  %v4661_v9 = vpop.permute.xlu0 %4660  ;;  %v3504_v43 = vadd.f32 1.0, %v7260_v53  ;;  %7285 = vrcp.f32 %v3379_v34 }
 0x210   : > { %v7264_v39 = vpop.eup %7263  ;;  %v5266_v20 = vmul.f32 %v4661_v9, %v11442_v14  ;;  %v3507_v49 = vadd.f32 1.0, %v7262_v21  ;;  %5396 = vst.msk [vmem:[%s8740_s6 + $0x118] sm:$0xff] %vm5360_vm1, %v5139_v61  ;;  %4718 = vrot.lane.b32.xlu1 %v7252_v40, %s7776_s27  ;;  %4456 = vrot.lane.b32.xlu0 %v9472_v54, %s7776_s27  ;;  %v9534_v17 = vpop.f32.mrb[102].mxu0  ;;  %7287 = vrcp.f32 %v3506_v12  ;;  %v9543_v40 = vld [vmem:[%s10968_s2] ss:$0 sm:$0xff]  ;;  %v11444_v12 = vld [vmem:[#allocation89_spill] sm:$0xff] }
 0x211   : > { %v7266_v16 = vpop.eup %7265  ;;  %v3505_v26 = vadd.f32 1.0, %v7264_v39  ;;  %v4663_v5 = vpop.permute.xlu1 %4662  ;;  %7289 = vrcp.f32 %v3377_v23  ;;  %v9547_v54 = vadd.f32 %v9543_v40, %v8825_v18  ;;  %v11445_v23 = vld [vmem:[#allocation84_spill] sm:$0xff]  ;;  %v9555_v14 = vadd.f32 %v9543_v40, %v8874_v24 }
 0x212   : > { %v7268_v29 = vpop.eup %7267  ;;  %5523 = vst.msk [vmem:[%s8740_s6 + $0x510] sm:$0xff] %vm5360_vm1, %v5266_v20  ;;  %v9538_v53 = vpop.f32.mrb[103].mxu0  ;;  %v3382_v34 = vadd.f32 1.0, %v7266_v16  ;;  %v5267_v21 = vmul.f32 %v4663_v5, %v11444_v12  ;;  %7291 = vrcp.f32 %v3504_v43  ;;  %v9567_v43 = vadd.f32 %v9543_v40, %v8881_v31 }
 0x213   : > { %v7270_v10 = vpop.eup %7269  ;;  %11443 = vst [vmem:[#allocation78_spill] sm:$0xff] %v9547_v54  ;;  %v4401_v52 = vpop.permute.xlu0 %4400  ;;  %v3380_v9 = vadd.f32 1.0, %v7268_v29  ;;  %11446 = vst [vmem:[#allocation80_spill] sm:$0xff] %v9555_v14  ;;  %7293 = vrcp.f32 %v3507_v49  ;;  %v9575_v49 = vadd.f32 %v9543_v40, %v8892_v32  ;;  %v6139_v31 = vmul.f32 -1.442695, %v9547_v54  ;;  %v11451_v32 = vld [vmem:[#allocation88_spill] sm:$0xff] }
 0x214   : > { %v9550_v61 = vpop.f32.mrb[100].mxu1  ;;  %v7272_v20 = vpop.eup %7271  ;;  %v5136_v39 = vmul.f32 %v4401_v52, %v11445_v23  ;;  %v3383_v18 = vadd.f32 1.0, %v7270_v10  ;;  %5524 = vst.msk [vmem:[%s8740_s6 + $0x518] sm:$0xff] %vm5360_vm1, %v5267_v21  ;;  %4458 = vrot.lane.b32.xlu1 %v9489_v50, %s7776_s27  ;;  %4712 = vrot.lane.b32.xlu0 %v9504_v13, %s7776_s27  ;;  %11447 = vst [vmem:[#allocation81_spill] sm:$0xff] %v9567_v43  ;;  %7295 = vrcp.f32 %v3505_v26  ;;  %v11449_v10 = vld [vmem:[#allocation86_spill] sm:$0xff] }
 0x215   : > { %v9557_v16 = vpop.f32.mrb[101].mxu1  ;;  %v7274_v35 = vpop.eup %7273  ;;  %11448 = vst [vmem:[#allocation85_spill] sm:$0xff] %v9575_v49  ;;  %7297 = vrcp.f32 %v3382_v34  ;;  %v6016_v23 = vmul.f32 -1.442695, %v9555_v14  ;;  %v9589_v56 = vadd.f32 %v9543_v40, %v8904_v62  ;;  %v6017_v62 = vmul.f32 -1.442695, %v9575_v49 }
 0x216   : > { %v9569_v29 = vpop.f32.mrb[102].mxu1  ;;  %v7276_v24 = vpop.eup %7275  ;;  %v3510_v5 = vadd.f32 1.0, %v7274_v35  ;;  %5393 = vst.msk [vmem:[%s8740_s6 + $0x100] sm:$0xff] %vm5360_vm1, %v5136_v39  ;;  %v9583_v35 = vadd.f32 %v9543_v40, %v8897_v8  ;;  %7299 = vrcp.f32 %v3380_v9  ;;  %v6014_v8 = vmul.f32 -1.442695, %v9567_v43  ;;  %v11458_v49 = vld [vmem:[#allocation91_spill] sm:$0xff] }
 0x217   : > { %v4403_v12 = vpop.permute.xlu1 %4402  ;;  %v9577_v50 = vpop.f32.mrb[103].mxu1  ;;  %11452 = vst [vmem:[#allocation89_spill] sm:$0xff] %v9589_v56  ;;  %7301 = vrcp.f32 %v3383_v18  ;;  %v9605_v18 = vadd.f32 %v9543_v40, %v8916_v2  ;;  %v9617_v2 = vadd.f32 %v9543_v40, %v8962_v37 }
 0x218   : > { %v7278_v13 = vpop.eup %7277  ;;  %v5137_v21 = vmul.f32 %v4403_v12, %v11449_v10  ;;  %v4657_v52 = vpop.permute.xlu0 %4656  ;;  %11450 = vst [vmem:[#allocation87_spill] sm:$0xff] %v9583_v35  ;;  %4714 = vrot.lane.b32.xlu1 %v7272_v20, %s7776_s27  ;;  %4468 = vrot.lane.b32.xlu0 %v7276_v24, %s7776_s27  ;;  %v11453_v12 = vld [vmem:[#allocation6_spill] sm:$0xff]  ;;  %7303 = vrcp.f32 %v3510_v5  ;;  %v9611_v5 = vadd.f32 %v9543_v40, %v8918_v25 }
 0x219   : > { %v7280_v26 = vpop.eup %7279  ;;  %v5264_v39 = vmul.f32 %v4657_v52, %v11451_v32  ;;  %v9598_v9 = vadd.f32 %v9543_v40, %v11453_v12  ;;  %11455 = vst [vmem:[#allocation86_spill] sm:$0xff] %v9605_v18  ;;  %7305 = vpow2.f32 %v6139_v31  ;;  %v6015_v32 = vmul.f32 -1.442695, %v9583_v35  ;;  %11459 = vst [vmem:[#allocation6_spill] sm:$0xff] %v9617_v2 }
 0x21a   : > { %v7282_v34 = vpop.eup %7281  ;;  %5394 = vst.msk [vmem:[%s8740_s6 + $0x108] sm:$0xff] %vm5360_vm1, %v5137_v21  ;;  %v11456_v21 = vld [vmem:[#allocation90_spill] sm:$0xff]  ;;  %11457 = vst [vmem:[#allocation88_spill] sm:$0xff] %v9611_v5  ;;  %7307 = vpow2.f32 %v6016_v23  ;;  %v9633_v35 = vadd.f32 %v9543_v40, %v8969_v47 }
 0x21b   : > { %11454 = vst [vmem:[#allocation84_spill] sm:$0xff] %v9598_v9  ;;  %v7284_v10 = vpop.eup %7283  ;;  %v4659_v52 = vpop.permute.xlu1 %4658  ;;  %5521 = vst.msk [vmem:[%s8740_s6 + $0x500] sm:$0xff] %vm5360_vm1, %v5264_v39  ;;  %v6144_v39 = vmul.f32 -1.442695, %v9589_v56  ;;  %7309 = vpow2.f32 %v6014_v8  ;;  %v6143_v8 = vmul.f32 -1.442695, %v9611_v5 }
 0x21c   : > { %v7286_v20 = vpop.eup %7285  ;;  %v5265_v24 = vmul.f32 %v4659_v52, %v11456_v21  ;;  %v4413_v12 = vpop.permute.xlu0 %4412  ;;  %v6142_v52 = vmul.f32 -1.442695, %v9598_v9  ;;  %7311 = vpow2.f32 %v6017_v62  ;;  %v11460_v21 = vld [vmem:[#allocation92_spill] sm:$0xff]  ;;  %v11461_v9 = vld [vmem:[#allocation93_spill] sm:$0xff]  ;;  %v6020_v62 = vmul.f32 -1.442695, %v9617_v2 }
 0x21d   : > { %v7288_v43 = vpop.eup %7287  ;;  %v5142_v14 = vmul.f32 %v4413_v12, %v11458_v49  ;;  %4470 = vrot.lane.b32.xlu1 %v7286_v20, %s7776_s27  ;;  %v6145_v49 = vmul.f32 -1.442695, %v9605_v18  ;;  %7313 = vpow2.f32 %v6015_v32  ;;  %11462 = vst [vmem:[#allocation90_spill] sm:$0xff] %v9633_v35  ;;  %v3381_v32 = vadd.f32 1.0, %v7280_v26  ;;  %v11464_v26 = vld [vmem:[#allocation13_spill] sm:$0xff]  ;;  %v11466_v2 = vld [vmem:[#allocation99_spill] sm:$0xff] }
 0x21e   : > { %v7290_v31 = vpop.eup %7289  ;;  %5522 = vst.msk [vmem:[%s8740_s6 + $0x508] sm:$0xff] %vm5360_vm1, %v5265_v24  ;;  %4724 = vrot.lane.b32.xlu0 %v7288_v43, %s7776_s27  ;;  %7315 = vpow2.f32 %v6144_v39  ;;  %v3511_v47 = vadd.f32 1.0, %v7284_v10  ;;  %v11467_v10 = vld [vmem:[#allocation94_spill] sm:$0xff] }
 0x21f   : > { %v7292_v25 = vpop.eup %7291  ;;  %v4415_v23 = vpop.permute.xlu1 %4414  ;;  %5399 = vst.msk [vmem:[%s8740_s6 + $0x130] sm:$0xff] %vm5360_vm1, %v5142_v14  ;;  %7317 = vpow2.f32 %v6142_v52 }
 0x220   : > { %v7294_v37 = vpop.eup %7293  ;;  %v5143_v12 = vmul.f32 %v4415_v23, %v11460_v21  ;;  %v4669_v24 = vpop.permute.xlu0 %4668  ;;  %7319 = vpow2.f32 %v6145_v49  ;;  %v9653_v21 = vadd.f32 %v9543_v40, %v11464_v26 }
 0x221   : > { %v7296_v20 = vpop.eup %7295  ;;  %v5270_v43 = vmul.f32 %v4669_v24, %v11461_v9  ;;  %v9635_v14 = vpop.f32.mrb[104].mxu0  ;;  %4726 = vrot.lane.b32.xlu1 %v7294_v37, %s7776_s27  ;;  %v9643_v9 = vadd.f32 %v9543_v40, %v8981_v59  ;;  %7321 = vpow2.f32 %v6143_v8 }
 0x222   : > { %v7298_v18 = vpop.eup %7297  ;;  %5400 = vst.msk [vmem:[%s8740_s6 + $0x138] sm:$0xff] %vm5360_vm1, %v5143_v12  ;;  %4464 = vrot.lane.b32.xlu0 %v7278_v13, %s7776_s27  ;;  %v9645_v39 = vpop.f32.mrb[105].mxu0  ;;  %11465 = vst [vmem:[#allocation92_spill] sm:$0xff] %v9653_v21  ;;  %v3508_v13 = vadd.f32 1.0, %v7282_v34  ;;  %7323 = vpow2.f32 %v6020_v62  ;;  %v6019_v62 = vmul.f32 -1.442695, %v9653_v21 }
 0x223   : > { %11463 = vst [vmem:[#allocation91_spill] sm:$0xff] %v9643_v9  ;;  %v9647_v23 = vpop.eup %7299  ;;  %5527 = vst.msk [vmem:[%s8740_s6 + $0x530] sm:$0xff] %vm5360_vm1, %v5270_v43  ;;  %v9655_v52 = vpop.f32.mrb[106].mxu0  ;;  %v6018_v43 = vmul.f32 -1.442695, %v9633_v35  ;;  %7325 = vrcp.f32 %v3381_v32 }
 0x224   : > { %v7302_v37 = vpop.eup %7301  ;;  %v4671_v12 = vpop.permute.xlu1 %4670  ;;  %v6021_v34 = vmul.f32 -1.442695, %v9643_v9  ;;  %7327 = vrcp.f32 %v3511_v47  ;;  %v11470_v9 = vld [vmem:[#allocation95_spill] sm:$0xff]  ;;  %v11471_v47 = vld [vmem:[#allocation97_spill] sm:$0xff] }
 0x225   : > { %v4409_v59 = vpop.permute.xlu0 %4408  ;;  %v7304_v24 = vpop.eup %7303  ;;  %v5271_v5 = vmul.f32 %v4671_v12, %v11466_v2  ;;  %4466 = vrot.lane.b32.xlu1 %v7290_v31, %s7776_s27  ;;  %7329 = vrcp.f32 %v3508_v13 }
 0x226   : > { %v5140_v49 = vmul.f32 %v4409_v59, %v11467_v10  ;;  %v9660_v56 = vpop.f32.mrb[107].mxu0  ;;  %v9662_v26 = vpop.f32.mrb[104].mxu1  ;;  %4720 = vrot.lane.b32.xlu0 %v7292_v25, %s7776_s27  ;;  %7331 = vpow2.f32 %v6018_v43 }
 0x227   : > { %11468 = vst [vmem:[#allocation93_spill] sm:$0xff] %v9660_v56  ;;  %v7306_v54 = vpop.eup %7305  ;;  %v9667_v8 = vpop.f32.mrb[105].mxu1  ;;  %5528 = vst.msk [vmem:[%s8740_s6 + $0x538] sm:$0xff] %vm5360_vm1, %v5271_v5  ;;  %7333 = vpow2.f32 %v6021_v34  ;;  %v11472_v34 = vld [vmem:[#allocation100_spill] sm:$0xff] }
 0x228   : > { %11469 = vst [vmem:[#allocation13_spill] sm:$0xff] %v9667_v8  ;;  %v7308_v2 = vpop.eup %7307  ;;  %5397 = vst.msk [vmem:[%s8740_s6 + $0x120] sm:$0xff] %vm5360_vm1, %v5140_v49  ;;  %v9674_v12 = vpop.f32.mrb[106].mxu1  ;;  %v3509_v32 = vadd.f32 1.0, %v7306_v54  ;;  %7335 = vpow2.f32 %v6019_v62 }
 0x229   : > { %v7310_v59 = vpop.eup %7309  ;;  %v4411_v31 = vpop.permute.xlu1 %4410  ;;  %v3386_v35 = vadd.f32 1.0, %v7308_v2  ;;  %4722 = vrot.lane.b32.xlu1 %v7296_v20, %s7776_s27 }
 0x22a   : > { %v4665_v25 = vpop.permute.xlu0 %4664  ;;  %v7312_v10 = vpop.eup %7311  ;;  %v5141_v8 = vmul.f32 %v4411_v31, %v11470_v9  ;;  %v3384_v21 = vadd.f32 1.0, %v7310_v59  ;;  %4476 = vrot.lane.b32.xlu0 %v7298_v18, %s7776_s27  ;;  %7337 = vrcp.f32 %v3509_v32  ;;  %v11473_v18 = vld [vmem:[#allocation101_spill] sm:$0xff] }
 0x22b   : > { %v5268_v56 = vmul.f32 %v4665_v25, %v11471_v47  ;;  %v9678_v5 = vpop.f32.mrb[107].mxu1  ;;  %v7314_v49 = vpop.eup %7313  ;;  %v3387_v13 = vadd.f32 1.0, %v7312_v10  ;;  %7339 = vrcp.f32 %v3386_v35  ;;  %v11475_v35 = vld [vmem:[#allocation12_spill] sm:$0xff] }
 0x22c   : > { %v7316_v54 = vpop.eup %7315  ;;  %5398 = vst.msk [vmem:[%s8740_s6 + $0x128] sm:$0xff] %vm5360_vm1, %v5141_v8  ;;  %v3385_v2 = vadd.f32 1.0, %v7314_v49  ;;  %7341 = vrcp.f32 %v3384_v21  ;;  %v9700_v49 = vadd.f32 %v9543_v40, %v11475_v35 }
 0x22d   : > { %5525 = vst.msk [vmem:[%s8740_s6 + $0x520] sm:$0xff] %vm5360_vm1, %v5268_v56  ;;  %v7318_v9 = vpop.eup %7317  ;;  %v4667_v43 = vpop.permute.xlu1 %4666  ;;  %v3514_v20 = vadd.f32 1.0, %v7316_v54  ;;  %4478 = vrot.lane.b32.xlu1 %v7302_v37, %s7776_s27  ;;  %v9691_v56 = vadd.f32 %v9543_v40, %v8994_v36  ;;  %7343 = vrcp.f32 %v3387_v13 }
 0x22e   : > { %v4421_v31 = vpop.permute.xlu0 %4420  ;;  %v7320_v59 = vpop.eup %7319  ;;  %v5269_v25 = vmul.f32 %v4667_v43, %v11472_v34  ;;  %v3512_v8 = vadd.f32 1.0, %v7318_v9  ;;  %4732 = vrot.lane.b32.xlu0 %v7304_v24, %s7776_s27  ;;  %11476 = vst [vmem:[#allocation94_spill] sm:$0xff] %v9700_v49  ;;  %7345 = vrcp.f32 %v3385_v2  ;;  %v11477_v9 = vld [vmem:[#allocation17_spill] sm:$0xff]  ;;  %v11479_v24 = vld [vmem:[#allocation16_spill] sm:$0xff]  ;;  %v11481_v34 = vld [vmem:[#allocation2_spill] sm:$0xff] }
 0x22f   : > { %v5146_v47 = vmul.f32 %v4421_v31, %v11473_v18  ;;  %v7322_v10 = vpop.eup %7321  ;;  %11474 = vst [vmem:[#allocation99_spill] sm:$0xff] %v9691_v56  ;;  %v3515_v32 = vadd.f32 1.0, %v7320_v59  ;;  %v9704_v36 = vadd.f32 %v9543_v40, %v11477_v9  ;;  %v9708_v13 = vadd.f32 %v9543_v40, %v11479_v24  ;;  %v11482_v18 = vld [vmem:[#allocation40_spill] sm:$0xff] }
 0x230   : > { %v7324_v62 = vpop.eup %7323  ;;  %5526 = vst.msk [vmem:[%s8740_s6 + $0x528] sm:$0xff] %vm5360_vm1, %v5269_v25  ;;  %v3513_v37 = vadd.f32 1.0, %v7322_v10  ;;  %7347 = vrcp.f32 %v3514_v20  ;;  %v6148_v35 = vmul.f32 -1.442695, %v9691_v56  ;;  %v9720_v20 = vadd.f32 %v9543_v40, %v9065_v3 }
 0x231   : > { %5403 = vst.msk [vmem:[%s8740_s6 + $0x150] sm:$0xff] %vm5360_vm1, %v5146_v47  ;;  %v7326_v21 = vpop.eup %7325  ;;  %v4423_v54 = vpop.permute.xlu1 %4422  ;;  %11478 = vst [vmem:[#allocation95_spill] sm:$0xff] %v9704_v36  ;;  %v3390_v59 = vadd.f32 1.0, %v7324_v62  ;;  %7349 = vrcp.f32 %v3512_v8  ;;  %v6146_v9 = vmul.f32 -1.442695, %v9700_v49  ;;  %v9731_v8 = vadd.f32 %v9543_v40, %v9069_v30  ;;  %v11489_v49 = vld [vmem:[#allocation42_spill] sm:$0xff] }
 0x232   : > { %11480 = vst [vmem:[#allocation97_spill] sm:$0xff] %v9708_v13  ;;  %v4677_v43 = vpop.permute.xlu0 %4676  ;;  %v7328_v31 = vpop.eup %7327  ;;  %v5147_v25 = vmul.f32 %v4423_v54, %v11481_v34  ;;  %4472 = vrot.lane.b32.xlu0 %v9647_v23, %s7776_s27  ;;  %11483 = vst [vmem:[#allocation100_spill] sm:$0xff] %v9720_v20  ;;  %7351 = vrcp.f32 %v3515_v32  ;;  %v6149_v3 = vmul.f32 -1.442695, %v9704_v36  ;;  %v11486_v34 = vld [vmem:[#allocation18_spill] sm:$0xff] }
 0x233   : > { %v5274_v2 = vmul.f32 %v4677_v43, %v11482_v18  ;;  %v9712_v47 = vpop.f32.mrb[108].mxu0  ;;  %v7330_v10 = vpop.eup %7329  ;;  %4734 = vrot.lane.b32.xlu1 %v7328_v31, %s7776_s27  ;;  %11484 = vst [vmem:[#allocation101_spill] sm:$0xff] %v9731_v8  ;;  %7353 = vrcp.f32 %v3513_v37  ;;  %v6147_v43 = vmul.f32 -1.442695, %v9708_v13  ;;  %v9745_v37 = vadd.f32 %v9543_v40, %v9079_v22 }
 0x234   : > { %v9722_v62 = vpop.f32.mrb[109].mxu0  ;;  %v7332_v54 = vpop.eup %7331  ;;  %5404 = vst.msk [vmem:[%s8740_s6 + $0x158] sm:$0xff] %vm5360_vm1, %v5147_v25  ;;  %v9739_v25 = vadd.f32 %v9543_v40, %v11486_v34  ;;  %7355 = vrcp.f32 %v3390_v59  ;;  %v6024_v59 = vmul.f32 -1.442695, %v9720_v20 }
 0x235   : > { %5531 = vst.msk [vmem:[%s8740_s6 + $0x550] sm:$0xff] %vm5360_vm1, %v5274_v2  ;;  %v9733_v24 = vpop.f32.mrb[110].mxu0  ;;  %v7334_v23 = vpop.eup %7333  ;;  %v11488_v2 = vld [vmem:[#allocation43_spill] sm:$0xff]  ;;  %11490 = vst [vmem:[#allocation16_spill] sm:$0xff] %v9745_v37  ;;  %7357 = vpow2.f32 %v6148_v35  ;;  %v6022_v35 = vmul.f32 -1.442695, %v9731_v8 }
 0x236   : > { %11485 = vst [vmem:[#allocation12_spill] sm:$0xff] %v9733_v24  ;;  %v4679_v31 = vpop.permute.xlu1 %4678  ;;  %v4417_v32 = vpop.permute.xlu0 %4416  ;;  %11487 = vst [vmem:[#allocation17_spill] sm:$0xff] %v9739_v25  ;;  %4728 = vrot.lane.b32.xlu0 %v7330_v10, %s7776_s27  ;;  %7359 = vpow2.f32 %v6146_v9 }
 0x237   : > { %v7336_v18 = vpop.eup %7335  ;;  %v5275_v30 = vmul.f32 %v4679_v31, %v11488_v2  ;;  %v5144_v56 = vmul.f32 %v4417_v32, %v11489_v49  ;;  %v9747_v36 = vpop.f32.mrb[111].mxu0  ;;  %4474 = vrot.lane.b32.xlu1 %v7326_v21, %s7776_s27  ;;  %v9756_v31 = vadd.f32 %v9543_v40, %v9082_v6  ;;  %7361 = vpow2.f32 %v6149_v3  ;;  %v11496_v2 = vld [vmem:[#allocation21_spill] sm:$0xff] }
 0x238   : > { %11491 = vst [vmem:[#allocation2_spill] sm:$0xff] %v9747_v36  ;;  %v9749_v13 = vpop.f32.mrb[108].mxu1  ;;  %v7338_v24 = vpop.eup %7337  ;;  %v6025_v6 = vmul.f32 -1.442695, %v9739_v25  ;;  %v9770_v20 = vadd.f32 %v9543_v40, %v11496_v2  ;;  %7363 = vpow2.f32 %v6147_v43  ;;  %v3388_v36 = vadd.f32 1.0, %v7332_v54 }
 0x239   : > { %11492 = vst [vmem:[#allocation40_spill] sm:$0xff] %v9749_v13  ;;  %11493 = vst [vmem:[#allocation18_spill] sm:$0xff] %v9756_v31  ;;  %v9758_v49 = vpop.f32.mrb[109].mxu1  ;;  %v7340_v22 = vpop.eup %7339  ;;  %7365 = vpow2.f32 %v6024_v59  ;;  %v6152_v2 = vmul.f32 -1.442695, %v9756_v31  ;;  %v11503_v59 = vld [vmem:[#allocation25_spill] sm:$0xff] }
 0x23a   : > { %11494 = vst [vmem:[#allocation43_spill] sm:$0xff] %v9758_v49  ;;  %5532 = vst.msk [vmem:[%s8740_s6 + $0x558] sm:$0xff] %vm5360_vm1, %v5275_v30  ;;  %v9765_v32 = vpop.f32.mrb[110].mxu1  ;;  %v7342_v21 = vpop.eup %7341  ;;  %v11498_v30 = vld [vmem:[#allocation47_spill] sm:$0xff]  ;;  %v11499_v49 = vld [vmem:[#allocation5_spill] sm:$0xff]  ;;  %4484 = vrot.lane.b32.xlu0 %v7340_v22, %s7776_s27  ;;  %7367 = vpow2.f32 %v6022_v35  ;;  %v9793_v54 = vadd.f32 %v9543_v40, %v11503_v59 }
 0x23b   : > { %5401 = vst.msk [vmem:[%s8740_s6 + $0x140] sm:$0xff] %vm5360_vm1, %v5144_v56  ;;  %11495 = vst [vmem:[#allocation42_spill] sm:$0xff] %v9765_v32  ;;  %v4419_v10 = vpop.permute.xlu1 %4418  ;;  %v4673_v34 = vpop.permute.xlu0 %4672  ;;  %v6023_v32 = vmul.f32 -1.442695, %v9745_v37  ;;  %4730 = vrot.lane.b32.xlu1 %v7338_v24, %s7776_s27  ;;  %7369 = vpow2.f32 %v6025_v6  ;;  %v6153_v24 = vmul.f32 -1.442695, %v9770_v20 }
 0x23c   : > { %11497 = vst [vmem:[#allocation21_spill] sm:$0xff] %v9770_v20  ;;  %v7344_v9 = vpop.eup %7343  ;;  %v5145_v56 = vmul.f32 %v4419_v10, %v11498_v30  ;;  %v5272_v8 = vmul.f32 %v4673_v34, %v11499_v49  ;;  %v9775_v13 = vpop.f32.mrb[111].mxu1  ;;  %v11501_v34 = vld [vmem:[#allocation58_spill] sm:$0xff]  ;;  %v11506_v37 = vld [vmem:[#allocation45_spill] sm:$0xff] }
 0x23d   : > { %11500 = vst [vmem:[#allocation47_spill] sm:$0xff] %v9775_v13  ;;  %v9777_v3 = vpop.eup %7345  ;;  %v9788_v30 = vadd.f32 %v9543_v40, %v11501_v34  ;;  %11504 = vst [vmem:[#allocation58_spill] sm:$0xff] %v9793_v54  ;;  %7371 = vpow2.f32 %v6023_v32  ;;  %v3389_v13 = vadd.f32 1.0, %v7336_v18  ;;  %v9803_v34 = vadd.f32 %v9543_v40, %v9164_v38 }
 0x23e   : > { %v7348_v25 = vpop.eup %7347  ;;  %5402 = vst.msk [vmem:[%s8740_s6 + $0x148] sm:$0xff] %vm5360_vm1, %v5145_v56  ;;  %5529 = vst.msk [vmem:[%s8740_s6 + $0x540] sm:$0xff] %vm5360_vm1, %v5272_v8  ;;  %v3391_v56 = vadd.f32 1.0, %v7334_v23  ;;  %v11505_v8 = vld [vmem:[#allocation3_spill] sm:$0xff]  ;;  %7373 = vpow2.f32 %v6152_v2  ;;  %v6151_v32 = vmul.f32 -1.442695, %v9793_v54 }
 0x23f   : > { %v7350_v43 = vpop.eup %7349  ;;  %v4675_v49 = vpop.permute.xlu1 %4674  ;;  %11502 = vst [vmem:[#allocation5_spill] sm:$0xff] %v9788_v30  ;;  %4486 = vrot.lane.b32.xlu1 %v7344_v9, %s7776_s27  ;;  %4740 = vrot.lane.b32.xlu0 %v7348_v25, %s7776_s27  ;;  %11507 = vst [vmem:[#allocation25_spill] sm:$0xff] %v9803_v34  ;;  %7375 = vrcp.f32 %v3388_v36  ;;  %v6150_v18 = vmul.f32 -1.442695, %v9788_v30  ;;  %v11508_v2 = vld [vmem:[#allocation4_spill] sm:$0xff] }
 0x240   : > { %v4429_v10 = vpop.permute.xlu0 %4428  ;;  %v7352_v22 = vpop.eup %7351  ;;  %v5273_v35 = vmul.f32 %v4675_v49, %v11505_v8  ;;  %7377 = vpow2.f32 %v6153_v24  ;;  %v11509_v36 = vld [vmem:[#allocation8_spill] sm:$0xff]  ;;  %v6028_v24 = vmul.f32 -1.442695, %v9803_v34 }
 0x241   : > { %v5150_v6 = vmul.f32 %v4429_v10, %v11506_v37  ;;  %v9797_v31 = vpop.eup %7353  ;;  %7379 = vrcp.f32 %v3391_v56  ;;  %v9815_v8 = vpop.f32.mrb[112].mxu0 }
 0x242   : > { %v9805_v59 = vpop.eup %7355  ;;  %5530 = vst.msk [vmem:[%s8740_s6 + $0x548] sm:$0xff] %vm5360_vm1, %v5273_v35  ;;  %7381 = vrcp.f32 %v3389_v13 }
 0x243   : > { %5407 = vst.msk [vmem:[%s8740_s6 + $0x170] sm:$0xff] %vm5360_vm1, %v5150_v6  ;;  %v7358_v23 = vpop.eup %7357  ;;  %v4431_v37 = vpop.permute.xlu1 %4430  ;;  %4742 = vrot.lane.b32.xlu1 %v7352_v22, %s7776_s27  ;;  %4480 = vrot.lane.b32.xlu0 %v7342_v21, %s7776_s27 }
 0x244   : > { %v4685_v9 = vpop.permute.xlu0 %4684  ;;  %v7360_v25 = vpop.eup %7359  ;;  %v3518_v38 = vadd.f32 1.0, %v7358_v23  ;;  %v5151_v49 = vmul.f32 %v4431_v37, %v11508_v2 }
 0x245   : > { %v5278_v10 = vmul.f32 %v4685_v9, %v11509_v36  ;;  %v7362_v35 = vpop.eup %7361  ;;  %v9820_v6 = vpop.f32.mrb[113].mxu0  ;;  %v3516_v9 = vadd.f32 1.0, %v7360_v25  ;;  %v11510_v36 = vld [vmem:[#allocation11_spill] sm:$0xff] }
 0x246   : > { %v7364_v54 = vpop.eup %7363  ;;  %7383 = vrcp.f32 %v3518_v38  ;;  %v3519_v56 = vadd.f32 1.0, %v7362_v35  ;;  %5408 = vst.msk [vmem:[%s8740_s6 + $0x178] sm:$0xff] %vm5360_vm1, %v5151_v49  ;;  %v9826_v23 = vpop.f32.mrb[114].mxu0  ;;  %v11511_v38 = vld [vmem:[#allocation48_spill] sm:$0xff] }
 0x247   : > { %5535 = vst.msk [vmem:[%s8740_s6 + $0x570] sm:$0xff] %vm5360_vm1, %v5278_v10  ;;  %v7366_v37 = vpop.eup %7365  ;;  %7385 = vpow2.f32 %v6150_v18  ;;  %v4687_v13 = vpop.permute.xlu1 %4686  ;;  %v3517_v21 = vadd.f32 1.0, %v7364_v54  ;;  %4482 = vrot.lane.b32.xlu1 %v9777_v3, %s7776_s27  ;;  %4736 = vrot.lane.b32.xlu0 %v7350_v43, %s7776_s27  ;;  %v9847_v3 = vadd.f32 %v9543_v40, %v9169_v27  ;;  %v11516_v43 = vld [vmem:[#allocation71_spill] sm:$0xff]  ;;  %v11521_v27 = vld [vmem:[#allocation30_spill] sm:$0xff] }
 0x248   : > { %v4425_v22 = vpop.permute.xlu0 %4424  ;;  %v7368_v2 = vpop.eup %7367  ;;  %7387 = vpow2.f32 %v6151_v32  ;;  %v5279_v34 = vmul.f32 %v4687_v13, %v11510_v36  ;;  %v3394_v20 = vadd.f32 1.0, %v7366_v37 }
 0x249   : > { %v5148_v35 = vmul.f32 %v4425_v22, %v11511_v38  ;;  %v9830_v30 = vpop.f32.mrb[115].mxu0  ;;  %v9832_v49 = vpop.f32.mrb[112].mxu1  ;;  %7389 = vpow2.f32 %v6028_v24  ;;  %v3392_v32 = vadd.f32 1.0, %v7368_v2  ;;  %11515 = vst [vmem:[#allocation8_spill] sm:$0xff] %v9847_v3  ;;  %v9851_v24 = vadd.f32 %v9543_v40, %v11516_v43  ;;  %v11518_v2 = vld [vmem:[#allocation9_spill] sm:$0xff] }
 0x24a   : > { %11512 = vst [vmem:[#allocation3_spill] sm:$0xff] %v9830_v30  ;;  %v7370_v10 = vpop.eup %7369  ;;  %v9837_v18 = vpop.f32.mrb[113].mxu1  ;;  %7391 = vrcp.f32 %v3519_v56  ;;  %5536 = vst.msk [vmem:[%s8740_s6 + $0x578] sm:$0xff] %vm5360_vm1, %v5279_v34  ;;  %v9863_v43 = vadd.f32 %v9543_v40, %v11521_v27 }
 0x24b   : > { %11513 = vst [vmem:[#allocation45_spill] sm:$0xff] %v9837_v18  ;;  %v7372_v54 = vpop.eup %7371  ;;  %5405 = vst.msk [vmem:[%s8740_s6 + $0x160] sm:$0xff] %vm5360_vm1, %v5148_v35  ;;  %v9843_v25 = vpop.f32.mrb[114].mxu1  ;;  %7393 = vrcp.f32 %v3516_v9  ;;  %v3395_v37 = vadd.f32 1.0, %v7370_v10  ;;  %v11519_v35 = vld [vmem:[#allocation7_spill] sm:$0xff]  ;;  %4738 = vrot.lane.b32.xlu1 %v9797_v31, %s7776_s27  ;;  %4492 = vrot.lane.b32.xlu0 %v9805_v59, %s7776_s27 }
 0x24c   : > { %11514 = vst [vmem:[#allocation4_spill] sm:$0xff] %v9843_v25  ;;  %v7374_v13 = vpop.eup %7373  ;;  %v4427_v22 = vpop.permute.xlu1 %4426  ;;  %11517 = vst [vmem:[#allocation11_spill] sm:$0xff] %v9851_v24  ;;  %7395 = vrcp.f32 %v3517_v21  ;;  %v3393_v34 = vadd.f32 1.0, %v7372_v54  ;;  %v6026_v59 = vmul.f32 -1.442695, %v9847_v3 }
 0x24d   : > { %v4681_v36 = vpop.permute.xlu0 %4680  ;;  %v7376_v56 = vpop.eup %7375  ;;  %v5149_v38 = vmul.f32 %v4427_v22, %v11518_v2  ;;  %7397 = vrcp.f32 %v3394_v20  ;;  %v3522_v18 = vadd.f32 1.0, %v7374_v13  ;;  %11522 = vst [vmem:[#allocation71_spill] sm:$0xff] %v9863_v43  ;;  %v11523_v22 = vld [vmem:[#allocation28_spill] sm:$0xff]  ;;  %v11525_v2 = vld [vmem:[#allocation75_spill] sm:$0xff] }
 0x24e   : > { %v5276_v9 = vmul.f32 %v4681_v36, %v11519_v35  ;;  %v9855_v10 = vpop.f32.mrb[115].mxu1  ;;  %v7378_v25 = vpop.eup %7377  ;;  %7399 = vrcp.f32 %v3392_v32  ;;  %v9871_v20 = vadd.f32 %v9543_v40, %v11523_v22  ;;  %v9878_v32 = vadd.f32 %v9543_v40, %v11525_v2  ;;  %v11530_v22 = vld [vmem:[#allocation52_spill] sm:$0xff] }
 0x24f   : > { %11520 = vst [vmem:[#allocation48_spill] sm:$0xff] %v9855_v10  ;;  %v7380_v21 = vpop.eup %7379  ;;  %v3523_v54 = vadd.f32 1.0, %v7378_v25  ;;  %5406 = vst.msk [vmem:[%s8740_s6 + $0x168] sm:$0xff] %vm5360_vm1, %v5149_v38  ;;  %7401 = vrcp.f32 %v3395_v37  ;;  %v11527_v25 = vld [vmem:[#allocation102_spill] sm:$0xff]  ;;  %v6029_v37 = vmul.f32 -1.442695, %v9851_v24 }
 0x250   : > { %5533 = vst.msk [vmem:[%s8740_s6 + $0x560] sm:$0xff] %vm5360_vm1, %v5276_v9  ;;  %11524 = vst [vmem:[#allocation9_spill] sm:$0xff] %v9871_v20  ;;  %v9873_v13 = vpop.eup %7381  ;;  %v4683_v31 = vpop.permute.xlu1 %4682  ;;  %v9882_v38 = vadd.f32 %v9543_v40, %v11527_v25  ;;  %7403 = vrcp.f32 %v3393_v34  ;;  %v11529_v9 = vld [vmem:[#allocation10_spill] sm:$0xff]  ;;  %4494 = vrot.lane.b32.xlu1 %v7380_v21, %s7776_s27  ;;  %v6027_v2 = vmul.f32 -1.442695, %v9863_v43  ;;  %v9892_v25 = vadd.f32 %v9543_v40, %v9211_v33 }
 0x251   : > { %v4437_v36 = vpop.permute.xlu0 %4436  ;;  %11526 = vst [vmem:[#allocation7_spill] sm:$0xff] %v9878_v32  ;;  %v7384_v35 = vpop.eup %7383  ;;  %v5277_v27 = vmul.f32 %v4683_v31, %v11529_v9  ;;  %7405 = vrcp.f32 %v3522_v18  ;;  %v6156_v34 = vmul.f32 -1.442695, %v9871_v20  ;;  %v9901_v18 = vadd.f32 %v9543_v40, %v9236_v7  ;;  %v11533_v9 = vld [vmem:[#allocation54_spill] sm:$0xff] }
 0x252   : > { %11528 = vst [vmem:[#allocation30_spill] sm:$0xff] %v9882_v38  ;;  %v5154_v10 = vmul.f32 %v4437_v36, %v11530_v22  ;;  %v7386_v3 = vpop.eup %7385  ;;  %4748 = vrot.lane.b32.xlu0 %v7384_v35, %s7776_s27  ;;  %11531 = vst [vmem:[#allocation28_spill] sm:$0xff] %v9892_v25  ;;  %7407 = vrcp.f32 %v3523_v54  ;;  %v6154_v36 = vmul.f32 -1.442695, %v9878_v32  ;;  %v6157_v33 = vmul.f32 -1.442695, %v9882_v38 }
 0x253   : > { %v7388_v30 = vpop.eup %7387  ;;  %5534 = vst.msk [vmem:[%s8740_s6 + $0x568] sm:$0xff] %vm5360_vm1, %v5277_v27  ;;  %11532 = vst [vmem:[#allocation75_spill] sm:$0xff] %v9901_v18  ;;  %7409 = vpow2.f32 %v6026_v59  ;;  %v11534_v22 = vld [vmem:[#allocation55_spill] sm:$0xff]  ;;  %v9909_v7 = vadd.f32 %v9543_v40, %v9255_v1  ;;  %v9911_v43 = vpop.f32.mrb[116].mxu0  ;;  %v6155_v32 = vmul.f32 -1.442695, %v9892_v25 }
 0x254   : > { %5411 = vst.msk [vmem:[%s8740_s6 + $0x190] sm:$0xff] %vm5360_vm1, %v5154_v10  ;;  %v7390_v21 = vpop.eup %7389  ;;  %v4439_v31 = vpop.permute.xlu1 %4438  ;;  %7411 = vpow2.f32 %v6029_v37  ;;  %v6032_v1 = vmul.f32 -1.442695, %v9901_v18  ;;  %v3521_v24 = vadd.f32 1.0, %v7388_v30 }
 0x255   : > { %v4693_v35 = vpop.permute.xlu0 %4692  ;;  %v7392_v54 = vpop.eup %7391  ;;  %v5155_v27 = vmul.f32 %v4439_v31, %v11533_v9  ;;  %11535 = vst [vmem:[#allocation102_spill] sm:$0xff] %v9909_v7  ;;  %7413 = vpow2.f32 %v6027_v2  ;;  %v9925_v31 = vadd.f32 %v9543_v40, %v9270_v11  ;;  %v11539_v11 = vld [vmem:[#allocation15_spill] sm:$0xff]  ;;  %v6033_v25 = vmul.f32 -1.442695, %v9909_v7 }
 0x256   : > { %v5282_v10 = vmul.f32 %v4693_v35, %v11534_v22  ;;  %v7394_v59 = vpop.eup %7393  ;;  %4750 = vrot.lane.b32.xlu1 %v7392_v54, %s7776_s27  ;;  %4488 = vrot.lane.b32.xlu0 %v7376_v56, %s7776_s27  ;;  %v9916_v38 = vpop.f32.mrb[117].mxu0  ;;  %7415 = vpow2.f32 %v6156_v34  ;;  %v3520_v54 = vadd.f32 1.0, %v7386_v3  ;;  %v9931_v34 = vadd.f32 %v9543_v40, %v9244_v28  ;;  %v11538_v22 = vld [vmem:[#allocation56_spill] sm:$0xff]  ;;  %v11542_v28 = vld [vmem:[#allocation39_spill] sm:$0xff] }
 0x257   : > { %v7396_v37 = vpop.eup %7395  ;;  %5412 = vst.msk [vmem:[%s8740_s6 + $0x198] sm:$0xff] %vm5360_vm1, %v5155_v27  ;;  %11536 = vst [vmem:[#allocation10_spill] sm:$0xff] %v9925_v31  ;;  %v9927_v2 = vpop.f32.mrb[118].mxu0  ;;  %7417 = vpow2.f32 %v6154_v36  ;;  %v6160_v30 = vmul.f32 -1.442695, %v9925_v31 }
 0x258   : > { %5539 = vst.msk [vmem:[%s8740_s6 + $0x590] sm:$0xff] %vm5360_vm1, %v5282_v10  ;;  %v7398_v35 = vpop.eup %7397  ;;  %v4695_v56 = vpop.permute.xlu1 %4694  ;;  %11537 = vst [vmem:[#allocation52_spill] sm:$0xff] %v9931_v34  ;;  %7419 = vpow2.f32 %v6157_v33  ;;  %v9947_v33 = vadd.f32 %v9543_v40, %v11542_v28  ;;  %v6030_v31 = vmul.f32 -1.442695, %v9931_v34 }
 0x259   : > { %v4433_v9 = vpop.permute.xlu0 %4432  ;;  %v9933_v27 = vpop.eup %7399  ;;  %v5283_v10 = vmul.f32 %v4695_v56, %v11538_v22  ;;  %7421 = vpow2.f32 %v6155_v32  ;;  %v11545_v32 = vld [vmem:[#allocation77_spill] sm:$0xff] }
 0x25a   : > { %v5152_v18 = vmul.f32 %v4433_v9, %v11539_v11  ;;  %v9938_v20 = vpop.f32.mrb[119].mxu0  ;;  %v9940_v3 = vpop.f32.mrb[116].mxu1  ;;  %4490 = vrot.lane.b32.xlu1 %v9873_v13, %s7776_s27  ;;  %4744 = vrot.lane.b32.xlu0 %v7394_v59, %s7776_s27  ;;  %11543 = vst [vmem:[#allocation56_spill] sm:$0xff] %v9947_v33  ;;  %7423 = vpow2.f32 %v6032_v1  ;;  %v9960_v13 = vadd.f32 %v9543_v40, %v11545_v32  ;;  %v3398_v11 = vadd.f32 1.0, %v7390_v21 }
 0x25b   : > { %11540 = vst [vmem:[#allocation54_spill] sm:$0xff] %v9938_v20  ;;  %11541 = vst [vmem:[#allocation55_spill] sm:$0xff] %v9940_v3  ;;  %v7402_v36 = vpop.eup %7401  ;;  %v9949_v56 = vpop.f32.mrb[117].mxu1  ;;  %7425 = vrcp.f32 %v3520_v54  ;;  %v6031_v21 = vmul.f32 -1.442695, %v9947_v33  ;;  %v11552_v33 = vld [vmem:[#allocation23_spill] sm:$0xff] }
 0x25c   : > { %11544 = vst [vmem:[#allocation15_spill] sm:$0xff] %v9949_v56  ;;  %v9951_v9 = vpop.eup %7403  ;;  %5540 = vst.msk [vmem:[%s8740_s6 + $0x598] sm:$0xff] %vm5360_vm1, %v5283_v10  ;;  %v9962_v59 = vpop.f32.mrb[118].mxu1  ;;  %v11548_v10 = vld [vmem:[#allocation14_spill] sm:$0xff]  ;;  %7427 = vpow2.f32 %v6033_v25 }
 0x25d   : > { %5409 = vst.msk [vmem:[%s8740_s6 + $0x180] sm:$0xff] %vm5360_vm1, %v5152_v18  ;;  %11546 = vst [vmem:[#allocation39_spill] sm:$0xff] %v9960_v13  ;;  %v7406_v22 = vpop.eup %7405  ;;  %v4435_v28 = vpop.permute.xlu1 %4434  ;;  %v11549_v18 = vld [vmem:[#allocation19_spill] sm:$0xff]  ;;  %7429 = vrcp.f32 %v3521_v24 }
 0x25e   : > { %11547 = vst [vmem:[#allocation77_spill] sm:$0xff] %v9962_v59  ;;  %v4689_v7 = vpop.permute.xlu0 %4688  ;;  %v7408_v56 = vpop.eup %7407  ;;  %v5153_v20 = vmul.f32 %v4435_v28, %v11548_v10  ;;  %4746 = vrot.lane.b32.xlu1 %v7396_v37, %s7776_s27  ;;  %4500 = vrot.lane.b32.xlu0 %v7398_v35, %s7776_s27  ;;  %7431 = vpow2.f32 %v6160_v30  ;;  %v11551_v35 = vld [vmem:[#allocation57_spill] sm:$0xff] }
 0x25f   : > { %v5280_v1 = vmul.f32 %v4689_v7, %v11549_v18  ;;  %v9967_v3 = vpop.f32.mrb[119].mxu1  ;;  %v7410_v32 = vpop.eup %7409  ;;  %v6158_v7 = vmul.f32 -1.442695, %v9960_v13  ;;  %7433 = vrcp.f32 %v3398_v11  ;;  %v11568_v13 = vld [vmem:[#allocation63_spill] sm:$0xff] }
 0x260   : > { %11550 = vst [vmem:[#allocation14_spill] sm:$0xff] %v9967_v3  ;;  %v7412_v54 = vpop.eup %7411  ;;  %5410 = vst.msk [vmem:[%s8740_s6 + $0x188] sm:$0xff] %vm5360_vm1, %v5153_v20  ;;  %v3396_v25 = vadd.f32 1.0, %v7410_v32  ;;  %7435 = vpow2.f32 %v6030_v31 }
 0x261   : > { %5537 = vst.msk [vmem:[%s8740_s6 + $0x580] sm:$0xff] %vm5360_vm1, %v5280_v1  ;;  %v7414_v28 = vpop.eup %7413  ;;  %v4691_v24 = vpop.permute.xlu1 %4690  ;;  %v3399_v18 = vadd.f32 1.0, %v7412_v54  ;;  %7437 = vpow2.f32 %v6031_v21 }
 0x262   : > { %v4445_v10 = vpop.permute.xlu0 %4444  ;;  %v7416_v37 = vpop.eup %7415  ;;  %v5281_v34 = vmul.f32 %v4691_v24, %v11551_v35  ;;  %v3397_v59 = vadd.f32 1.0, %v7414_v28  ;;  %4502 = vrot.lane.b32.xlu1 %v7402_v36, %s7776_s27  ;;  %4756 = vrot.lane.b32.xlu0 %v7406_v22, %s7776_s27  ;;  %7439 = vpow2.f32 %v6158_v7  ;;  %v11553_v36 = vld [vmem:[#allocation24_spill] sm:$0xff] }
 0x263   : > { %v5158_v3 = vmul.f32 %v4445_v10, %v11552_v33  ;;  %v7418_v20 = vpop.eup %7417  ;;  %v3526_v11 = vadd.f32 1.0, %v7416_v37  ;;  %7441 = vrcp.f32 %v3396_v25  ;;  %v11554_v22 = vld [vmem:[#allocation68_spill] sm:$0xff]  ;;  %v9987_v10 = vpop.f32.mrb[120].mxu0 }
 0x264   : > { %v7420_v30 = vpop.eup %7419  ;;  %5538 = vst.msk [vmem:[%s8740_s6 + $0x588] sm:$0xff] %vm5360_vm1, %v5281_v34  ;;  %v3524_v32 = vadd.f32 1.0, %v7418_v20  ;;  %7443 = vrcp.f32 %v3399_v18  ;;  %v11555_v7 = vld [vmem:[#allocation36_spill] sm:$0xff]  ;;  %v9996_v37 = vpop.f32.mrb[121].mxu0 }
 0x265   : > { %5415 = vst.msk [vmem:[%s8740_s6 + $0x1b0] sm:$0xff] %vm5360_vm1, %v5158_v3  ;;  %v7422_v1 = vpop.eup %7421  ;;  %v4447_v31 = vpop.permute.xlu1 %4446  ;;  %v3527_v28 = vadd.f32 1.0, %v7420_v30  ;;  %7445 = vrcp.f32 %v3397_v59  ;;  %v9991_v25 = vadd.f32 %v9543_v40, %v11555_v7  ;;  %v10002_v59 = vadd.f32 %v9543_v40, %v9298_v60  ;;  %v11560_v60 = vld [vmem:[#allocation27_spill] sm:$0xff] }
 0x266   : > { %v4701_v54 = vpop.permute.xlu0 %4700  ;;  %v7424_v33 = vpop.eup %7423  ;;  %v5159_v21 = vmul.f32 %v4447_v31, %v11553_v36  ;;  %v3525_v3 = vadd.f32 1.0, %v7422_v1  ;;  %4758 = vrot.lane.b32.xlu1 %v7408_v56, %s7776_s27  ;;  %4496 = vrot.lane.b32.xlu0 %v9933_v27, %s7776_s27  ;;  %7447 = vrcp.f32 %v3526_v11  ;;  %v10010_v31 = vadd.f32 %v9543_v40, %v9348_v48  ;;  %v11561_v36 = vld [vmem:[#allocation20_spill] sm:$0xff] }
 0x267   : > { %v5286_v24 = vmul.f32 %v4701_v54, %v11554_v22  ;;  %v7426_v34 = vpop.eup %7425  ;;  %11556 = vst [vmem:[#allocation19_spill] sm:$0xff] %v9991_v25  ;;  %v3402_v35 = vadd.f32 1.0, %v7424_v33  ;;  %11557 = vst [vmem:[#allocation57_spill] sm:$0xff] %v10002_v59  ;;  %v10006_v20 = vpop.f32.mrb[122].mxu0  ;;  %7449 = vrcp.f32 %v3524_v32  ;;  %v10014_v11 = vadd.f32 %v9543_v40, %v9354_v51  ;;  %v11562_v51 = vld [vmem:[#allocation46_spill] sm:$0xff] }
 0x268   : > { %v7428_v18 = vpop.eup %7427  ;;  %5416 = vst.msk [vmem:[%s8740_s6 + $0x1b8] sm:$0xff] %vm5360_vm1, %v5159_v21  ;;  %11558 = vst [vmem:[#allocation23_spill] sm:$0xff] %v10010_v31  ;;  %7451 = vrcp.f32 %v3527_v28  ;;  %v10018_v32 = vpop.f32.mrb[123].mxu0  ;;  %v6161_v7 = vmul.f32 -1.442695, %v9991_v25  ;;  %v10028_v28 = vadd.f32 %v9543_v40, %v11562_v51 }
 0x269   : > { %5543 = vst.msk [vmem:[%s8740_s6 + $0x5b0] sm:$0xff] %vm5360_vm1, %v5286_v24  ;;  %v7430_v30 = vpop.eup %7429  ;;  %v3403_v56 = vadd.f32 1.0, %v7428_v18  ;;  %v4703_v1 = vpop.permute.xlu1 %4702  ;;  %11559 = vst [vmem:[#allocation24_spill] sm:$0xff] %v10014_v11  ;;  %7453 = vrcp.f32 %v3525_v3  ;;  %v11564_v3 = vld [vmem:[#allocation51_spill] sm:$0xff] }
 0x26a   : > { %v4441_v27 = vpop.permute.xlu0 %4440  ;;  %v7432_v54 = vpop.eup %7431  ;;  %v5287_v33 = vmul.f32 %v4703_v1, %v11560_v60  ;;  %4498 = vrot.lane.b32.xlu1 %v9951_v9, %s7776_s27  ;;  %4752 = vrot.lane.b32.xlu0 %v7426_v34, %s7776_s27  ;;  %11563 = vst [vmem:[#allocation68_spill] sm:$0xff] %v10028_v28  ;;  %7455 = vrcp.f32 %v3402_v35  ;;  %v6034_v35 = vmul.f32 -1.442695, %v10014_v11 }
 0x26b   : > { %v5156_v21 = vmul.f32 %v4441_v27, %v11561_v36  ;;  %v10020_v22 = vpop.f32.mrb[120].mxu1  ;;  %v7434_v24 = vpop.eup %7433  ;;  %v3530_v48 = vadd.f32 1.0, %v7432_v54  ;;  %v6159_v27 = vmul.f32 -1.442695, %v10002_v59  ;;  %v10039_v54 = vadd.f32 %v9543_v40, %v11564_v3 }
 0x26c   : > { %v10030_v18 = vpop.f32.mrb[121].mxu1  ;;  %v7436_v1 = vpop.eup %7435  ;;  %5544 = vst.msk [vmem:[%s8740_s6 + $0x5b8] sm:$0xff] %vm5360_vm1, %v5287_v33  ;;  %7457 = vrcp.f32 %v3403_v56  ;;  %v6036_v36 = vmul.f32 -1.442695, %v10010_v31  ;;  %v10047_v59 = vadd.f32 %v9543_v40, %v9369_v42  ;;  %v10056_v56 = vld [vmem:[%s10968_s2] ss:$0 sm:$0xff] }
 0x26d   : > { %5413 = vst.msk [vmem:[%s8740_s6 + $0x1a0] sm:$0xff] %vm5360_vm1, %v5156_v21  ;;  %11565 = vst [vmem:[#allocation36_spill] sm:$0xff] %v10039_v54  ;;  %v10041_v9 = vpop.f32.mrb[122].mxu1  ;;  %v7438_v34 = vpop.eup %7437  ;;  %7459 = vrcp.f32 %v3530_v48  ;;  %v11567_v21 = vld [vmem:[#allocation22_spill] sm:$0xff]  ;;  %v10060_v11 = vadd.f32 %v10056_v56, %v9372_v4  ;;  %v6037_v48 = vmul.f32 -1.442695, %v10028_v28 }
 0x26e   : > { %v4443_v60 = vpop.permute.xlu1 %4442  ;;  %v4697_v51 = vpop.permute.xlu0 %4696  ;;  %11566 = vst [vmem:[#allocation27_spill] sm:$0xff] %v10047_v59  ;;  %7461 = vpow2.f32 %v6161_v7  ;;  %4754 = vrot.lane.b32.xlu1 %v7430_v30, %s7776_s27  ;;  %4508 = vrot.lane.b32.xlu0 %v7434_v24, %s7776_s27  ;;  %v6035_v4 = vmul.f32 -1.442695, %v10039_v54  ;;  %v10078_v7 = vadd.f32 %v10056_v56, %v9383_v44 }
 0x26f   : > { %v10049_v33 = vpop.eup %7439  ;;  %v5157_v3 = vmul.f32 %v4443_v60, %v11567_v21  ;;  %v5284_v25 = vmul.f32 %v4697_v51, %v11568_v13  ;;  %11569 = vst [vmem:[#allocation20_spill] sm:$0xff] %v10060_v11  ;;  %v10062_v42 = vpop.f32.mrb[123].mxu1  ;;  %v10069_v13 = vadd.f32 %v10056_v56, %v9379_v58  ;;  %7463 = vpow2.f32 %v6159_v27  ;;  %v11572_v27 = vld [vmem:[#allocation66_spill] sm:$0xff] }
 0x270   : > { %v7442_v40 = vpop.eup %7441  ;;  %11571 = vst [vmem:[#allocation51_spill] sm:$0xff] %v10078_v7  ;;  %7465 = vpow2.f32 %v6036_v36  ;;  %v6164_v58 = vmul.f32 -1.442695, %v10047_v59  ;;  %v6162_v54 = vmul.f32 -1.442695, %v10060_v11 }
 0x271   : > { %11570 = vst [vmem:[#allocation46_spill] sm:$0xff] %v10069_v13  ;;  %v7444_v60 = vpop.eup %7443  ;;  %5414 = vst.msk [vmem:[%s8740_s6 + $0x1a8] sm:$0xff] %vm5360_vm1, %v5157_v3  ;;  %7467 = vpow2.f32 %v6034_v35  ;;  %v11573_v3 = vld [vmem:[#allocation26_spill] sm:$0xff]  ;;  %v6165_v44 = vmul.f32 -1.442695, %v10069_v13 }
 0x272   : > { %5541 = vst.msk [vmem:[%s8740_s6 + $0x5a0] sm:$0xff] %vm5360_vm1, %v5284_v25  ;;  %v7446_v30 = vpop.eup %7445  ;;  %v4699_v24 = vpop.permute.xlu1 %4698  ;;  %7469 = vpow2.f32 %v6037_v48  ;;  %4510 = vrot.lane.b32.xlu1 %v7444_v60, %s7776_s27  ;;  %v6163_v35 = vmul.f32 -1.442695, %v10078_v7  ;;  %v10094_v48 = vadd.f32 %v10056_v56, %v9441_v0  ;;  %v10106_v0 = vadd.f32 %v10056_v56, %v9453_v57 }
 0x273   : > { %v4453_v51 = vpop.permute.xlu0 %4452  ;;  %v7448_v21 = vpop.eup %7447  ;;  %v5285_v28 = vmul.f32 %v4699_v24, %v11572_v27  ;;  %7471 = vpow2.f32 %v6035_v4 }
 0x274   : > { %v5162_v25 = vmul.f32 %v4453_v51, %v11573_v3  ;;  %v7450_v31 = vpop.eup %7449  ;;  %4764 = vrot.lane.b32.xlu0 %v7448_v21, %s7776_s27  ;;  %7473 = vpow2.f32 %v6164_v58  ;;  %11574 = vst [vmem:[#allocation22_spill] sm:$0xff] %v10094_v48  ;;  %v3400_v21 = vadd.f32 1.0, %v7436_v1  ;;  %v11575_v3 = vld [vmem:[#allocation74_spill] sm:$0xff]  ;;  %v3401_v58 = vadd.f32 1.0, %v7438_v34  ;;  %11577 = vst [vmem:[#allocation63_spill] sm:$0xff] %v10106_v0 }
 0x275   : > { %v7452_v36 = vpop.eup %7451  ;;  %5542 = vst.msk [vmem:[%s8740_s6 + $0x5a8] sm:$0xff] %vm5360_vm1, %v5285_v28  ;;  %7475 = vpow2.f32 %v6162_v54  ;;  %v11576_v28 = vld [vmem:[#allocation33_spill] sm:$0xff]  ;;  %v10118_v54 = vadd.f32 %v10056_v56, %v9458_v15 }
 0x276   : > { %5419 = vst.msk [vmem:[%s8740_s6 + $0x1d0] sm:$0xff] %vm5360_vm1, %v5162_v25  ;;  %v7454_v24 = vpop.eup %7453  ;;  %v4455_v51 = vpop.permute.xlu1 %4454  ;;  %7477 = vpow2.f32 %v6165_v44  ;;  %4766 = vrot.lane.b32.xlu1 %v7452_v36, %s7776_s27  ;;  %v3528_v44 = vadd.f32 1.0, %v10049_v33  ;;  %v6038_v33 = vmul.f32 -1.442695, %v10106_v0 }
 0x277   : > { %v4709_v27 = vpop.permute.xlu0 %4708  ;;  %v7456_v60 = vpop.eup %7455  ;;  %v5163_v11 = vmul.f32 %v4455_v51, %v11575_v3  ;;  %7479 = vpow2.f32 %v6163_v35  ;;  %11578 = vst [vmem:[#allocation66_spill] sm:$0xff] %v10118_v54  ;;  %v11580_v35 = vld [vmem:[#allocation31_spill] sm:$0xff] }
 0x278   : > { %v5290_v4 = vmul.f32 %v4709_v27, %v11576_v28  ;;  %v10098_v25 = vpop.f32.mrb[124].mxu0  ;;  %v10100_v7 = vpop.eup %7457  ;;  %4504 = vrot.lane.b32.xlu0 %v7442_v40, %s7776_s27  ;;  %v6040_v27 = vmul.f32 -1.442695, %v10094_v48  ;;  %7481 = vrcp.f32 %v3400_v21  ;;  %v6041_v21 = vmul.f32 -1.442695, %v10118_v54 }
 0x279   : > { %v10108_v1 = vpop.f32.mrb[125].mxu0  ;;  %v10110_v51 = vpop.eup %7459  ;;  %5420 = vst.msk [vmem:[%s8740_s6 + $0x1d8] sm:$0xff] %vm5360_vm1, %v5163_v11  ;;  %7483 = vrcp.f32 %v3401_v58 }
 0x27a   : > { %5547 = vst.msk [vmem:[%s8740_s6 + $0x5d0] sm:$0xff] %vm5360_vm1, %v5290_v4  ;;  %v10120_v34 = vpop.f32.mrb[126].mxu0  ;;  %v7462_v40 = vpop.eup %7461  ;;  %v11581_v4 = vld [vmem:[#allocation69_spill] sm:$0xff]  ;;  %4506 = vrot.lane.b32.xlu1 %v7446_v30, %s7776_s27 }
 0x27b   : > { %11579 = vst [vmem:[#allocation26_spill] sm:$0xff] %v10120_v34  ;;  %v4711_v57 = vpop.permute.xlu1 %4710  ;;  %v4449_v36 = vpop.permute.xlu0 %4448  ;;  %v3531_v11 = vadd.f32 1.0, %v7462_v40 }
 0x27c   : > { %v7464_v3 = vpop.eup %7463  ;;  %v5291_v28 = vmul.f32 %v4711_v57, %v11580_v35  ;;  %v5160_v13 = vmul.f32 %v4449_v36, %v11581_v4  ;;  %v10126_v15 = vpop.f32.mrb[127].mxu0  ;;  %4760 = vrot.lane.b32.xlu0 %v7450_v31, %s7776_s27  ;;  %v11583_v4 = vld [vmem:[#allocation29_spill] sm:$0xff] }
 0x27d   : > { %v7466_v59 = vpop.eup %7465  ;;  %7485 = vrcp.f32 %v3531_v11  ;;  %v10136_v40 = vpop.f32.mrb[124].mxu1  ;;  %v3529_v36 = vadd.f32 1.0, %v7464_v3  ;;  %v11584_v11 = vld [vmem:[#allocation32_spill] sm:$0xff] }
 0x27e   : > { %v7468_v34 = vpop.eup %7467  ;;  %5548 = vst.msk [vmem:[%s8740_s6 + $0x5d8] sm:$0xff] %vm5360_vm1, %v5291_v28  ;;  %5417 = vst.msk [vmem:[%s8740_s6 + $0x1c0] sm:$0xff] %vm5360_vm1, %v5160_v13  ;;  %7487 = vrcp.f32 %v3528_v44  ;;  %v3406_v35 = vadd.f32 1.0, %v7466_v59  ;;  %v10140_v48 = vpop.f32.mrb[125].mxu1  ;;  %4762 = vrot.lane.b32.xlu1 %v7454_v24, %s7776_s27  ;;  %v10154_v24 = vadd.f32 %v10056_v56, %v9470_v55 }
 0x27f   : > { %11582 = vst [vmem:[#allocation74_spill] sm:$0xff] %v10136_v40  ;;  %v7470_v57 = vpop.eup %7469  ;;  %v4451_v58 = vpop.permute.xlu1 %4450  ;;  %7489 = vpow2.f32 %v6040_v27  ;;  %v3404_v54 = vadd.f32 1.0, %v7468_v34 }
 0x280   : > { %v4705_v30 = vpop.permute.xlu0 %4704  ;;  %v7472_v31 = vpop.eup %7471  ;;  %v5161_v0 = vmul.f32 %v4451_v58, %v11583_v4  ;;  %7491 = vpow2.f32 %v6038_v33  ;;  %4516 = vrot.lane.b32.xlu0 %v7456_v60, %s7776_s27  ;;  %v3407_v40 = vadd.f32 1.0, %v7470_v57  ;;  %v11586_v4 = vld [vmem:[#allocation34_spill] sm:$0xff] }
 0x281   : > { %v5288_v28 = vmul.f32 %v4705_v30, %v11584_v11  ;;  %v7474_v13 = vpop.eup %7473  ;;  %v10144_v44 = vpop.f32.mrb[126].mxu1  ;;  %7493 = vpow2.f32 %v6041_v21  ;;  %v3405_v58 = vadd.f32 1.0, %v7472_v31 }
 0x282   : > { %v7476_v3 = vpop.eup %7475  ;;  %5418 = vst.msk [vmem:[%s8740_s6 + $0x1c8] sm:$0xff] %vm5360_vm1, %v5161_v0  ;;  %v10150_v59 = vpop.f32.mrb[127].mxu1  ;;  %7495 = vrcp.f32 %v3529_v36  ;;  %v3534_v57 = vadd.f32 1.0, %v7474_v13  ;;  %v11585_v0 = vld [vmem:[#allocation35_spill] sm:$0xff]  ;;  %4518 = vrot.lane.b32.xlu1 %v10100_v7, %s7776_s27  ;;  %v10162_v36 = vadd.f32 %v10056_v56, %v9466_v63  ;;  %v11587_v63 = vld [vmem:[#allocation72_spill] sm:$0xff] }
 0x283   : > { %5545 = vst.msk [vmem:[%s8740_s6 + $0x5c0] sm:$0xff] %vm5360_vm1, %v5288_v28  ;;  %v7478_v27 = vpop.eup %7477  ;;  %v4707_v34 = vpop.permute.xlu1 %4706  ;;  %7497 = vrcp.f32 %v3406_v35  ;;  %v3532_v11 = vadd.f32 1.0, %v7476_v3  ;;  %v10176_v13 = vadd.f32 %v10056_v56, %v11587_v63 }
 0x284   : > { %v4461_v60 = vpop.permute.xlu0 %4460  ;;  %v7480_v33 = vpop.eup %7479  ;;  %v5289_v30 = vmul.f32 %v4707_v34, %v11585_v0  ;;  %7499 = vrcp.f32 %v3404_v54  ;;  %4772 = vrot.lane.b32.xlu0 %v10110_v51, %s7776_s27  ;;  %v3535_v31 = vadd.f32 1.0, %v7478_v27  ;;  %v10172_v54 = vadd.f32 %v10056_v56, %v9487_v46  ;;  %v11588_v27 = vld [vmem:[#allocation76_spill] sm:$0xff] }
 0x285   : > { %v5166_v21 = vmul.f32 %v4461_v60, %v11586_v4  ;;  %v7482_v55 = vpop.eup %7481  ;;  %7501 = vrcp.f32 %v3407_v40  ;;  %v3533_v7 = vadd.f32 1.0, %v7480_v33  ;;  %v10180_v51 = vadd.f32 %v10056_v56, %v9497_v19 }
 0x286   : > { %5546 = vst.msk [vmem:[%s8740_s6 + $0x5c8] sm:$0xff] %vm5360_vm1, %v5289_v30  ;;  %v7484_v35 = vpop.eup %7483  ;;  %7503 = vrcp.f32 %v3405_v58  ;;  %v6168_v46 = vmul.f32 -1.442695, %v10154_v24  ;;  %v11589_v58 = vld [vmem:[#allocation44_spill] sm:$0xff]  ;;  %v6039_v0 = vmul.f32 -1.442695, %v10162_v36  ;;  %v10190_v19 = vadd.f32 %v10056_v56, %v9524_v45 }
 0x287   : > { %5423 = vst.msk [vmem:[%s8740_s6 + $0x1f0] sm:$0xff] %vm5360_vm1, %v5166_v21  ;;  %v4463_v28 = vpop.permute.xlu1 %4462  ;;  %v7486_v3 = vpop.eup %7485  ;;  %7505 = vrcp.f32 %v3534_v57  ;;  %v6169_v57 = vmul.f32 -1.442695, %v10172_v54  ;;  %v10199_v4 = vadd.f32 %v10056_v56, %v9527_v41  ;;  %v6167_v63 = vmul.f32 -1.442695, %v10180_v51  ;;  %v11592_v41 = vld [vmem:[#allocation37_spill] sm:$0xff] }
 0x288   : > { %v4717_v40 = vpop.permute.xlu0 %4716  ;;  %v5167_v34 = vmul.f32 %v4463_v28, %v11588_v27  ;;  %v7488_v33 = vpop.eup %7487  ;;  %7507 = vrcp.f32 %v3532_v11  ;;  %4774 = vrot.lane.b32.xlu1 %v7486_v3, %s7776_s27  ;;  %4512 = vrot.lane.b32.xlu0 %v7482_v55, %s7776_s27  ;;  %v6166_v11 = vmul.f32 -1.442695, %v10176_v13 }
 0x289   : > { %v5294_v60 = vmul.f32 %v4717_v40, %v11589_v58  ;;  %v7490_v30 = vpop.eup %7489  ;;  %7509 = vrcp.f32 %v3535_v31  ;;  %11590 = vst [vmem:[#allocation33_spill] sm:$0xff] %v10199_v4  ;;  %v10204_v31 = vadd.f32 %v10056_v56, %v9534_v17  ;;  %v11591_v40 = vld [vmem:[#allocation41_spill] sm:$0xff]  ;;  %v10214_v17 = vadd.f32 %v10056_v56, %v9550_v61 }
 0x28a   : > { %5424 = vst.msk [vmem:[%s8740_s6 + $0x1f8] sm:$0xff] %vm5360_vm1, %v5167_v34  ;;  %v7492_v21 = vpop.eup %7491  ;;  %7511 = vrcp.f32 %v3533_v7  ;;  %v6044_v7 = vmul.f32 -1.442695, %v10190_v19 }
 0x28b   : > { %5551 = vst.msk [vmem:[%s8740_s6 + $0x5f0] sm:$0xff] %vm5360_vm1, %v5294_v60  ;;  %v4719_v55 = vpop.permute.xlu1 %4718  ;;  %v7494_v28 = vpop.eup %7493  ;;  %7513 = vpow2.f32 %v6168_v46  ;;  %v6042_v46 = vmul.f32 -1.442695, %v10199_v4  ;;  %v10223_v60 = vadd.f32 %v10056_v56, %v9569_v29  ;;  %v6045_v61 = vmul.f32 -1.442695, %v10204_v31 }
 0x28c   : > { %v4457_v45 = vpop.permute.xlu0 %4456  ;;  %v5295_v3 = vmul.f32 %v4719_v55, %v11591_v40  ;;  %v7496_v34 = vpop.eup %7495  ;;  %7515 = vpow2.f32 %v6039_v0  ;;  %4514 = vrot.lane.b32.xlu1 %v7484_v35, %s7776_s27  ;;  %4768 = vrot.lane.b32.xlu0 %v7488_v33, %s7776_s27  ;;  %v6172_v29 = vmul.f32 -1.442695, %v10214_v17 }
 0x28d   : > { %v5164_v27 = vmul.f32 %v4457_v45, %v11592_v41  ;;  %v7498_v58 = vpop.eup %7497  ;;  %7517 = vpow2.f32 %v6169_v57  ;;  %v3410_v57 = vadd.f32 1.0, %v7490_v30  ;;  %v11593_v45 = vld [vmem:[#allocation79_spill] sm:$0xff]  ;;  %v6173_v30 = vmul.f32 -1.442695, %v10223_v60 }
 0x28e   : > { %5552 = vst.msk [vmem:[%s8740_s6 + $0x5f8] sm:$0xff] %vm5360_vm1, %v5295_v3  ;;  %v7500_v35 = vpop.eup %7499  ;;  %7519 = vpow2.f32 %v6166_v11  ;;  %v11594_v3 = vld [vmem:[#allocation82_spill] sm:$0xff] }
 0x28f   : > { %5421 = vst.msk [vmem:[%s8740_s6 + $0x1e0] sm:$0xff] %vm5360_vm1, %v5164_v27  ;;  %v4459_v33 = vpop.permute.xlu1 %4458  ;;  %v7502_v55 = vpop.eup %7501  ;;  %7521 = vpow2.f32 %v6167_v63 }
 0x290   : > { %v4713_v0 = vpop.permute.xlu0 %4712  ;;  %v5165_v40 = vmul.f32 %v4459_v33, %v11593_v45  ;;  %v10228_v27 = vpop.eup %7503  ;;  %4770 = vrot.lane.b32.xlu1 %v7496_v34, %s7776_s27  ;;  %7523 = vpow2.f32 %v6044_v7  ;;  %4524 = vrot.lane.b32.xlu0 %v7498_v58, %s7776_s27  ;;  %v10240_v34 = vadd.f32 %v10056_v56, %v9538_v53  ;;  %v10244_v58 = vadd.f32 %v10056_v56, %v9557_v16 }
 0x291   : > { %v5292_v41 = vmul.f32 %v4713_v0, %v11594_v3  ;;  %v7506_v11 = vpop.eup %7505  ;;  %7525 = vpow2.f32 %v6042_v46  ;;  %v3408_v45 = vadd.f32 1.0, %v7492_v21  ;;  %v11596_v46 = vld [vmem:[#allocation83_spill] sm:$0xff]  ;;  %v11597_v3 = vld [vmem:[#allocation38_spill] sm:$0xff]  ;;  %v10252_v53 = vadd.f32 %v10056_v56, %v9577_v50 }
 0x292   : > { %5422 = vst.msk [vmem:[%s8740_s6 + $0x1e8] sm:$0xff] %vm5360_vm1, %v5165_v40  ;;  %v7508_v63 = vpop.eup %7507  ;;  %7527 = vpow2.f32 %v6045_v61  ;;  %11595 = vst [vmem:[#allocation31_spill] sm:$0xff] %v10244_v58  ;;  %v3411_v61 = vadd.f32 1.0, %v7494_v28  ;;  %v6170_v50 = vmul.f32 -1.442695, %v10244_v58 }
 0x293   : > { %5549 = vst.msk [vmem:[%s8740_s6 + $0x5e0] sm:$0xff] %vm5360_vm1, %v5292_v41  ;;  %v4715_v33 = vpop.permute.xlu1 %4714  ;;  %v7510_v0 = vpop.eup %7509  ;;  %7529 = vrcp.f32 %v3410_v57  ;;  %11598 = vst [vmem:[#allocation69_spill] sm:$0xff] %v10252_v53 }
 0x294   : > { %v4469_v7 = vpop.permute.xlu0 %4468  ;;  %v5293_v40 = vmul.f32 %v4715_v33, %v11596_v46  ;;  %v7512_v4 = vpop.eup %7511  ;;  %4526 = vrot.lane.b32.xlu1 %v7502_v55, %s7776_s27  ;;  %7531 = vpow2.f32 %v6172_v29  ;;  %4780 = vrot.lane.b32.xlu0 %v7506_v11, %s7776_s27  ;;  %v6043_v33 = vmul.f32 -1.442695, %v10240_v34  ;;  %v11599_v11 = vld [vmem:[#allocation59_spill] sm:$0xff]  ;;  %v11600_v46 = vld [vmem:[#allocation50_spill] sm:$0xff] }
 0x295   : > { %v5170_v41 = vmul.f32 %v4469_v7, %v11597_v3  ;;  %v7514_v16 = vpop.eup %7513  ;;  %7533 = vpow2.f32 %v6173_v30  ;;  %v6171_v30 = vmul.f32 -1.442695, %v10252_v53 }
 0x296   : > { %5550 = vst.msk [vmem:[%s8740_s6 + $0x5e8] sm:$0xff] %vm5360_vm1, %v5293_v40  ;;  %v7516_v21 = vpop.eup %7515  ;;  %v3538_v57 = vadd.f32 1.0, %v7514_v16  ;;  %7535 = vrcp.f32 %v3408_v45 }
 0x297   : > { %5427 = vst.msk [vmem:[%s8740_s6 + $0x210] sm:$0xff] %vm5360_vm1, %v5170_v41  ;;  %v4471_v28 = vpop.permute.xlu1 %4470  ;;  %v7518_v29 = vpop.eup %7517  ;;  %7537 = vrcp.f32 %v3411_v61 }
 0x298   : > { %v4725_v55 = vpop.permute.xlu0 %4724  ;;  %v5171_v7 = vmul.f32 %v4471_v28, %v11599_v11  ;;  %v7520_v40 = vpop.eup %7519  ;;  %4782 = vrot.lane.b32.xlu1 %v7510_v0, %s7776_s27  ;;  %4520 = vrot.lane.b32.xlu0 %v7500_v35, %s7776_s27  ;;  %7539 = vrcp.f32 %v3538_v57  ;;  %v3539_v16 = vadd.f32 1.0, %v7518_v29  ;;  %v3409_v28 = vadd.f32 1.0, %v7516_v21  ;;  %v11602_v35 = vld [vmem:[#allocation49_spill] sm:$0xff] }
 0x299   : > { %v5298_v3 = vmul.f32 %v4725_v55, %v11600_v46  ;;  %v7522_v41 = vpop.eup %7521  ;;  %7541 = vpow2.f32 %v6043_v33  ;;  %v3536_v0 = vadd.f32 1.0, %v7520_v40  ;;  %v11601_v46 = vld [vmem:[#allocation60_spill] sm:$0xff]  ;;  %v10276_v21 = vadd.f32 %v10056_v56, %v9635_v14 }
 0x29a   : > { %5428 = vst.msk [vmem:[%s8740_s6 + $0x218] sm:$0xff] %vm5360_vm1, %v5171_v7  ;;  %v7524_v45 = vpop.eup %7523  ;;  %7543 = vpow2.f32 %v6170_v50  ;;  %v3537_v29 = vadd.f32 1.0, %v7522_v41  ;;  %v11603_v41 = vld [vmem:[#allocation61_spill] sm:$0xff] }
 0x29b   : > { %5555 = vst.msk [vmem:[%s8740_s6 + $0x610] sm:$0xff] %vm5360_vm1, %v5298_v3  ;;  %v4727_v11 = vpop.permute.xlu1 %4726  ;;  %v7526_v61 = vpop.eup %7525  ;;  %7545 = vpow2.f32 %v6171_v30  ;;  %v3414_v7 = vadd.f32 1.0, %v7524_v45  ;;  %v11604_v45 = vld [vmem:[#allocation53_spill] sm:$0xff] }
 0x29c   : > { %v4465_v55 = vpop.permute.xlu0 %4464  ;;  %v5299_v53 = vmul.f32 %v4727_v11, %v11601_v46  ;;  %v7528_v57 = vpop.eup %7527  ;;  %4522 = vrot.lane.b32.xlu1 %v10228_v27, %s7776_s27  ;;  %4776 = vrot.lane.b32.xlu0 %v7508_v63, %s7776_s27  ;;  %7547 = vrcp.f32 %v3539_v16  ;;  %v3412_v3 = vadd.f32 1.0, %v7526_v61  ;;  %v10284_v27 = vadd.f32 %v10056_v56, %v9655_v52 }
 0x29d   : > { %v5168_v58 = vmul.f32 %v4465_v55, %v11602_v35  ;;  %v7530_v33 = vpop.eup %7529  ;;  %7549 = vrcp.f32 %v3409_v28  ;;  %v3415_v63 = vadd.f32 1.0, %v7528_v57  ;;  %v10293_v28 = vadd.f32 %v10056_v56, %v9662_v26  ;;  %v11605_v35 = vld [vmem:[#allocation93_spill] sm:$0xff] }
 0x29e   : > { %5556 = vst.msk [vmem:[%s8740_s6 + $0x618] sm:$0xff] %vm5360_vm1, %v5299_v53  ;;  %v7532_v50 = vpop.eup %7531  ;;  %7551 = vrcp.f32 %v3536_v0  ;;  %v10301_v55 = vadd.f32 %v10056_v56, %v9645_v39  ;;  %v6049_v46 = vmul.f32 -1.442695, %v10284_v27  ;;  %v10306_v26 = vadd.f32 %v10056_v56, %v11605_v35 }
 0x29f   : > { %5425 = vst.msk [vmem:[%s8740_s6 + $0x200] sm:$0xff] %vm5360_vm1, %v5168_v58  ;;  %v4467_v40 = vpop.permute.xlu1 %4466  ;;  %v7534_v14 = vpop.eup %7533  ;;  %7553 = vrcp.f32 %v3537_v29  ;;  %v6048_v58 = vmul.f32 -1.442695, %v10276_v21  ;;  %v3542_v11 = vadd.f32 1.0, %v7532_v50  ;;  %v11607_v50 = vld [vmem:[#allocation64_spill] sm:$0xff] }
 0x2a0   : > { %v4721_v30 = vpop.permute.xlu0 %4720  ;;  %v5169_v16 = vmul.f32 %v4467_v40, %v11603_v41  ;;  %4778 = vrot.lane.b32.xlu1 %v7512_v4, %s7776_s27  ;;  %4532 = vrot.lane.b32.xlu0 %v7530_v33, %s7776_s27  ;;  %v7536_v52 = vpop.eup %7535  ;;  %7555 = vrcp.f32 %v3414_v7  ;;  %v3543_v61 = vadd.f32 1.0, %v7534_v14  ;;  %v11606_v33 = vld [vmem:[#allocation62_spill] sm:$0xff]  ;;  %v11608_v40 = vld [vmem:[#allocation13_spill] sm:$0xff]  ;;  %v6176_v14 = vmul.f32 -1.442695, %v10293_v28 }
 0x2a1   : > { %v5296_v53 = vmul.f32 %v4721_v30, %v11604_v45  ;;  %v7538_v4 = vpop.eup %7537  ;;  %7557 = vrcp.f32 %v3412_v3  ;;  %v10312_v3 = vadd.f32 %v10056_v56, %v11608_v40  ;;  %v10318_v41 = vadd.f32 %v10056_v56, %v9674_v12 }
 0x2a2   : > { %5426 = vst.msk [vmem:[%s8740_s6 + $0x208] sm:$0xff] %vm5360_vm1, %v5169_v16  ;;  %v7540_v29 = vpop.eup %7539  ;;  %7559 = vrcp.f32 %v3415_v63  ;;  %v6046_v16 = vmul.f32 -1.442695, %v10301_v55  ;;  %v10328_v45 = vadd.f32 %v10056_v56, %v9678_v5 }
 0x2a3   : > { %5553 = vst.msk [vmem:[%s8740_s6 + $0x600] sm:$0xff] %vm5360_vm1, %v5296_v53  ;;  %v4723_v0 = vpop.permute.xlu1 %4722  ;;  %v7542_v30 = vpop.eup %7541  ;;  %7561 = vpow2.f32 %v6048_v58  ;;  %v6047_v58 = vmul.f32 -1.442695, %v10306_v26  ;;  %v6177_v5 = vmul.f32 -1.442695, %v10318_v41 }
 0x2a4   : > { %v4477_v57 = vpop.permute.xlu0 %4476  ;;  %v5297_v7 = vmul.f32 %v4723_v0, %v11606_v33  ;;  %4534 = vrot.lane.b32.xlu1 %v7538_v4, %s7776_s27  ;;  %4788 = vrot.lane.b32.xlu0 %v7540_v29, %s7776_s27  ;;  %v7544_v63 = vpop.eup %7543  ;;  %7563 = vrcp.f32 %v3542_v11  ;;  %11609 = vst [vmem:[#allocation29_spill] sm:$0xff] %v10328_v45  ;;  %v11610_v11 = vld [vmem:[#allocation98_spill] sm:$0xff]  ;;  %v11611_v29 = vld [vmem:[#allocation67_spill] sm:$0xff] }
 0x2a5   : > { %v5174_v39 = vmul.f32 %v4477_v57, %v11607_v50  ;;  %v7546_v53 = vpop.eup %7545  ;;  %7565 = vrcp.f32 %v3543_v61  ;;  %v6174_v57 = vmul.f32 -1.442695, %v10312_v3  ;;  %v10339_v61 = vadd.f32 %v10056_v56, %v9712_v47 }
 0x2a6   : > { %5554 = vst.msk [vmem:[%s8740_s6 + $0x608] sm:$0xff] %vm5360_vm1, %v5297_v7  ;;  %v7548_v0 = vpop.eup %7547  ;;  %7567 = vpow2.f32 %v6049_v46  ;;  %v6175_v46 = vmul.f32 -1.442695, %v10328_v45 }
 0x2a7   : > { %5431 = vst.msk [vmem:[%s8740_s6 + $0x230] sm:$0xff] %vm5360_vm1, %v5174_v39  ;;  %v4479_v12 = vpop.permute.xlu1 %4478  ;;  %v7550_v7 = vpop.eup %7549  ;;  %7569 = vpow2.f32 %v6176_v14  ;;  %11612 = vst [vmem:[#allocation32_spill] sm:$0xff] %v10339_v61  ;;  %v10348_v39 = vadd.f32 %v10056_v56, %v9722_v62  ;;  %v3413_v14 = vadd.f32 1.0, %v7542_v30  ;;  %v6052_v62 = vmul.f32 -1.442695, %v10339_v61  ;;  %v11616_v30 = vld [vmem:[#allocation12_spill] sm:$0xff] }
 0x2a8   : > { %v4733_v4 = vpop.permute.xlu0 %4732  ;;  %v5175_v35 = vmul.f32 %v4479_v12, %v11610_v11  ;;  %4790 = vrot.lane.b32.xlu1 %v7548_v0, %s7776_s27  ;;  %4528 = vrot.lane.b32.xlu0 %v7536_v52, %s7776_s27  ;;  %v7552_v50 = vpop.eup %7551  ;;  %7571 = vpow2.f32 %v6046_v16  ;;  %v11614_v16 = vld [vmem:[#allocation70_spill] sm:$0xff]  ;;  %v11615_v11 = vld [vmem:[#allocation96_spill] sm:$0xff] }
 0x2a9   : > { %v5302_v33 = vmul.f32 %v4733_v4, %v11611_v29  ;;  %11613 = vst [vmem:[#allocation35_spill] sm:$0xff] %v10348_v39  ;;  %v7554_v40 = vpop.eup %7553  ;;  %7573 = vpow2.f32 %v6047_v58  ;;  %v3540_v4 = vadd.f32 1.0, %v7544_v63  ;;  %v10359_v58 = vadd.f32 %v10056_v56, %v11616_v30  ;;  %v11621_v30 = vld [vmem:[#allocation65_spill] sm:$0xff] }
 0x2aa   : > { %5432 = vst.msk [vmem:[%s8740_s6 + $0x238] sm:$0xff] %vm5360_vm1, %v5175_v35  ;;  %v7556_v12 = vpop.eup %7555  ;;  %7575 = vpow2.f32 %v6174_v57  ;;  %v6050_v63 = vmul.f32 -1.442695, %v10348_v39 }
 0x2ab   : > { %5559 = vst.msk [vmem:[%s8740_s6 + $0x630] sm:$0xff] %vm5360_vm1, %v5302_v33  ;;  %v4735_v52 = vpop.permute.xlu1 %4734  ;;  %v10352_v29 = vpop.eup %7557  ;;  %7577 = vpow2.f32 %v6177_v5  ;;  %v6053_v61 = vmul.f32 -1.442695, %v10359_v58 }
 0x2ac   : > { %v4473_v47 = vpop.permute.xlu0 %4472  ;;  %v5303_v0 = vmul.f32 %v4735_v52, %v11614_v16  ;;  %4530 = vrot.lane.b32.xlu1 %v7550_v7, %s7776_s27  ;;  %4784 = vrot.lane.b32.xlu0 %v7552_v50, %s7776_s27  ;;  %v7560_v33 = vpop.eup %7559  ;;  %7579 = vpow2.f32 %v6175_v46  ;;  %v11617_v50 = vld [vmem:[#allocation2_spill] sm:$0xff] }
 0x2ad   : > { %v5172_v35 = vmul.f32 %v4473_v47, %v11615_v11  ;;  %v7562_v57 = vpop.eup %7561  ;;  %7581 = vrcp.f32 %v3413_v14  ;;  %v10368_v52 = vadd.f32 %v10056_v56, %v11617_v50  ;;  %v11619_v47 = vld [vmem:[#allocation40_spill] sm:$0xff]  ;;  %v11620_v11 = vld [vmem:[#allocation73_spill] sm:$0xff] }
 0x2ae   : > { %5560 = vst.msk [vmem:[%s8740_s6 + $0x638] sm:$0xff] %vm5360_vm1, %v5303_v0  ;;  %v10372_v16 = vadd.f32 %v10056_v56, %v11619_v47  ;;  %v7564_v46 = vpop.eup %7563  ;;  %7583 = vrcp.f32 %v3540_v4  ;;  %v3541_v0 = vadd.f32 1.0, %v7546_v53  ;;  %v3418_v45 = vadd.f32 1.0, %v7562_v57 }
 0x2af   : > { %5429 = vst.msk [vmem:[%s8740_s6 + $0x220] sm:$0xff] %vm5360_vm1, %v5172_v35  ;;  %v4475_v5 = vpop.permute.xlu1 %4474  ;;  %11618 = vst [vmem:[#allocation34_spill] sm:$0xff] %v10368_v52  ;;  %v7566_v14 = vpop.eup %7565  ;;  %7585 = vpow2.f32 %v6052_v62  ;;  %v11622_v62 = vld [vmem:[#allocation78_spill] sm:$0xff] }
 0x2b0   : > { %v4729_v7 = vpop.permute.xlu0 %4728  ;;  %v5173_v35 = vmul.f32 %v4475_v5, %v11620_v11  ;;  %4786 = vrot.lane.b32.xlu1 %v7554_v40, %s7776_s27  ;;  %4540 = vrot.lane.b32.xlu0 %v7556_v12, %s7776_s27  ;;  %v7568_v50 = vpop.eup %7567  ;;  %7587 = vpow2.f32 %v6050_v63  ;;  %v6051_v5 = vmul.f32 -1.442695, %v10368_v52  ;;  %v6180_v12 = vmul.f32 -1.442695, %v10372_v16  ;;  %v11623_v11 = vld [vmem:[#allocation80_spill] sm:$0xff]  ;;  %v11624_v52 = vld [vmem:[#allocation42_spill] sm:$0xff] }
 0x2b1   : > { %v5300_v39 = vmul.f32 %v4729_v7, %v11621_v30  ;;  %v7570_v53 = vpop.eup %7569  ;;  %7589 = vrcp.f32 %v3541_v0 }
 0x2b2   : > { %5430 = vst.msk [vmem:[%s8740_s6 + $0x228] sm:$0xff] %vm5360_vm1, %v5173_v35  ;;  %v7572_v40 = vpop.eup %7571  ;;  %v3419_v35 = vadd.f32 1.0, %v7568_v50  ;;  %7591 = vpow2.f32 %v6053_v61  ;;  %v3546_v63 = vadd.f32 1.0, %v7570_v53  ;;  %v11626_v53 = vld [vmem:[#allocation89_spill] sm:$0xff] }
 0x2b3   : > { %5557 = vst.msk [vmem:[%s8740_s6 + $0x620] sm:$0xff] %vm5360_vm1, %v5300_v39  ;;  %v4731_v4 = vpop.permute.xlu1 %4730  ;;  %v7574_v30 = vpop.eup %7573  ;;  %7593 = vrcp.f32 %v3418_v45  ;;  %v11625_v45 = vld [vmem:[#allocation85_spill] sm:$0xff] }
 0x2b4   : > { %v4485_v7 = vpop.permute.xlu0 %4484  ;;  %v5301_v47 = vmul.f32 %v4731_v4, %v11622_v62  ;;  %4542 = vrot.lane.b32.xlu1 %v7560_v33, %s7776_s27  ;;  %4796 = vrot.lane.b32.xlu0 %v7564_v46, %s7776_s27  ;;  %v7576_v39 = vpop.eup %7575  ;;  %v3416_v4 = vadd.f32 1.0, %v7572_v40  ;;  %7595 = vpow2.f32 %v6051_v5  ;;  %v3417_v46 = vadd.f32 1.0, %v7574_v30  ;;  %v11627_v40 = vld [vmem:[#allocation43_spill] sm:$0xff] }
 0x2b5   : > { %v5178_v57 = vmul.f32 %v4485_v7, %v11623_v11  ;;  %v7578_v0 = vpop.eup %7577  ;;  %v10395_v7 = vadd.f32 %v10056_v56, %v11624_v52  ;;  %7597 = vpow2.f32 %v6180_v12  ;;  %v10401_v5 = vadd.f32 %v10056_v56, %v11627_v40 }
 0x2b6   : > { %5558 = vst.msk [vmem:[%s8740_s6 + $0x628] sm:$0xff] %vm5360_vm1, %v5301_v47  ;;  %v7580_v33 = vpop.eup %7579  ;;  %7599 = vrcp.f32 %v3419_v35  ;;  %v3547_v30 = vadd.f32 1.0, %v7578_v0 }
 0x2b7   : > { %5435 = vst.msk [vmem:[%s8740_s6 + $0x250] sm:$0xff] %vm5360_vm1, %v5178_v57  ;;  %v4487_v62 = vpop.permute.xlu1 %4486  ;;  %v7582_v11 = vpop.eup %7581  ;;  %v3544_v57 = vadd.f32 1.0, %v7576_v39  ;;  %7601 = vrcp.f32 %v3546_v63  ;;  %v3545_v35 = vadd.f32 1.0, %v7580_v33  ;;  %v6181_v39 = vmul.f32 -1.442695, %v10395_v7  ;;  %v11630_v63 = vld [vmem:[#allocation86_spill] sm:$0xff] }
 0x2b8   : > { %v4741_v61 = vpop.permute.xlu0 %4740  ;;  %v5179_v50 = vmul.f32 %v4487_v62, %v11625_v45  ;;  %4798 = vrot.lane.b32.xlu1 %v7566_v14, %s7776_s27  ;;  %4536 = vrot.lane.b32.xlu0 %v10352_v29, %s7776_s27  ;;  %v7584_v52 = vpop.eup %7583  ;;  %7603 = vrcp.f32 %v3416_v4  ;;  %v11628_v45 = vld [vmem:[#allocation47_spill] sm:$0xff]  ;;  %v6178_v4 = vmul.f32 -1.442695, %v10401_v5  ;;  %v10422_v33 = vadd.f32 %v10056_v56, %v9815_v8 }
 0x2b9   : > { %v5306_v47 = vmul.f32 %v4741_v61, %v11626_v53  ;;  %v7586_v12 = vpop.eup %7585  ;;  %7605 = vrcp.f32 %v3417_v46  ;;  %v10413_v29 = vadd.f32 %v10056_v56, %v11628_v45  ;;  %v10434_v8 = vadd.f32 %v10056_v56, %v9826_v23 }
 0x2ba   : > { %5436 = vst.msk [vmem:[%s8740_s6 + $0x258] sm:$0xff] %vm5360_vm1, %v5179_v50  ;;  %v7588_v14 = vpop.eup %7587  ;;  %v11631_v50 = vld [vmem:[#allocation81_spill] sm:$0xff]  ;;  %7607 = vrcp.f32 %v3544_v57  ;;  %11632 = vst [vmem:[#allocation76_spill] sm:$0xff] %v10422_v33  ;;  %v10430_v57 = vadd.f32 %v10056_v56, %v9820_v6  ;;  %v10444_v23 = vadd.f32 %v10056_v56, %v9832_v49 }
 0x2bb   : > { %5563 = vst.msk [vmem:[%s8740_s6 + $0x650] sm:$0xff] %vm5360_vm1, %v5306_v47  ;;  %v4743_v62 = vpop.permute.xlu1 %4742  ;;  %11629 = vst [vmem:[#allocation72_spill] sm:$0xff] %v10413_v29  ;;  %v7590_v46 = vpop.eup %7589  ;;  %7609 = vrcp.f32 %v3547_v30  ;;  %v3422_v47 = vadd.f32 1.0, %v7586_v12  ;;  %v6179_v12 = vmul.f32 -1.442695, %v10413_v29 }
 0x2bc   : > { %v4481_v61 = vpop.permute.xlu0 %4480  ;;  %v5307_v0 = vmul.f32 %v4743_v62, %v11630_v63  ;;  %4538 = vrot.lane.b32.xlu1 %v7582_v11, %s7776_s27  ;;  %4792 = vrot.lane.b32.xlu0 %v7584_v52, %s7776_s27  ;;  %11633 = vst [vmem:[#allocation44_spill] sm:$0xff] %v10430_v57  ;;  %v7592_v40 = vpop.eup %7591  ;;  %7611 = vrcp.f32 %v3545_v35  ;;  %v3420_v11 = vadd.f32 1.0, %v7588_v14  ;;  %11634 = vst [vmem:[#allocation41_spill] sm:$0xff] %v10434_v8  ;;  %v11636_v63 = vld [vmem:[#allocation84_spill] sm:$0xff]  ;;  %v6056_v35 = vmul.f32 -1.442695, %v10422_v33 }
 0x2bd   : > { %v5176_v53 = vmul.f32 %v4481_v61, %v11631_v50  ;;  %v7594_v30 = vpop.eup %7593  ;;  %7613 = vpow2.f32 %v6181_v39  ;;  %v11635_v61 = vld [vmem:[#allocation87_spill] sm:$0xff]  ;;  %v6054_v39 = vmul.f32 -1.442695, %v10430_v57 }
 0x2be   : > { %5564 = vst.msk [vmem:[%s8740_s6 + $0x658] sm:$0xff] %vm5360_vm1, %v5307_v0  ;;  %v7596_v0 = vpop.eup %7595  ;;  %7615 = vpow2.f32 %v6178_v4  ;;  %v6057_v4 = vmul.f32 -1.442695, %v10434_v8  ;;  %v11642_v8 = vld [vmem:[#allocation4_spill] sm:$0xff] }
 0x2bf   : > { %5433 = vst.msk [vmem:[%s8740_s6 + $0x240] sm:$0xff] %vm5360_vm1, %v5176_v53  ;;  %v4483_v62 = vpop.permute.xlu1 %4482  ;;  %v7598_v14 = vpop.eup %7597  ;;  %7617 = vrcp.f32 %v3422_v47  ;;  %v10466_v33 = vadd.f32 %v10056_v56, %v11642_v8  ;;  %v11643_v8 = vld [vmem:[#allocation91_spill] sm:$0xff] }
 0x2c0   : > { %v4737_v52 = vpop.permute.xlu0 %4736  ;;  %v5177_v45 = vmul.f32 %v4483_v62, %v11635_v61  ;;  %4794 = vrot.lane.b32.xlu1 %v7590_v46, %s7776_s27  ;;  %4548 = vrot.lane.b32.xlu0 %v7594_v30, %s7776_s27  ;;  %v7600_v50 = vpop.eup %7599  ;;  %7619 = vrcp.f32 %v3420_v11  ;;  %v11637_v46 = vld [vmem:[#allocation3_spill] sm:$0xff]  ;;  %v3423_v61 = vadd.f32 1.0, %v7592_v40  ;;  %v11641_v11 = vld [vmem:[#allocation6_spill] sm:$0xff]  ;;  %v3550_v29 = vadd.f32 1.0, %v7598_v14 }
 0x2c1   : > { %v5304_v6 = vmul.f32 %v4737_v52, %v11636_v63  ;;  %v10454_v62 = vadd.f32 %v10056_v56, %v11637_v46  ;;  %v11638_v52 = vld [vmem:[#allocation45_spill] sm:$0xff]  ;;  %v7602_v30 = vpop.eup %7601  ;;  %7621 = vpow2.f32 %v6179_v12  ;;  %v6184_v46 = vmul.f32 -1.442695, %v10444_v23  ;;  %v11644_v14 = vld [vmem:[#allocation99_spill] sm:$0xff] }
 0x2c2   : > { %5434 = vst.msk [vmem:[%s8740_s6 + $0x248] sm:$0xff] %vm5360_vm1, %v5177_v45  ;;  %v10458_v47 = vadd.f32 %v10056_v56, %v11638_v52  ;;  %v11640_v45 = vld [vmem:[#allocation88_spill] sm:$0xff]  ;;  %v7604_v57 = vpop.eup %7603  ;;  %7623 = vpow2.f32 %v6056_v35 }
 0x2c3   : > { %5561 = vst.msk [vmem:[%s8740_s6 + $0x640] sm:$0xff] %vm5360_vm1, %v5304_v6  ;;  %v4739_v53 = vpop.permute.xlu1 %4738  ;;  %v7606_v52 = vpop.eup %7605  ;;  %7625 = vpow2.f32 %v6054_v39  ;;  %v6055_v12 = vmul.f32 -1.442695, %v10454_v62  ;;  %v6185_v39 = vmul.f32 -1.442695, %v10466_v33 }
 0x2c4   : > { %v4493_v49 = vpop.permute.xlu0 %4492  ;;  %11639 = vst [vmem:[#allocation37_spill] sm:$0xff] %v10458_v47  ;;  %v5305_v63 = vmul.f32 %v4739_v53, %v11640_v45  ;;  %4550 = vrot.lane.b32.xlu1 %v7600_v50, %s7776_s27  ;;  %4804 = vrot.lane.b32.xlu0 %v7602_v30, %s7776_s27  ;;  %v7608_v40 = vpop.eup %7607  ;;  %7627 = vpow2.f32 %v6057_v4  ;;  %v6182_v30 = vmul.f32 -1.442695, %v10458_v47  ;;  %v11645_v4 = vld [vmem:[#allocation48_spill] sm:$0xff] }
 0x2c5   : > { %v5182_v6 = vmul.f32 %v4493_v49, %v11641_v11  ;;  %v7610_v53 = vpop.eup %7609  ;;  %7629 = vrcp.f32 %v3423_v61  ;;  %v10481_v11 = vadd.f32 %v10056_v56, %v11645_v4 }
 0x2c6   : > { %5562 = vst.msk [vmem:[%s8740_s6 + $0x648] sm:$0xff] %vm5360_vm1, %v5305_v63  ;;  %v7612_v63 = vpop.eup %7611  ;;  %7631 = vpow2.f32 %v6184_v46 }
 0x2c7   : > { %5439 = vst.msk [vmem:[%s8740_s6 + $0x270] sm:$0xff] %vm5360_vm1, %v5182_v6  ;;  %v4495_v35 = vpop.permute.xlu1 %4494  ;;  %v7614_v6 = vpop.eup %7613  ;;  %7633 = vrcp.f32 %v3550_v29 }
 0x2c8   : > { %v4749_v50 = vpop.permute.xlu0 %4748  ;;  %v5183_v49 = vmul.f32 %v4495_v35, %v11643_v8  ;;  %4806 = vrot.lane.b32.xlu1 %v7610_v53, %s7776_s27  ;;  %4544 = vrot.lane.b32.xlu0 %v7604_v57, %s7776_s27  ;;  %v7616_v61 = vpop.eup %7615  ;;  %v3551_v35 = vadd.f32 1.0, %v7614_v6  ;;  %7635 = vpow2.f32 %v6055_v12  ;;  %v10490_v53 = vadd.f32 %v10056_v56, %v9911_v43 }
 0x2c9   : > { %v5310_v45 = vmul.f32 %v4749_v50, %v11644_v14  ;;  %v10494_v57 = vadd.f32 %v10056_v56, %v9916_v38  ;;  %v7618_v29 = vpop.eup %7617  ;;  %v3421_v8 = vadd.f32 1.0, %v7596_v0  ;;  %7637 = vpow2.f32 %v6182_v30 }
 0x2ca   : > { %5440 = vst.msk [vmem:[%s8740_s6 + $0x278] sm:$0xff] %vm5360_vm1, %v5183_v49  ;;  %v11647_v49 = vld [vmem:[#allocation95_spill] sm:$0xff]  ;;  %v10498_v12 = vpop.eup %7619  ;;  %7639 = vpow2.f32 %v6185_v39  ;;  %v6183_v6 = vmul.f32 -1.442695, %v10481_v11  ;;  %v3548_v47 = vadd.f32 1.0, %v7616_v61 }
 0x2cb   : > { %5567 = vst.msk [vmem:[%s8740_s6 + $0x670] sm:$0xff] %vm5360_vm1, %v5310_v45  ;;  %v4751_v46 = vpop.permute.xlu1 %4750  ;;  %11646 = vst [vmem:[#allocation79_spill] sm:$0xff] %v10494_v57  ;;  %v11648_v45 = vld [vmem:[#allocation90_spill] sm:$0xff]  ;;  %v7622_v43 = vpop.eup %7621  ;;  %7641 = vrcp.f32 %v3551_v35  ;;  %v6060_v0 = vmul.f32 -1.442695, %v10490_v53 }
 0x2cc   : > { %v4489_v50 = vpop.permute.xlu0 %4488  ;;  %v5311_v14 = vmul.f32 %v4751_v46, %v11647_v49  ;;  %4546 = vrot.lane.b32.xlu1 %v7606_v52, %s7776_s27  ;;  %4800 = vrot.lane.b32.xlu0 %v7608_v40, %s7776_s27  ;;  %v7624_v38 = vpop.eup %7623  ;;  %7643 = vrcp.f32 %v3421_v8  ;;  %v11649_v46 = vld [vmem:[#allocation92_spill] sm:$0xff]  ;;  %v6058_v61 = vmul.f32 -1.442695, %v10494_v57  ;;  %v3549_v49 = vadd.f32 1.0, %v7622_v43 }
 0x2cd   : > { %v5180_v4 = vmul.f32 %v4489_v50, %v11648_v45  ;;  %v7626_v39 = vpop.eup %7625  ;;  %v11650_v50 = vld [vmem:[#allocation94_spill] sm:$0xff]  ;;  %7645 = vpow2.f32 %v6183_v6 }
 0x2ce   : > { %5568 = vst.msk [vmem:[%s8740_s6 + $0x678] sm:$0xff] %vm5360_vm1, %v5311_v14  ;;  %v7628_v35 = vpop.eup %7627  ;;  %v10515_v14 = vld [vmem:[%s10968_s2] ss:$0 sm:$0xff]  ;;  %7647 = vrcp.f32 %v3548_v47 }
 0x2cf   : > { %5437 = vst.msk [vmem:[%s8740_s6 + $0x260] sm:$0xff] %vm5360_vm1, %v5180_v4  ;;  %v4491_v56 = vpop.permute.xlu1 %4490  ;;  %v10519_v45 = vadd.f32 %v10515_v14, %v9927_v2  ;;  %v7630_v8 = vpop.eup %7629  ;;  %v3426_v4 = vadd.f32 1.0, %v7624_v38  ;;  %7649 = vpow2.f32 %v6060_v0  ;;  %v11654_v38 = vld [vmem:[#allocation100_spill] sm:$0xff]  ;;  %v11655_v0 = vld [vmem:[#allocation77_spill] sm:$0xff] }
 0x2d0   : > { %v4745_v30 = vpop.permute.xlu0 %4744  ;;  %v5181_v52 = vmul.f32 %v4491_v56, %v11649_v46  ;;  %4802 = vrot.lane.b32.xlu1 %v7612_v63, %s7776_s27  ;;  %4556 = vrot.lane.b32.xlu0 %v7618_v29, %s7776_s27  ;;  %v7632_v6 = vpop.eup %7631  ;;  %v3424_v63 = vadd.f32 1.0, %v7626_v39  ;;  %v11651_v56 = vld [vmem:[#allocation55_spill] sm:$0xff]  ;;  %v3427_v29 = vadd.f32 1.0, %v7628_v35  ;;  %7651 = vpow2.f32 %v6058_v61 }
 0x2d1   : > { %v5308_v40 = vmul.f32 %v4745_v30, %v11650_v50  ;;  %v10528_v30 = vadd.f32 %v10515_v14, %v11651_v56  ;;  %v7634_v46 = vpop.eup %7633  ;;  %v11653_v50 = vld [vmem:[#allocation97_spill] sm:$0xff]  ;;  %7653 = vrcp.f32 %v3549_v49  ;;  %v6061_v39 = vmul.f32 -1.442695, %v10519_v45  ;;  %v11657_v49 = vld [vmem:[#allocation54_spill] sm:$0xff] }
 0x2d2   : > { %5438 = vst.msk [vmem:[%s8740_s6 + $0x268] sm:$0xff] %vm5360_vm1, %v5181_v52  ;;  %v7636_v57 = vpop.eup %7635  ;;  %7655 = vrcp.f32 %v3426_v4  ;;  %v3554_v35 = vadd.f32 1.0, %v7632_v6  ;;  %v11658_v6 = vld [vmem:[#allocation17_spill] sm:$0xff] }
 0x2d3   : > { %5565 = vst.msk [vmem:[%s8740_s6 + $0x660] sm:$0xff] %vm5360_vm1, %v5308_v40  ;;  %v4747_v43 = vpop.permute.xlu1 %4746  ;;  %11652 = vst [vmem:[#allocation82_spill] sm:$0xff] %v10528_v30  ;;  %v10536_v40 = vadd.f32 %v10515_v14, %v11655_v0  ;;  %v7638_v56 = vpop.eup %7637  ;;  %7657 = vrcp.f32 %v3424_v63  ;;  %v3425_v4 = vadd.f32 1.0, %v7636_v57  ;;  %v11661_v57 = vld [vmem:[#allocation14_spill] sm:$0xff] }
 0x2d4   : > { %v4501_v2 = vpop.permute.xlu0 %4500  ;;  %v5309_v47 = vmul.f32 %v4747_v43, %v11653_v50  ;;  %4558 = vrot.lane.b32.xlu1 %v7630_v8, %s7776_s27  ;;  %4812 = vrot.lane.b32.xlu0 %v7634_v46, %s7776_s27  ;;  %v7640_v61 = vpop.eup %7639  ;;  %v10545_v43 = vadd.f32 %v10515_v14, %v11657_v49  ;;  %v6188_v8 = vmul.f32 -1.442695, %v10528_v30  ;;  %7659 = vrcp.f32 %v3427_v29 }
 0x2d5   : > { %v5186_v52 = vmul.f32 %v4501_v2, %v11654_v38  ;;  %11656 = vst [vmem:[#allocation83_spill] sm:$0xff] %v10536_v40  ;;  %v7642_v46 = vpop.eup %7641  ;;  %7661 = vpow2.f32 %v6061_v39  ;;  %v6189_v49 = vmul.f32 -1.442695, %v10536_v40  ;;  %v3555_v29 = vadd.f32 1.0, %v7640_v61 }
 0x2d6   : > { %5566 = vst.msk [vmem:[%s8740_s6 + $0x668] sm:$0xff] %vm5360_vm1, %v5309_v47  ;;  %v11659_v47 = vld [vmem:[#allocation18_spill] sm:$0xff]  ;;  %v7644_v30 = vpop.eup %7643  ;;  %7663 = vrcp.f32 %v3554_v35  ;;  %v11662_v35 = vld [vmem:[#allocation21_spill] sm:$0xff] }
 0x2d7   : > { %5443 = vst.msk [vmem:[%s8740_s6 + $0x290] sm:$0xff] %vm5360_vm1, %v5186_v52  ;;  %v4503_v2 = vpop.permute.xlu1 %4502  ;;  %v11660_v52 = vld [vmem:[#allocation15_spill] sm:$0xff]  ;;  %v7646_v39 = vpop.eup %7645  ;;  %7665 = vpow2.f32 %v6188_v8 }
 0x2d8   : > { %v4757_v50 = vpop.permute.xlu0 %4756  ;;  %v5187_v38 = vmul.f32 %v4503_v2, %v11658_v6  ;;  %v10552_v63 = vadd.f32 %v10515_v14, %v11660_v52  ;;  %4814 = vrot.lane.b32.xlu1 %v7642_v46, %s7776_s27  ;;  %4552 = vrot.lane.b32.xlu0 %v10498_v12, %s7776_s27  ;;  %v10562_v2 = vadd.f32 %v10515_v14, %v11661_v57  ;;  %7667 = vrcp.f32 %v3425_v4 }
 0x2d9   : > { %v5314_v0 = vmul.f32 %v4757_v50, %v11659_v47  ;;  %v3552_v50 = vadd.f32 1.0, %v7638_v56  ;;  %v7648_v47 = vpop.eup %7647  ;;  %v6059_v12 = vmul.f32 -1.442695, %v10545_v43  ;;  %7669 = vpow2.f32 %v6189_v49 }
 0x2da   : > { %5444 = vst.msk [vmem:[%s8740_s6 + $0x298] sm:$0xff] %vm5360_vm1, %v5187_v38  ;;  %v11663_v38 = vld [vmem:[#allocation101_spill] sm:$0xff]  ;;  %v7650_v40 = vpop.eup %7649  ;;  %v6186_v57 = vmul.f32 -1.442695, %v10552_v63  ;;  %v10574_v56 = vadd.f32 %v10515_v14, %v9987_v10  ;;  %7671 = vrcp.f32 %v3555_v29  ;;  %v6187_v4 = vmul.f32 -1.442695, %v10562_v2 }
 0x2db   : > { %5571 = vst.msk [vmem:[%s8740_s6 + $0x690] sm:$0xff] %vm5360_vm1, %v5314_v0  ;;  %v4759_v6 = vpop.permute.xlu1 %4758  ;;  %v7652_v8 = vpop.eup %7651  ;;  %v10583_v0 = vadd.f32 %v10515_v14, %v10006_v20  ;;  %7673 = vrcp.f32 %v3552_v50  ;;  %v10587_v10 = vadd.f32 %v10515_v14, %v9996_v37  ;;  %v10591_v29 = vadd.f32 %v10515_v14, %v10020_v22  ;;  %v11666_v20 = vld [vmem:[#allocation16_spill] sm:$0xff] }
 0x2dc   : > { %v4497_v46 = vpop.permute.xlu0 %4496  ;;  %v5315_v61 = vmul.f32 %v4759_v6, %v11662_v35  ;;  %4554 = vrot.lane.b32.xlu1 %v7644_v30, %s7776_s27  ;;  %4808 = vrot.lane.b32.xlu0 %v7648_v47, %s7776_s27  ;;  %v7654_v49 = vpop.eup %7653  ;;  %v3553_v30 = vadd.f32 1.0, %v7646_v39  ;;  %v3430_v35 = vadd.f32 1.0, %v7650_v40  ;;  %7675 = vpow2.f32 %v6059_v12 }
 0x2dd   : > { %v5184_v52 = vmul.f32 %v4497_v46, %v11663_v38  ;;  %11664 = vst [vmem:[#allocation38_spill] sm:$0xff] %v10583_v0  ;;  %11665 = vst [vmem:[#allocation59_spill] sm:$0xff] %v10587_v10  ;;  %v7656_v47 = vpop.eup %7655  ;;  %v11667_v38 = vld [vmem:[#allocation5_spill] sm:$0xff]  ;;  %7677 = vpow2.f32 %v6186_v57  ;;  %v6065_v22 = vmul.f32 -1.442695, %v10583_v0  ;;  %v10606_v57 = vadd.f32 %v10515_v14, %v10018_v32 }
 0x2de   : > { %5572 = vst.msk [vmem:[%s8740_s6 + $0x698] sm:$0xff] %vm5360_vm1, %v5315_v61  ;;  %v7658_v39 = vpop.eup %7657  ;;  %7679 = vpow2.f32 %v6187_v4  ;;  %v11668_v4 = vld [vmem:[#allocation58_spill] sm:$0xff] }
 0x2df   : > { %5441 = vst.msk [vmem:[%s8740_s6 + $0x280] sm:$0xff] %vm5360_vm1, %v5184_v52  ;;  %v4499_v6 = vpop.permute.xlu1 %4498  ;;  %v6064_v52 = vmul.f32 -1.442695, %v10574_v56  ;;  %v7660_v37 = vpop.eup %7659  ;;  %7681 = vrcp.f32 %v3553_v30 }
 0x2e0   : > { %v4753_v46 = vpop.permute.xlu0 %4752  ;;  %v5185_v61 = vmul.f32 %v4499_v6, %v11666_v20  ;;  %4810 = vrot.lane.b32.xlu1 %v7654_v49, %s7776_s27  ;;  %4564 = vrot.lane.b32.xlu0 %v7656_v47, %s7776_s27  ;;  %v7662_v40 = vpop.eup %7661  ;;  %v6062_v6 = vmul.f32 -1.442695, %v10587_v10  ;;  %7683 = vrcp.f32 %v3430_v35  ;;  %v6192_v20 = vmul.f32 -1.442695, %v10591_v29 }
 0x2e1   : > { %v5312_v50 = vmul.f32 %v4753_v46, %v11667_v38  ;;  %v7664_v46 = vpop.eup %7663  ;;  %v3431_v30 = vadd.f32 1.0, %v7662_v40  ;;  %7685 = vpow2.f32 %v6064_v52  ;;  %v10614_v10 = vadd.f32 %v10515_v14, %v10041_v9 }
 0x2e2   : > { %5442 = vst.msk [vmem:[%s8740_s6 + $0x288] sm:$0xff] %vm5360_vm1, %v5185_v61  ;;  %v11669_v61 = vld [vmem:[#allocation25_spill] sm:$0xff]  ;;  %7687 = vpow2.f32 %v6065_v22  ;;  %v10623_v52 = vadd.f32 %v10515_v14, %v10030_v18 }
 0x2e3   : > { %5569 = vst.msk [vmem:[%s8740_s6 + $0x680] sm:$0xff] %vm5360_vm1, %v5312_v50  ;;  %v4755_v12 = vpop.permute.xlu1 %4754  ;;  %v7666_v50 = vpop.eup %7665  ;;  %7689 = vpow2.f32 %v6062_v6  ;;  %v11671_v22 = vld [vmem:[#allocation9_spill] sm:$0xff] }
 0x2e4   : > { %v4509_v49 = vpop.permute.xlu0 %4508  ;;  %v5313_v47 = vmul.f32 %v4755_v12, %v11668_v4  ;;  %4566 = vrot.lane.b32.xlu1 %v7660_v37, %s7776_s27  ;;  %4820 = vrot.lane.b32.xlu0 %v7664_v46, %s7776_s27  ;;  %v7668_v32 = vpop.eup %7667  ;;  %v3558_v0 = vadd.f32 1.0, %v7666_v50  ;;  %v3428_v12 = vadd.f32 1.0, %v7652_v8  ;;  %7691 = vpow2.f32 %v6192_v20  ;;  %v11670_v46 = vld [vmem:[#allocation11_spill] sm:$0xff] }
 0x2e5   : > { %v5190_v38 = vmul.f32 %v4509_v49, %v11669_v61  ;;  %v7670_v35 = vpop.eup %7669  ;;  %v6063_v49 = vmul.f32 -1.442695, %v10606_v57  ;;  %7693 = vrcp.f32 %v3431_v30  ;;  %v6193_v8 = vmul.f32 -1.442695, %v10614_v10 }
 0x2e6   : > { %5570 = vst.msk [vmem:[%s8740_s6 + $0x688] sm:$0xff] %vm5360_vm1, %v5313_v47  ;;  %v7672_v37 = vpop.eup %7671  ;;  %7695 = vrcp.f32 %v3558_v0  ;;  %v3559_v6 = vadd.f32 1.0, %v7670_v35  ;;  %v11672_v0 = vld [vmem:[#allocation30_spill] sm:$0xff] }
 0x2e7   : > { %5447 = vst.msk [vmem:[%s8740_s6 + $0x2b0] sm:$0xff] %vm5360_vm1, %v5190_v38  ;;  %v4511_v40 = vpop.permute.xlu1 %4510  ;;  %v7674_v61 = vpop.eup %7673  ;;  %7697 = vrcp.f32 %v3428_v12  ;;  %v10637_v38 = vadd.f32 %v10515_v14, %v10062_v42  ;;  %v10646_v42 = vadd.f32 %v10515_v14, %v10098_v25 }
 0x2e8   : > { %v4765_v9 = vpop.permute.xlu0 %4764  ;;  %v5191_v4 = vmul.f32 %v4511_v40, %v11670_v46  ;;  %4822 = vrot.lane.b32.xlu1 %v7672_v37, %s7776_s27  ;;  %4560 = vrot.lane.b32.xlu0 %v7658_v39, %s7776_s27  ;;  %v7676_v18 = vpop.eup %7675  ;;  %7699 = vpow2.f32 %v6063_v49  ;;  %v6190_v39 = vmul.f32 -1.442695, %v10623_v52 }
 0x2e9   : > { %v5318_v47 = vmul.f32 %v4765_v9, %v11671_v22  ;;  %v7678_v20 = vpop.eup %7677  ;;  %v11673_v9 = vld [vmem:[#allocation8_spill] sm:$0xff]  ;;  %7701 = vpow2.f32 %v6193_v8 }
 0x2ea   : > { %5448 = vst.msk [vmem:[%s8740_s6 + $0x2b8] sm:$0xff] %vm5360_vm1, %v5191_v4  ;;  %v7680_v40 = vpop.eup %7679  ;;  %v3429_v4 = vadd.f32 1.0, %v7676_v18  ;;  %v3556_v22 = vadd.f32 1.0, %v7678_v20  ;;  %7703 = vrcp.f32 %v3559_v6  ;;  %v6191_v18 = vmul.f32 -1.442695, %v10637_v38 }
 0x2eb   : > { %5575 = vst.msk [vmem:[%s8740_s6 + $0x6b0] sm:$0xff] %vm5360_vm1, %v5318_v47  ;;  %v4767_v50 = vpop.permute.xlu1 %4766  ;;  %v7682_v46 = vpop.eup %7681  ;;  %v3557_v47 = vadd.f32 1.0, %v7680_v40  ;;  %7705 = vpow2.f32 %v6190_v39  ;;  %v10657_v6 = vadd.f32 %v10515_v14, %v10108_v1  ;;  %v6068_v40 = vmul.f32 -1.442695, %v10646_v42 }
 0x2ec   : > { %v4505_v30 = vpop.permute.xlu0 %4504  ;;  %v5319_v35 = vmul.f32 %v4767_v50, %v11672_v0  ;;  %4562 = vrot.lane.b32.xlu1 %v7668_v32, %s7776_s27  ;;  %4816 = vrot.lane.b32.xlu0 %v7674_v61, %s7776_s27  ;;  %v7684_v12 = vpop.eup %7683  ;;  %v11674_v50 = vld [vmem:[#allocation71_spill] sm:$0xff]  ;;  %7707 = vrcp.f32 %v3429_v4 }
 0x2ed   : > { %v5188_v37 = vmul.f32 %v4505_v30, %v11673_v9  ;;  %v7686_v49 = vpop.eup %7685  ;;  %v11675_v30 = vld [vmem:[#allocation7_spill] sm:$0xff]  ;;  %7709 = vrcp.f32 %v3556_v22 }
 0x2ee   : > { %5576 = vst.msk [vmem:[%s8740_s6 + $0x6b8] sm:$0xff] %vm5360_vm1, %v5319_v35  ;;  %v7688_v61 = vpop.eup %7687  ;;  %v11676_v35 = vld [vmem:[#allocation26_spill] sm:$0xff]  ;;  %7711 = vrcp.f32 %v3557_v47 }
 0x2ef   : > { %5445 = vst.msk [vmem:[%s8740_s6 + $0x2a0] sm:$0xff] %vm5360_vm1, %v5188_v37  ;;  %v4507_v8 = vpop.permute.xlu1 %4506  ;;  %v7690_v20 = vpop.eup %7689  ;;  %v10663_v9 = vadd.f32 %v10515_v14, %v11676_v35  ;;  %v3434_v37 = vadd.f32 1.0, %v7686_v49  ;;  %v3435_v4 = vadd.f32 1.0, %v7688_v61  ;;  %7713 = vpow2.f32 %v6191_v18 }
 0x2f0   : > { %v4761_v32 = vpop.permute.xlu0 %4760  ;;  %v5189_v25 = vmul.f32 %v4507_v8, %v11674_v50  ;;  %4818 = vrot.lane.b32.xlu1 %v7682_v46, %s7776_s27  ;;  %4572 = vrot.lane.b32.xlu0 %v7684_v12, %s7776_s27  ;;  %v7692_v39 = vpop.eup %7691  ;;  %v10672_v46 = vadd.f32 %v10515_v14, %v10126_v15  ;;  %v11677_v12 = vld [vmem:[#allocation28_spill] sm:$0xff]  ;;  %v6066_v49 = vmul.f32 -1.442695, %v10657_v6  ;;  %7715 = vpow2.f32 %v6068_v40 }
 0x2f1   : > { %v5316_v0 = vmul.f32 %v4761_v32, %v11675_v30  ;;  %v7694_v1 = vpop.eup %7693  ;;  %v6069_v47 = vmul.f32 -1.442695, %v10663_v9  ;;  %v10682_v15 = vadd.f32 %v10515_v14, %v10140_v48  ;;  %7717 = vrcp.f32 %v3434_v37  ;;  %v11679_v48 = vld [vmem:[#allocation102_spill] sm:$0xff] }
 0x2f2   : > { %5446 = vst.msk [vmem:[%s8740_s6 + $0x2a8] sm:$0xff] %vm5360_vm1, %v5189_v25  ;;  %v7696_v50 = vpop.eup %7695  ;;  %v11678_v25 = vld [vmem:[#allocation75_spill] sm:$0xff]  ;;  %v3562_v18 = vadd.f32 1.0, %v7692_v39  ;;  %7719 = vrcp.f32 %v3435_v4  ;;  %v6067_v40 = vmul.f32 -1.442695, %v10672_v46  ;;  %v11681_v37 = vld [vmem:[#allocation10_spill] sm:$0xff]  ;;  %v10699_v4 = vadd.f32 %v10515_v14, %v10150_v59 }
 0x2f3   : > { %5573 = vst.msk [vmem:[%s8740_s6 + $0x6a0] sm:$0xff] %vm5360_vm1, %v5316_v0  ;;  %v4763_v8 = vpop.permute.xlu1 %4762  ;;  %v7698_v0 = vpop.eup %7697  ;;  %7721 = vpow2.f32 %v6066_v49 }
 0x2f4   : > { %v4517_v32 = vpop.permute.xlu0 %4516  ;;  %v5317_v22 = vmul.f32 %v4763_v8, %v11677_v12  ;;  %4574 = vrot.lane.b32.xlu1 %v7694_v1, %s7776_s27  ;;  %4828 = vrot.lane.b32.xlu0 %v7696_v50, %s7776_s27  ;;  %v7700_v61 = vpop.eup %7699  ;;  %v3432_v8 = vadd.f32 1.0, %v7690_v20  ;;  %7723 = vpow2.f32 %v6069_v47  ;;  %v6194_v20 = vmul.f32 -1.442695, %v10682_v15 }
 0x2f5   : > { %v5194_v30 = vmul.f32 %v4517_v32, %v11678_v25  ;;  %v7702_v35 = vpop.eup %7701  ;;  %v11680_v25 = vld [vmem:[#allocation74_spill] sm:$0xff]  ;;  %7725 = vrcp.f32 %v3562_v18  ;;  %v3433_v47 = vadd.f32 1.0, %v7700_v61  ;;  %v11682_v18 = vld [vmem:[#allocation19_spill] sm:$0xff]  ;;  %v6195_v61 = vmul.f32 -1.442695, %v10699_v4 }
 0x2f6   : > { %5574 = vst.msk [vmem:[%s8740_s6 + $0x6a8] sm:$0xff] %vm5360_vm1, %v5317_v22  ;;  %v7704_v50 = vpop.eup %7703  ;;  %v10692_v39 = vadd.f32 %v10515_v14, %v11680_v25  ;;  %7727 = vrcp.f32 %v3432_v8 }
 0x2f7   : > { %5451 = vst.msk [vmem:[%s8740_s6 + $0x2d0] sm:$0xff] %vm5360_vm1, %v5194_v30  ;;  %v4519_v1 = vpop.permute.xlu1 %4518  ;;  %v7706_v49 = vpop.eup %7705  ;;  %v3563_v30 = vadd.f32 1.0, %v7702_v35  ;;  %7729 = vpow2.f32 %v6067_v40 }
 0x2f8   : > { %v4773_v32 = vpop.permute.xlu0 %4772  ;;  %v5195_v12 = vmul.f32 %v4519_v1, %v11679_v48  ;;  %4830 = vrot.lane.b32.xlu1 %v7704_v50, %s7776_s27  ;;  %4568 = vrot.lane.b32.xlu0 %v7698_v0, %s7776_s27  ;;  %v7708_v1 = vpop.eup %7707  ;;  %v10708_v50 = vadd.f32 %v10515_v14, %v10144_v44  ;;  %v6196_v0 = vmul.f32 -1.442695, %v10692_v39  ;;  %7731 = vpow2.f32 %v6194_v20 }
 0x2f9   : > { %v5322_v22 = vmul.f32 %v4773_v32, %v11681_v37  ;;  %v7710_v48 = vpop.eup %7709  ;;  %v3560_v14 = vadd.f32 1.0, %v7706_v49  ;;  %7733 = vrcp.f32 %v3563_v30 }
 0x2fa   : > { %5452 = vst.msk [vmem:[%s8740_s6 + $0x2d8] sm:$0xff] %vm5360_vm1, %v5195_v12  ;;  %v11683_v12 = vld [vmem:[#allocation52_spill] sm:$0xff]  ;;  %v7712_v37 = vpop.eup %7711  ;;  %7735 = vrcp.f32 %v3433_v47 }
 0x2fb   : > { %5579 = vst.msk [vmem:[%s8740_s6 + $0x6d0] sm:$0xff] %vm5360_vm1, %v5322_v22  ;;  %v4775_v32 = vpop.permute.xlu1 %4774  ;;  %v7714_v44 = vpop.eup %7713  ;;  %7737 = vpow2.f32 %v6196_v0 }
 0x2fc   : > { %v4513_v59 = vpop.permute.xlu0 %4512  ;;  %v5323_v35 = vmul.f32 %v4775_v32, %v11682_v18  ;;  %4570 = vrot.lane.b32.xlu1 %v7708_v1, %s7776_s27  ;;  %4824 = vrot.lane.b32.xlu0 %v7710_v48, %s7776_s27  ;;  %v7716_v8 = vpop.eup %7715  ;;  %v6197_v32 = vmul.f32 -1.442695, %v10708_v50  ;;  %v11684_v1 = vld [vmem:[#allocation56_spill] sm:$0xff]  ;;  %v11685_v48 = vld [vmem:[#allocation39_spill] sm:$0xff]  ;;  %v3561_v30 = vadd.f32 1.0, %v7714_v44  ;;  %7739 = vpow2.f32 %v6195_v61  ;;  %v11686_v44 = vld [vmem:[#allocation57_spill] sm:$0xff] }
 0x2fd   : > { %v5192_v25 = vmul.f32 %v4513_v59, %v11683_v12  ;;  %v7718_v20 = vpop.eup %7717  ;;  %7741 = vrcp.f32 %v3560_v14 }
 0x2fe   : > { %5580 = vst.msk [vmem:[%s8740_s6 + $0x6d8] sm:$0xff] %vm5360_vm1, %v5323_v35  ;;  %v7720_v49 = vpop.eup %7719  ;;  %v3438_v35 = vadd.f32 1.0, %v7716_v8  ;;  %7743 = vpow2.f32 %v6197_v32 }
 0x2ff   : > { %5449 = vst.msk [vmem:[%s8740_s6 + $0x2c0] sm:$0xff] %vm5360_vm1, %v5192_v25  ;;  %v4515_v40 = vpop.permute.xlu1 %4514  ;;  %v7722_v47 = vpop.eup %7721  ;;  %7745 = vrcp.f32 %v3561_v30 }
 0x300   : > { %v4769_v22 = vpop.permute.xlu0 %4768  ;;  %v5193_v59 = vmul.f32 %v4515_v40, %v11684_v1  ;;  %4826 = vrot.lane.b32.xlu1 %v7712_v37, %s7776_s27  ;;  %4580 = vrot.lane.b32.xlu0 %v7718_v20, %s7776_s27  ;;  %v7724_v0 = vpop.eup %7723  ;;  %v3436_v20 = vadd.f32 1.0, %v7722_v47  ;;  %7747 = vrcp.f32 %v3438_v35  ;;  %v11689_v47 = vld [vmem:[#allocation27_spill] sm:$0xff] }
 0x301   : > { %v5320_v18 = vmul.f32 %v4769_v22, %v11685_v48  ;;  %v7726_v40 = vpop.eup %7725  ;;  %v11687_v22 = vld [vmem:[#allocation23_spill] sm:$0xff]  ;;  %v3439_v8 = vadd.f32 1.0, %v7724_v0 }
 0x302   : > { %5450 = vst.msk [vmem:[%s8740_s6 + $0x2c8] sm:$0xff] %vm5360_vm1, %v5193_v59  ;;  %v7728_v1 = vpop.eup %7727  ;;  %7749 = vrcp.f32 %v3436_v20 }
 0x303   : > { %5577 = vst.msk [vmem:[%s8740_s6 + $0x6c0] sm:$0xff] %vm5360_vm1, %v5320_v18  ;;  %v4771_v12 = vpop.permute.xlu1 %4770  ;;  %v7730_v14 = vpop.eup %7729  ;;  %7751 = vrcp.f32 %v3439_v8 }
 0x304   : > { %v4525_v25 = vpop.permute.xlu0 %4524  ;;  %v5321_v61 = vmul.f32 %v4771_v12, %v11686_v44  ;;  %4582 = vrot.lane.b32.xlu1 %v7720_v49, %s7776_s27  ;;  %4836 = vrot.lane.b32.xlu0 %v7726_v40, %s7776_s27  ;;  %v7732_v32 = vpop.eup %7731  ;;  %v11688_v12 = vld [vmem:[#allocation68_spill] sm:$0xff]  ;;  %v3437_v40 = vadd.f32 1.0, %v7730_v14 }
 0x305   : > { %v5198_v37 = vmul.f32 %v4525_v25, %v11687_v22  ;;  %v7734_v18 = vpop.eup %7733  ;;  %v3564_v0 = vadd.f32 1.0, %v7732_v32  ;;  %v11691_v14 = vld [vmem:[#allocation24_spill] sm:$0xff] }
 0x306   : > { %5578 = vst.msk [vmem:[%s8740_s6 + $0x6c8] sm:$0xff] %vm5360_vm1, %v5321_v61  ;;  %v7736_v49 = vpop.eup %7735  ;;  %7753 = vrcp.f32 %v3437_v40 }
 0x307   : > { %5455 = vst.msk [vmem:[%s8740_s6 + $0x2f0] sm:$0xff] %vm5360_vm1, %v5198_v37  ;;  %v4527_v59 = vpop.permute.xlu1 %4526  ;;  %v7738_v35 = vpop.eup %7737  ;;  %7755 = vrcp.f32 %v3564_v0 }
 0x308   : > { %v4781_v48 = vpop.permute.xlu0 %4780  ;;  %v5199_v30 = vmul.f32 %v4527_v59, %v11688_v12  ;;  %4838 = vrot.lane.b32.xlu1 %v7734_v18, %s7776_s27  ;;  %4576 = vrot.lane.b32.xlu0 %v7728_v1, %s7776_s27  ;;  %v7740_v44 = vpop.eup %7739  ;;  %v11690_v59 = vld [vmem:[#allocation46_spill] sm:$0xff]  ;;  %v3566_v18 = vadd.f32 1.0, %v7738_v35  ;;  %v11693_v35 = vld [vmem:[#allocation20_spill] sm:$0xff] }
 0x309   : > { %v5326_v25 = vmul.f32 %v4781_v48, %v11689_v47  ;;  %v7742_v37 = vpop.eup %7741  ;;  %v3565_v8 = vadd.f32 1.0, %v7740_v44 }
 0x30a   : > { %5456 = vst.msk [vmem:[%s8740_s6 + $0x2f8] sm:$0xff] %vm5360_vm1, %v5199_v30  ;;  %v7744_v1 = vpop.eup %7743  ;;  %7757 = vrcp.f32 %v3566_v18 }
 0x30b   : > { %5583 = vst.msk [vmem:[%s8740_s6 + $0x6f0] sm:$0xff] %vm5360_vm1, %v5326_v25  ;;  %v4783_v61 = vpop.permute.xlu1 %4782  ;;  %v7746_v32 = vpop.eup %7745  ;;  %v11692_v25 = vld [vmem:[#allocation36_spill] sm:$0xff]  ;;  %7759 = vrcp.f32 %v3565_v8 }
 0x30c   : > { %v4521_v22 = vpop.permute.xlu0 %4520  ;;  %v5327_v20 = vmul.f32 %v4783_v61, %v11690_v59  ;;  %4578 = vrot.lane.b32.xlu1 %v7736_v49, %s7776_s27  ;;  %4832 = vrot.lane.b32.xlu0 %v7742_v37, %s7776_s27  ;;  %v7748_v47 = vpop.eup %7747  ;;  %v3567_v49 = vadd.f32 1.0, %v7744_v1  ;;  %v11694_v59 = vld [vmem:[#allocation51_spill] sm:$0xff] }
 0x30d   : > { %v5196_v48 = vmul.f32 %v4521_v22, %v11691_v14  ;;  %v7750_v0 = vpop.eup %7749  ;;  %v11695_v14 = vld [vmem:[#allocation22_spill] sm:$0xff] }
 0x30e   : > { %5584 = vst.msk [vmem:[%s8740_s6 + $0x6f8] sm:$0xff] %vm5360_vm1, %v5327_v20  ;;  %v7752_v37 = vpop.eup %7751  ;;  %7761 = vrcp.f32 %v3567_v49 }
 0x30f   : > { %5453 = vst.msk [vmem:[%s8740_s6 + $0x2e0] sm:$0xff] %vm5360_vm1, %v5196_v48  ;;  %v4523_v12 = vpop.permute.xlu1 %4522 }
 0x310   : > { %v4777_v30 = vpop.permute.xlu0 %4776  ;;  %v5197_v40 = vmul.f32 %v4523_v12, %v11692_v25  ;;  %4834 = vrot.lane.b32.xlu1 %v7746_v32, %s7776_s27  ;;  %4588 = vrot.lane.b32.xlu0 %v7748_v47, %s7776_s27  ;;  %v7754_v18 = vpop.eup %7753  ;;  %v11696_v12 = vld [vmem:[#allocation66_spill] sm:$0xff] }
 0x311   : > { %v5324_v61 = vmul.f32 %v4777_v30, %v11693_v35  ;;  %v7756_v32 = vpop.eup %7755 }
 0x312   : > { %5454 = vst.msk [vmem:[%s8740_s6 + $0x2e8] sm:$0xff] %vm5360_vm1, %v5197_v40 }
 0x313   : > { %5581 = vst.msk [vmem:[%s8740_s6 + $0x6e0] sm:$0xff] %vm5360_vm1, %v5324_v61  ;;  %v4779_v44 = vpop.permute.xlu1 %4778 }
 0x314   : > { %v4533_v22 = vpop.permute.xlu0 %4532  ;;  %v5325_v20 = vmul.f32 %v4779_v44, %v11694_v59  ;;  %4590 = vrot.lane.b32.xlu1 %v7752_v37, %s7776_s27  ;;  %4584 = vrot.lane.b32.xlu0 %v7750_v0, %s7776_s27  ;;  %v7758_v25 = vpop.eup %7757  ;;  %v11697_v0 = vld [vmem:[#allocation63_spill] sm:$0xff] }
 0x315   : > { %v5202_v48 = vmul.f32 %v4533_v22, %v11695_v14  ;;  %v7760_v61 = vpop.eup %7759 }
 0x316   : > { %5582 = vst.msk [vmem:[%s8740_s6 + $0x6e8] sm:$0xff] %vm5360_vm1, %v5325_v20 }
 0x317   : > { %5459 = vst.msk [vmem:[%s8740_s6 + $0x310] sm:$0xff] %vm5360_vm1, %v5202_v48  ;;  %v4535_v1 = vpop.permute.xlu1 %4534 }
 0x318   : > { %v4789_v8 = vpop.permute.xlu0 %4788  ;;  %v5203_v30 = vmul.f32 %v4535_v1, %v11696_v12  ;;  %4586 = vrot.lane.b32.xlu1 %v7754_v18, %s7776_s27  ;;  %4840 = vrot.lane.b32.xlu0 %v7756_v32, %s7776_s27  ;;  %v7762_v37 = vpop.eup %7761  ;;  %v11698_v12 = vld [vmem:[#allocation33_spill] sm:$0xff] }
 0x319   : > { %v5330_v47 = vmul.f32 %v4789_v8, %v10154_v24 }
 0x31a   : > { %5460 = vst.msk [vmem:[%s8740_s6 + $0x318] sm:$0xff] %vm5360_vm1, %v5203_v30 }
 0x31b   : > { %5587 = vst.msk [vmem:[%s8740_s6 + $0x710] sm:$0xff] %vm5360_vm1, %v5330_v47  ;;  %v4791_v40 = vpop.permute.xlu1 %4790 }
 0x31c   : > { %v4529_v35 = vpop.permute.xlu0 %4528  ;;  %v5331_v49 = vmul.f32 %v4791_v40, %v10172_v54  ;;  %4842 = vrot.lane.b32.xlu1 %v7760_v61, %s7776_s27  ;;  %4844 = vrot.lane.b32.xlu0 %v7758_v25, %s7776_s27  ;;  %v11699_v25 = vld [vmem:[#allocation31_spill] sm:$0xff]  ;;  %v11700_v61 = vld [vmem:[#allocation69_spill] sm:$0xff] }
 0x31d   : > { %v5200_v44 = vmul.f32 %v4529_v35, %v11697_v0 }
 0x31e   : > { %5588 = vst.msk [vmem:[%s8740_s6 + $0x718] sm:$0xff] %vm5360_vm1, %v5331_v49 }
 0x31f   : > { %5457 = vst.msk [vmem:[%s8740_s6 + $0x300] sm:$0xff] %vm5360_vm1, %v5200_v44  ;;  %v4531_v24 = vpop.permute.xlu1 %4530 }
 0x320   : > { %v4785_v22 = vpop.permute.xlu0 %4784  ;;  %v5201_v59 = vmul.f32 %v4531_v24, %v10162_v36  ;;  %4846 = vrot.lane.b32.xlu1 %v7762_v37, %s7776_s27 }
 0x321   : > { %v5328_v54 = vmul.f32 %v4785_v22, %v10176_v13 }
 0x322   : > { %5458 = vst.msk [vmem:[%s8740_s6 + $0x308] sm:$0xff] %vm5360_vm1, %v5201_v59 }
 0x323   : > { %5585 = vst.msk [vmem:[%s8740_s6 + $0x700] sm:$0xff] %vm5360_vm1, %v5328_v54  ;;  %v4787_v20 = vpop.permute.xlu1 %4786 }
 0x324   : > { %v4541_v14 = vpop.permute.xlu0 %4540  ;;  %v5329_v48 = vmul.f32 %v4787_v20, %v10180_v51 }
 0x325   : > { %v5206_v18 = vmul.f32 %v4541_v14, %v10190_v19 }
 0x326   : > { %5586 = vst.msk [vmem:[%s8740_s6 + $0x708] sm:$0xff] %vm5360_vm1, %v5329_v48 }
 0x327   : > { %5463 = vst.msk [vmem:[%s8740_s6 + $0x330] sm:$0xff] %vm5360_vm1, %v5206_v18  ;;  %v4543_v36 = vpop.permute.xlu1 %4542 }
 0x328   : > { %v4797_v13 = vpop.permute.xlu0 %4796  ;;  %v5207_v1 = vmul.f32 %v4543_v36, %v10204_v31  ;;  %v11702_v36 = vld [vmem:[#allocation32_spill] sm:$0xff] }
 0x329   : > { %v5334_v8 = vmul.f32 %v4797_v13, %v10214_v17 }
 0x32a   : > { %5464 = vst.msk [vmem:[%s8740_s6 + $0x338] sm:$0xff] %vm5360_vm1, %v5207_v1 }
 0x32b   : > { %5591 = vst.msk [vmem:[%s8740_s6 + $0x730] sm:$0xff] %vm5360_vm1, %v5334_v8  ;;  %v4799_v32 = vpop.permute.xlu1 %4798 }
 0x32c   : > { %v4537_v51 = vpop.permute.xlu0 %4536  ;;  %v5335_v19 = vmul.f32 %v4799_v32, %v10223_v60 }
 0x32d   : > { %v5204_v30 = vmul.f32 %v4537_v51, %v11698_v12  ;;  %v11703_v12 = vld [vmem:[#allocation35_spill] sm:$0xff] }
 0x32e   : > { %5592 = vst.msk [vmem:[%s8740_s6 + $0x738] sm:$0xff] %vm5360_vm1, %v5335_v19 }
 0x32f   : > { %5461 = vst.msk [vmem:[%s8740_s6 + $0x320] sm:$0xff] %vm5360_vm1, %v5204_v30  ;;  %v4539_v47 = vpop.permute.xlu1 %4538 }
 0x330   : > { %v4793_v31 = vpop.permute.xlu0 %4792  ;;  %v5205_v17 = vmul.f32 %v4539_v47, %v10240_v34 }
 0x331   : > { %v5332_v40 = vmul.f32 %v4793_v31, %v11699_v25 }
 0x332   : > { %5462 = vst.msk [vmem:[%s8740_s6 + $0x328] sm:$0xff] %vm5360_vm1, %v5205_v17 }
 0x333   : > { %5589 = vst.msk [vmem:[%s8740_s6 + $0x720] sm:$0xff] %vm5360_vm1, %v5332_v40  ;;  %v4795_v35 = vpop.permute.xlu1 %4794  ;;  %v11705_v40 = vld [vmem:[#allocation72_spill] sm:$0xff] }
 0x334   : > { %v4549_v60 = vpop.permute.xlu0 %4548  ;;  %v5333_v49 = vmul.f32 %v4795_v35, %v11700_v61 }
 0x335   : > { %v5210_v0 = vmul.f32 %v4549_v60, %v10276_v21  ;;  %v11706_v60 = vld [vmem:[#allocation76_spill] sm:$0xff] }
 0x336   : > { %5590 = vst.msk [vmem:[%s8740_s6 + $0x728] sm:$0xff] %vm5360_vm1, %v5333_v49 }
 0x337   : > { %5467 = vst.msk [vmem:[%s8740_s6 + $0x350] sm:$0xff] %vm5360_vm1, %v5210_v0  ;;  %v4551_v44 = vpop.permute.xlu1 %4550 }
 0x338   : > { %v4805_v34 = vpop.permute.xlu0 %4804  ;;  %v5211_v24 = vmul.f32 %v4551_v44, %v10284_v27 }
 0x339   : > { %v5338_v22 = vmul.f32 %v4805_v34, %v10293_v28 }
 0x33a   : > { %5468 = vst.msk [vmem:[%s8740_s6 + $0x358] sm:$0xff] %vm5360_vm1, %v5211_v24 }
 0x33b   : > { %5595 = vst.msk [vmem:[%s8740_s6 + $0x750] sm:$0xff] %vm5360_vm1, %v5338_v22  ;;  %v4807_v37 = vpop.permute.xlu1 %4806 }
 0x33c   : > { %v4545_v59 = vpop.permute.xlu0 %4544  ;;  %v5339_v21 = vmul.f32 %v4807_v37, %v10318_v41 }
 0x33d   : > { %v5208_v54 = vmul.f32 %v4545_v59, %v10301_v55  ;;  %v11701_v55 = vld [vmem:[#allocation29_spill] sm:$0xff]  ;;  %v11708_v59 = vld [vmem:[#allocation44_spill] sm:$0xff] }
 0x33e   : > { %5596 = vst.msk [vmem:[%s8740_s6 + $0x758] sm:$0xff] %vm5360_vm1, %v5339_v21 }
 0x33f   : > { %5465 = vst.msk [vmem:[%s8740_s6 + $0x340] sm:$0xff] %vm5360_vm1, %v5208_v54  ;;  %v4547_v20 = vpop.permute.xlu1 %4546 }
 0x340   : > { %v4801_v27 = vpop.permute.xlu0 %4800  ;;  %v5209_v28 = vmul.f32 %v4547_v20, %v10306_v26 }
 0x341   : > { %v5336_v14 = vmul.f32 %v4801_v27, %v10312_v3  ;;  %v11709_v27 = vld [vmem:[#allocation37_spill] sm:$0xff] }
 0x342   : > { %5466 = vst.msk [vmem:[%s8740_s6 + $0x348] sm:$0xff] %vm5360_vm1, %v5209_v28 }
 0x343   : > { %5593 = vst.msk [vmem:[%s8740_s6 + $0x740] sm:$0xff] %vm5360_vm1, %v5336_v14  ;;  %v4803_v48 = vpop.permute.xlu1 %4802 }
 0x344   : > { %v4557_v41 = vpop.permute.xlu0 %4556  ;;  %v5337_v18 = vmul.f32 %v4803_v48, %v11701_v55 }
 0x345   : > { %v5214_v13 = vmul.f32 %v4557_v41, %v11702_v36  ;;  %v11710_v36 = vld [vmem:[#allocation82_spill] sm:$0xff] }
 0x346   : > { %5594 = vst.msk [vmem:[%s8740_s6 + $0x748] sm:$0xff] %vm5360_vm1, %v5337_v18 }
 0x347   : > { %5471 = vst.msk [vmem:[%s8740_s6 + $0x370] sm:$0xff] %vm5360_vm1, %v5214_v13  ;;  %v4559_v1 = vpop.permute.xlu1 %4558 }
 0x348   : > { %v4813_v26 = vpop.permute.xlu0 %4812  ;;  %v5215_v3 = vmul.f32 %v4559_v1, %v10359_v58 }
 0x349   : > { %v5342_v8 = vmul.f32 %v4813_v26, %v10372_v16  ;;  %v11704_v16 = vld [vmem:[#allocation34_spill] sm:$0xff] }
 0x34a   : > { %5472 = vst.msk [vmem:[%s8740_s6 + $0x378] sm:$0xff] %vm5360_vm1, %v5215_v3  ;;  %v11712_v3 = vld [vmem:[#allocation79_spill] sm:$0xff] }
 0x34b   : > { %5599 = vst.msk [vmem:[%s8740_s6 + $0x770] sm:$0xff] %vm5360_vm1, %v5342_v8  ;;  %v4815_v32 = vpop.permute.xlu1 %4814 }
 0x34c   : > { %v4553_v51 = vpop.permute.xlu0 %4552  ;;  %v5343_v19 = vmul.f32 %v4815_v32, %v10395_v7 }
 0x34d   : > { %v5212_v30 = vmul.f32 %v4553_v51, %v11703_v12 }
 0x34e   : > { %5600 = vst.msk [vmem:[%s8740_s6 + $0x778] sm:$0xff] %vm5360_vm1, %v5343_v19 }
 0x34f   : > { %5469 = vst.msk [vmem:[%s8740_s6 + $0x360] sm:$0xff] %vm5360_vm1, %v5212_v30  ;;  %v4555_v47 = vpop.permute.xlu1 %4554 }
 0x350   : > { %v4809_v58 = vpop.permute.xlu0 %4808  ;;  %v5213_v31 = vmul.f32 %v4555_v47, %v11704_v16 }
 0x351   : > { %v5340_v17 = vmul.f32 %v4809_v58, %v10401_v5  ;;  %v11707_v5 = vld [vmem:[#allocation41_spill] sm:$0xff] }
 0x352   : > { %5470 = vst.msk [vmem:[%s8740_s6 + $0x368] sm:$0xff] %vm5360_vm1, %v5213_v31 }
 0x353   : > { %5597 = vst.msk [vmem:[%s8740_s6 + $0x760] sm:$0xff] %vm5360_vm1, %v5340_v17  ;;  %v4811_v25 = vpop.permute.xlu1 %4810 }
 0x354   : > { %v4565_v7 = vpop.permute.xlu0 %4564  ;;  %v5341_v35 = vmul.f32 %v4811_v25, %v11705_v40 }
 0x355   : > { %v5218_v61 = vmul.f32 %v4565_v7, %v11706_v60  ;;  %v11714_v7 = vld [vmem:[#allocation59_spill] sm:$0xff] }
 0x356   : > { %5598 = vst.msk [vmem:[%s8740_s6 + $0x768] sm:$0xff] %vm5360_vm1, %v5341_v35 }
 0x357   : > { %5475 = vst.msk [vmem:[%s8740_s6 + $0x390] sm:$0xff] %vm5360_vm1, %v5218_v61  ;;  %v4567_v49 = vpop.permute.xlu1 %4566 }
 0x358   : > { %v4821_v0 = vpop.permute.xlu0 %4820  ;;  %v5219_v44 = vmul.f32 %v4567_v49, %v11707_v5 }
 0x359   : > { %v5346_v34 = vmul.f32 %v4821_v0, %v10444_v23 }
 0x35a   : > { %5476 = vst.msk [vmem:[%s8740_s6 + $0x398] sm:$0xff] %vm5360_vm1, %v5219_v44 }
 0x35b   : > { %5603 = vst.msk [vmem:[%s8740_s6 + $0x790] sm:$0xff] %vm5360_vm1, %v5346_v34  ;;  %v4823_v24 = vpop.permute.xlu1 %4822 }
 0x35c   : > { %v4561_v22 = vpop.permute.xlu0 %4560  ;;  %v5347_v37 = vmul.f32 %v4823_v24, %v10466_v33 }
 0x35d   : > { %v5216_v21 = vmul.f32 %v4561_v22, %v11708_v59 }
 0x35e   : > { %5604 = vst.msk [vmem:[%s8740_s6 + $0x798] sm:$0xff] %vm5360_vm1, %v5347_v37 }
 0x35f   : > { %5473 = vst.msk [vmem:[%s8740_s6 + $0x380] sm:$0xff] %vm5360_vm1, %v5216_v21  ;;  %v4563_v54 = vpop.permute.xlu1 %4562 }
 0x360   : > { %v4817_v20 = vpop.permute.xlu0 %4816  ;;  %v5217_v23 = vmul.f32 %v4563_v54, %v10454_v62 }
 0x361   : > { %v5344_v28 = vmul.f32 %v4817_v20, %v11709_v27 }
 0x362   : > { %5474 = vst.msk [vmem:[%s8740_s6 + $0x388] sm:$0xff] %vm5360_vm1, %v5217_v23 }
 0x363   : > { %5601 = vst.msk [vmem:[%s8740_s6 + $0x780] sm:$0xff] %vm5360_vm1, %v5344_v28  ;;  %v4819_v14 = vpop.permute.xlu1 %4818 }
 0x364   : > { %v4573_v33 = vpop.permute.xlu0 %4572  ;;  %v5345_v48 = vmul.f32 %v4819_v14, %v10481_v11 }
 0x365   : > { %v5222_v41 = vmul.f32 %v4573_v33, %v10490_v53  ;;  %v11711_v53 = vld [vmem:[#allocation83_spill] sm:$0xff] }
 0x366   : > { %5602 = vst.msk [vmem:[%s8740_s6 + $0x788] sm:$0xff] %vm5360_vm1, %v5345_v48 }
 0x367   : > { %5479 = vst.msk [vmem:[%s8740_s6 + $0x3b0] sm:$0xff] %vm5360_vm1, %v5222_v41  ;;  %v4575_v55 = vpop.permute.xlu1 %4574 }
 0x368   : > { %v4829_v62 = vpop.permute.xlu0 %4828  ;;  %v5223_v18 = vmul.f32 %v4575_v55, %v10519_v45 }
 0x369   : > { %v5350_v13 = vmul.f32 %v4829_v62, %v11710_v36 }
 0x36a   : > { %5480 = vst.msk [vmem:[%s8740_s6 + $0x3b8] sm:$0xff] %vm5360_vm1, %v5223_v18 }
 0x36b   : > { %5607 = vst.msk [vmem:[%s8740_s6 + $0x7b0] sm:$0xff] %vm5360_vm1, %v5350_v13  ;;  %v4831_v1 = vpop.permute.xlu1 %4830 }
 0x36c   : > { %v4569_v11 = vpop.permute.xlu0 %4568  ;;  %v5351_v26 = vmul.f32 %v4831_v1, %v11711_v53 }
 0x36d   : > { %v5220_v8 = vmul.f32 %v4569_v11, %v11712_v3 }
 0x36e   : > { %5608 = vst.msk [vmem:[%s8740_s6 + $0x7b8] sm:$0xff] %vm5360_vm1, %v5351_v26 }
 0x36f   : > { %5477 = vst.msk [vmem:[%s8740_s6 + $0x3a0] sm:$0xff] %vm5360_vm1, %v5220_v8  ;;  %v4571_v32 = vpop.permute.xlu1 %4570 }
 0x370   : > { %v4825_v45 = vpop.permute.xlu0 %4824  ;;  %v5221_v51 = vmul.f32 %v4571_v32, %v10545_v43 }
 0x371   : > { %v5348_v19 = vmul.f32 %v4825_v45, %v10552_v63  ;;  %v11713_v63 = vld [vmem:[#allocation38_spill] sm:$0xff] }
 0x372   : > { %5478 = vst.msk [vmem:[%s8740_s6 + $0x3a8] sm:$0xff] %vm5360_vm1, %v5221_v51 }
 0x373   : > { %5605 = vst.msk [vmem:[%s8740_s6 + $0x7a0] sm:$0xff] %vm5360_vm1, %v5348_v19  ;;  %v4827_v12 = vpop.permute.xlu1 %4826 }
 0x374   : > { %v4581_v30 = vpop.permute.xlu0 %4580  ;;  %v5349_v47 = vmul.f32 %v4827_v12, %v10562_v2 }
 0x375   : > { %v5226_v58 = vmul.f32 %v4581_v30, %v10574_v56 }
 0x376   : > { %5606 = vst.msk [vmem:[%s8740_s6 + $0x7a8] sm:$0xff] %vm5360_vm1, %v5349_v47 }
 0x377   : > { %5483 = vst.msk [vmem:[%s8740_s6 + $0x3d0] sm:$0xff] %vm5360_vm1, %v5226_v58  ;;  %v4583_v16 = vpop.permute.xlu1 %4582 }
 0x378   : > { %v4837_v43 = vpop.permute.xlu0 %4836  ;;  %v5227_v31 = vmul.f32 %v4583_v16, %v11713_v63 }
 0x379   : > { %v5354_v17 = vmul.f32 %v4837_v43, %v10591_v29 }
 0x37a   : > { %5484 = vst.msk [vmem:[%s8740_s6 + $0x3d8] sm:$0xff] %vm5360_vm1, %v5227_v31 }
 0x37b   : > { %5611 = vst.msk [vmem:[%s8740_s6 + $0x7d0] sm:$0xff] %vm5360_vm1, %v5354_v17  ;;  %v4839_v25 = vpop.permute.xlu1 %4838 }
 0x37c   : > { %v4577_v2 = vpop.permute.xlu0 %4576  ;;  %v5355_v56 = vmul.f32 %v4839_v25, %v10614_v10 }
 0x37d   : > { %v5224_v40 = vmul.f32 %v4577_v2, %v11714_v7 }
 0x37e   : > { %5612 = vst.msk [vmem:[%s8740_s6 + $0x7d8] sm:$0xff] %vm5360_vm1, %v5355_v56 }
 0x37f   : > { %5481 = vst.msk [vmem:[%s8740_s6 + $0x3c0] sm:$0xff] %vm5360_vm1, %v5224_v40  ;;  %v4579_v35 = vpop.permute.xlu1 %4578 }
 0x380   : > { %v4833_v60 = vpop.permute.xlu0 %4832  ;;  %v5225_v29 = vmul.f32 %v4579_v35, %v10606_v57 }
 0x381   : > { %v5352_v61 = vmul.f32 %v4833_v60, %v10623_v52 }
 0x382   : > { %5482 = vst.msk [vmem:[%s8740_s6 + $0x3c8] sm:$0xff] %vm5360_vm1, %v5225_v29 }
 0x383   : > { %5609 = vst.msk [vmem:[%s8740_s6 + $0x7c0] sm:$0xff] %vm5360_vm1, %v5352_v61  ;;  %v4835_v49 = vpop.permute.xlu1 %4834 }
 0x384   : > { %v4589_v10 = vpop.permute.xlu0 %4588  ;;  %v5353_v0 = vmul.f32 %v4835_v49, %v10637_v38 }
 0x385   : > { %v5230_v5 = vmul.f32 %v4589_v10, %v10646_v42 }
 0x386   : > { %5610 = vst.msk [vmem:[%s8740_s6 + $0x7c8] sm:$0xff] %vm5360_vm1, %v5353_v0 }
 0x387   : > { %5487 = vst.msk [vmem:[%s8740_s6 + $0x3f0] sm:$0xff] %vm5360_vm1, %v5230_v5  ;;  %v4591_v44 = vpop.permute.xlu1 %4590 }
 0x388   : > { %v4585_v57 = vpop.permute.xlu0 %4584  ;;  %v5231_v52 = vmul.f32 %v4591_v44, %v10663_v9 }
 0x389   : > { %v5228_v34 = vmul.f32 %v4585_v57, %v10657_v6 }
 0x38a   : > { %5488 = vst.msk [vmem:[%s8740_s6 + $0x3f8] sm:$0xff] %vm5360_vm1, %v5231_v52 }
 0x38b   : > { %5485 = vst.msk [vmem:[%s8740_s6 + $0x3e0] sm:$0xff] %vm5360_vm1, %v5228_v34  ;;  %v4587_v38 = vpop.permute.xlu1 %4586 }
 0x38c   : > { %v4841_v24 = vpop.permute.xlu0 %4840  ;;  %v5229_v42 = vmul.f32 %v4587_v38, %v10672_v46 }
 0x38d   : > { %v5356_v22 = vmul.f32 %v4841_v24, %v10682_v15 }
 0x38e   : > { %5486 = vst.msk [vmem:[%s8740_s6 + $0x3e8] sm:$0xff] %vm5360_vm1, %v5229_v42 }
 0x38f   : > { %5613 = vst.msk [vmem:[%s8740_s6 + $0x7e0] sm:$0xff] %vm5360_vm1, %v5356_v22  ;;  %v4843_v37 = vpop.permute.xlu1 %4842 }
 0x390   : > { %v4845_v59 = vpop.permute.xlu0 %4844  ;;  %v5357_v9 = vmul.f32 %v4843_v37, %v10699_v4 }
 0x391   : > { %v5358_v6 = vmul.f32 %v4845_v59, %v10692_v39 }
 0x392   : > { %5614 = vst.msk [vmem:[%s8740_s6 + $0x7e8] sm:$0xff] %vm5360_vm1, %v5357_v9 }
 0x393   : > { %5615 = vst.msk [vmem:[%s8740_s6 + $0x7f0] sm:$0xff] %vm5360_vm1, %v5358_v6  ;;  %v4847_v21 = vpop.permute.xlu1 %4846 }
 0x394   : > { %v5359_v54 = vmul.f32 %v4847_v21, %v10708_v50 }
 0x396   : > { %5616 = vst.msk [vmem:[%s8740_s6 + $0x7f8] sm:$0xff] %vm5360_vm1, %v5359_v54 }
 0x397 PF: > { %s13_s12 = sadd.s32 1, %s7774_s12  }
 0x398   : > { %p10_p4 = scmp.ge.s32.totalorder %s13_s12, 4  }
 0x39a   :  { %12 = sbr.rel (!%p10_p4) target bundleno = 1 (0x1), region = 62 }

</bundles_post_ra>
